<compile_context>
chip_gen: v6e
topology: v6e:2x2x1
jax: 0.10.0
libtpu: 0.0.40
codegen_flags: <defaults>
</compile_context>

<pallas_src>
import functools

import jax
import jax.numpy as jnp
from jax import lax
from jax.experimental import pallas as pl
from jax.experimental.pallas import tpu as pltpu


_VMEM_LIMIT = 48 * 1024 * 1024
_BN_EPS = 1e-5


def _round_up(x, m):
    return ((x + m - 1) // m) * m


def _pick_tile(n, cap, mult):
    """Largest tile <= cap that is a multiple of `mult` and divides round_up(n, mult)."""
    npad = _round_up(max(n, 1), mult)
    t = min(cap, npad)
    t = (t // mult) * mult
    while t > mult and npad % t != 0:
        t -= mult
    return max(t, mult)


def _num_tensorcores():
    try:
        kind = (getattr(jax.devices()[0], "device_kind", "") or "").lower()
        if ("v7" in kind) or ("v4" in kind) or ("v5p" in kind):
            return 2
    except Exception:
        pass
    return 1


_MULTI_TC = _num_tensorcores() > 1


# ----------------------------------------------------------------------------
# Tiled matmul with fused BatchNorm-stats / tanh epilogue
# ----------------------------------------------------------------------------
def _mm_kernel(a_ref, b_ref, o_ref, *rest, act, with_stats):
    if with_stats:
        stats_ref, acc_ref = rest
    else:
        (acc_ref,) = rest

    @pl.when(pl.program_id(2) == 0)
    def _init():
        acc_ref[...] = jnp.zeros_like(acc_ref)

    acc_ref[...] += jnp.dot(a_ref[...], b_ref[...],
                            preferred_element_type=jnp.float32)

    @pl.when(pl.program_id(2) == pl.num_programs(2) - 1)
    def _finish():
        acc = acc_ref[...]
        if with_stats:
            stats_ref[...] = jnp.zeros_like(stats_ref)
            stats_ref[0:1, :] = jnp.sum(acc, axis=0, keepdims=True)
            stats_ref[1:2, :] = jnp.sum(acc * acc, axis=0, keepdims=True)
        out = jnp.tanh(acc) if act == "tanh" else acc
        o_ref[...] = out.astype(o_ref.dtype)


def pallas_matmul(a, b, *, act="none", with_stats=False, out_dtype=jnp.float32):
    """a: (M, K), b: (K, N) bf16 -> y: (M, N) `out_dtype`.

    Padded rows/cols are zero so they do not perturb the fused column statistics.
    With with_stats=True also returns (col_sum, col_sumsq) of the product, shape (N,).
    """
    M, K = a.shape
    K2, N = b.shape
    assert K == K2

    tm = _pick_tile(M, 512, 16)          # bf16: keep M tiles multiples of 16
    tk = _pick_tile(K, 2048, 128)        # large K tiles for weight-streaming layers
    tn = _pick_tile(N, 1024, 128)        # N < 128 is padded to a lane-dense 128
    Mp, Kp, Np = _round_up(M, tm), _round_up(K, tk), _round_up(N, tn)

    # Only split work when a second TensorCore can actually use it (v7x / megacore).
    if _MULTI_TC and (Mp // tm) * (Np // tn) < 2:
        if tn >= 256:
            tn //= 2
        elif tm >= 32:
            tm //= 2

    gi, gj, gk = Mp // tm, Np // tn, Kp // tk

    a_p = a if (Mp == M and Kp == K) else jnp.pad(a, ((0, Mp - M), (0, Kp - K)))
    b_p = b if (Kp == K and Np == N) else jnp.pad(b, ((0, Kp - K), (0, Np - N)))

    out_shape = [jax.ShapeDtypeStruct((Mp, Np), out_dtype)]
    out_specs = [pl.BlockSpec((tm, tn), lambda i, j, k: (i, j))]
    if with_stats:
        # (8, tn) block per (M, N) tile: row 0 = column sums, row 1 = sum of squares.
        out_shape.append(jax.ShapeDtypeStruct((gi * 8, Np), jnp.float32))
        out_specs.append(pl.BlockSpec((8, tn), lambda i, j, k: (i, j)))

    res = pl.pallas_call(
        functools.partial(_mm_kernel, act=act, with_stats=with_stats),
        out_shape=tuple(out_shape) if with_stats else out_shape[0],
        grid_spec=pltpu.PrefetchScalarGridSpec(
            num_scalar_prefetch=0,
            grid=(gi, gj, gk),
            in_specs=[
                pl.BlockSpec((tm, tk), lambda i, j, k: (i, k)),
                pl.BlockSpec((tk, tn), lambda i, j, k: (k, j)),
            ],
            out_specs=tuple(out_specs) if with_stats else out_specs[0],
            scratch_shapes=[pltpu.VMEM((tm, tn), jnp.float32)],
        ),
        compiler_params=pltpu.CompilerParams(
            dimension_semantics=("parallel", "parallel", "arbitrary"),
            vmem_limit_bytes=_VMEM_LIMIT),
    )(a_p, b_p)

    if with_stats:
        y, stats = res
        st = stats.reshape(gi, 8, Np)
        return y[:M, :N], (st[:, 0, :N].sum(axis=0), st[:, 1, :N].sum(axis=0))
    return res[:M, :N]


# ----------------------------------------------------------------------------
# Fused BatchNorm normalize + activation (f32 math, bf16 in/out)
# ----------------------------------------------------------------------------
def _bn_act_kernel(y_ref, scale_ref, shift_ref, o_ref, *, act):
    y = y_ref[...].astype(jnp.float32) * scale_ref[...] + shift_ref[...]
    if act == "relu":
        y = jnp.maximum(y, 0.0)
    elif act == "tanh":
        y = jnp.tanh(y)
    o_ref[...] = y.astype(o_ref.dtype)


def pallas_bn_act(y, scale, shift, act, out_dtype=jnp.bfloat16):
    """y: (M, C); scale/shift: (C,).  Returns act(y * scale + shift) as bf16."""
    M, C = y.shape
    tm = _pick_tile(M, 1024, 16)
    tc = C if C < 128 else _pick_tile(C, 1024, 128)
    Mp, Cp = _round_up(M, tm), _round_up(C, tc)

    y_p = y if (Mp == M and Cp == C) else jnp.pad(y, ((0, Mp - M), (0, Cp - C)))
    sc = scale.reshape(1, C).astype(jnp.float32)
    sh = shift.reshape(1, C).astype(jnp.float32)
    if Cp != C:
        sc = jnp.pad(sc, ((0, 0), (0, Cp - C)))
        sh = jnp.pad(sh, ((0, 0), (0, Cp - C)))

    out = pl.pallas_call(
        functools.partial(_bn_act_kernel, act=act),
        out_shape=jax.ShapeDtypeStruct((Mp, Cp), out_dtype),
        grid_spec=pltpu.PrefetchScalarGridSpec(
            num_scalar_prefetch=0,
            grid=(Mp // tm, Cp // tc),
            in_specs=[
                pl.BlockSpec((tm, tc), lambda i, j: (i, j)),
                pl.BlockSpec((1, tc), lambda i, j: (0, j)),
                pl.BlockSpec((1, tc), lambda i, j: (0, j)),
            ],
            out_specs=pl.BlockSpec((tm, tc), lambda i, j: (i, j)),
        ),
        compiler_params=pltpu.CompilerParams(
            dimension_semantics=("parallel", "parallel"),
            vmem_limit_bytes=_VMEM_LIMIT),
    )(y_p, sc, sh)
    return out[:M, :C]


# ----------------------------------------------------------------------------
# Fused stride-2 ConvTranspose2d kernel (no HBM im2col): padded activation stays
# resident in VMEM, 2x2 tap windows are read in-kernel, all 4 sub-pixel phases
# computed per invocation.  Requires W % 8 == 0 (sublane-aligned row merge).
# ----------------------------------------------------------------------------
def _fused_ct2_kernel(x_ref, w_ref, o_ref, *rest, wd, th, act, with_stats):
    if with_stats:
        stats_ref, acc_ref = rest
    else:
        (acc_ref,) = rest
    cp = o_ref.shape[-1]
    h0 = pl.program_id(1) * th
    if with_stats:
        col_sum = jnp.zeros((1, cp), jnp.float32)
        col_sq = jnp.zeros((1, cp), jnp.float32)
    for p in range(4):                       # output phase (py, px)
        py, px = p // 2, p % 2
        acc_ref[...] = jnp.zeros_like(acc_ref)
        for t in range(4):                   # 2x2 tap (dy, dx)
            dy, dx = t // 2, t % 2
            a = x_ref[0, pl.ds(h0 + py + dy, th), pl.ds(px + dx, wd), :]
            a = a.reshape(th * wd, a.shape[-1])
            acc_ref[...] += jnp.dot(a, w_ref[p * 4 + t],
                                    preferred_element_type=jnp.float32)
        acc = acc_ref[...]
        if with_stats:
            col_sum = col_sum + jnp.sum(acc, axis=0, keepdims=True)
            col_sq = col_sq + jnp.sum(acc * acc, axis=0, keepdims=True)
        out = jnp.tanh(acc) if act == "tanh" else acc
        o_ref[p, 0] = out.astype(o_ref.dtype)
    if with_stats:
        stats_ref[...] = jnp.zeros_like(stats_ref)
        stats_ref[0, 0:1, :] = col_sum
        stats_ref[0, 1:2, :] = col_sq


def _pick_th(h, w, cap_rows=4096):
    best = 1
    for cand in range(1, h + 1):
        if h % cand == 0 and cand * w <= cap_rows:
            best = cand
    return best


def _fused_conv_call(xpad, w16, *, th, act, with_stats):
    B, Hp2, Wp2, Cin = xpad.shape
    H, W = Hp2 - 2, Wp2 - 2
    Cp = w16.shape[-1]
    nh = H // th

    out_shape = [jax.ShapeDtypeStruct((4, B, H * W, Cp), jnp.bfloat16)]
    out_specs = [pl.BlockSpec((4, 1, th * W, Cp), lambda b, h: (0, b, h, 0))]
    if with_stats:
        out_shape.append(jax.ShapeDtypeStruct((B, nh * 8, Cp), jnp.float32))
        out_specs.append(pl.BlockSpec((1, 8, Cp), lambda b, h: (b, h, 0)))

    res = pl.pallas_call(
        functools.partial(_fused_ct2_kernel, wd=W, th=th, act=act,
                          with_stats=with_stats),
        out_shape=tuple(out_shape) if with_stats else out_shape[0],
        grid_spec=pltpu.PrefetchScalarGridSpec(
            num_scalar_prefetch=0,
            grid=(B, nh),
            in_specs=[
                pl.BlockSpec((1, Hp2, Wp2, Cin), lambda b, h: (b, 0, 0, 0)),
                pl.BlockSpec((16, Cin, Cp), lambda b, h: (0, 0, 0)),
            ],
            out_specs=tuple(out_specs) if with_stats else out_specs[0],
            scratch_shapes=[pltpu.VMEM((th * W, Cp), jnp.float32)],
        ),
        compiler_params=pltpu.CompilerParams(
            dimension_semantics=("parallel", "arbitrary"),
            vmem_limit_bytes=_VMEM_LIMIT),
    )(xpad, w16)

    if with_stats:
        y, st = res
        st = st.reshape(B, nh, 8, Cp)
        return y, (st[:, :, 0, :].sum(axis=(0, 1)), st[:, :, 1, :].sum(axis=(0, 1)))
    return res, None


def _probe_fused():
    """Compile/run the fused kernel at a tiny shape; fall back to patches on failure."""
    try:
        x = jnp.zeros((1, 16, 16, 64), jnp.bfloat16)
        w16 = jnp.zeros((16, 64, 128), jnp.bfloat16)
        xpad = jnp.pad(x, ((0, 0), (1, 1), (1, 1), (0, 0)))
        y, _ = _fused_conv_call(xpad, w16, th=8, act="none", with_stats=True)
        jax.block_until_ready(y)
        return True
    except Exception:
        return False


# ----------------------------------------------------------------------------
# Layer wrappers (JAX glue does only cheap pad / interleave moves)
# ----------------------------------------------------------------------------
def _bn_scale_shift(col_sum, col_sq, count):
    """Training-mode BatchNorm (biased var, eps=1e-5, gamma=1, beta=0)."""
    mean = col_sum / count
    var = jnp.maximum(col_sq / count - mean * mean, 0.0)
    inv = lax.rsqrt(var + _BN_EPS)
    return inv, -mean * inv


def conv_t2_fused(x, w16, cout, *, use_bn, act):
    """ConvTranspose2d(k=4, s=2, p=1) [+BN] + act via the fused kernel (W % 8 == 0)."""
    B, H, Wd, _ = x.shape
    Cp = w16.shape[-1]
    xpad = jnp.pad(x, ((0, 0), (1, 1), (1, 1), (0, 0)))
    th = _pick_th(H, Wd)
    y, stats = _fused_conv_call(xpad, w16, th=th,
                                act=("none" if use_bn else act),
                                with_stats=use_bn)
    if use_bn:
        col_sum, col_sq = stats
        scale, shift = _bn_scale_shift(col_sum, col_sq, 4 * B * H * Wd)
        y = pallas_bn_act(y.reshape(4 * B * H * Wd, Cp), scale, shift, act)
        y = y.reshape(4, B, H * Wd, Cp)
    y = y[..., :cout].reshape(2, 2, B, H, Wd, cout)
    return y.transpose(2, 3, 0, 4, 1, 5).reshape(B, 2 * H, 2 * Wd, cout)


def conv_t2_patches(x, w_phases, *, use_bn, act):
    """ConvTranspose2d(k=4, s=2, p=1) [+BN] + act via im2col patches + tiled matmul."""
    B, H, Wd, Cin = x.shape
    cout = w_phases[0].shape[1]
    M = B * H * Wd
    xpad = jnp.pad(x, ((0, 0), (1, 1), (1, 1), (0, 0)))

    ys, tot_sum, tot_sq = [], 0.0, 0.0
    for p, (py, px) in enumerate(((0, 0), (0, 1), (1, 0), (1, 1))):
        patches = jnp.concatenate(
            [xpad[:, py + dy:py + dy + H, px + dx:px + dx + Wd, :]
             for dy in range(2) for dx in range(2)],
            axis=-1).reshape(M, 4 * Cin)
        if use_bn:
            y, (s, q) = pallas_matmul(patches, w_phases[p], with_stats=True,
                                      out_dtype=jnp.bfloat16)
            tot_sum, tot_sq = tot_sum + s, tot_sq + q
        else:
            y = pallas_matmul(patches, w_phases[p], act=act, out_dtype=jnp.bfloat16)
        ys.append(y)

    if use_bn:
        scale, shift = _bn_scale_shift(tot_sum, tot_sq, 4 * M)
        ys = [pallas_bn_act(y, scale, shift, act) for y in ys]

    phases = jnp.stack([y.reshape(B, H, Wd, cout) for y in ys], axis=0)
    phases = phases.reshape(2, 2, B, H, Wd, cout)
    return phases.transpose(2, 3, 0, 4, 1, 5).reshape(B, 2 * H, 2 * Wd, cout)


def conv_t1_full(x, Wm):
    """ConvTranspose2d(k=4, s=1, p=0) + BatchNorm2d + ReLU  (4x4 -> 7x7)."""
    B, H, Wd, Cin = x.shape
    k = 4
    OH, OW = H + k - 1, Wd + k - 1
    cout = Wm.shape[1]
    M = B * OH * OW
    q = k - 1
    xpad = jnp.pad(x, ((0, 0), (q, q), (q, q), (0, 0)))
    patches = jnp.concatenate(
        [xpad[:, ky:ky + OH, kx:kx + OW, :] for ky in range(k) for kx in range(k)],
        axis=-1).reshape(M, k * k * Cin)
    y, (s, sq) = pallas_matmul(patches, Wm, with_stats=True, out_dtype=jnp.bfloat16)
    scale, shift = _bn_scale_shift(s, sq, M)
    a = pallas_bn_act(y, scale, shift, "relu")
    return a.reshape(B, OH, OW, cout)


# ----------------------------------------------------------------------------
# Generator_256: config, params, one-time weight prep, forward
# ----------------------------------------------------------------------------
def generator_256_config(latent_dim, channels=3):
    # (Cin, Cout, stride, padding) per ConvTranspose2d(k=4, bias=False)
    return [
        (latent_dim, 2048, 1, 0),
        (2048, 1024, 1, 0),
        (1024, 512, 2, 1),
        (512, 256, 2, 1),
        (256, 128, 2, 1),
        (128, 64, 2, 1),
        (64, channels, 2, 1),
    ]


def init_generator_256_params(key, latent_dim, channels=3):
    """DCGAN-style init: W ~ N(0, 0.02^2), PyTorch layout (Cin, Cout, 4, 4)."""
    params = []
    for (cin, cout, _, _) in generator_256_config(latent_dim, channels):
        key, sub = jax.random.split(key)
        params.append(0.02 * jax.random.normal(sub, (cin, cout, 4, 4), jnp.float32))
    return params


def prepare_params(params, latent_dim, channels=3, use_fused=True):
    """One-time weight packing to bf16 matmul layouts (hoisted out of the forward)."""
    cfg = generator_256_config(latent_dim, channels)
    prepped = []
    # layer 0: 1x1 input -> (latent, 16*Cout)
    prepped.append(params[0].transpose(0, 2, 3, 1)
                   .reshape(latent_dim, 16 * cfg[0][1]).astype(jnp.bfloat16))
    # layer 1: full k=4 transposed conv -> (16*Cin, Cout) with flipped kernel
    Wf1 = params[1][:, :, ::-1, ::-1]
    prepped.append(Wf1.transpose(2, 3, 0, 1)
                   .reshape(16 * cfg[1][0], cfg[1][1]).astype(jnp.bfloat16))
    spatial = 7
    for i in range(2, len(cfg)):
        cin, cout = cfg[i][0], cfg[i][1]
        Wf = params[i][:, :, ::-1, ::-1]
        if use_fused and spatial % 8 == 0:
            cp = max(_round_up(cout, 128), 128)
            mats = []
            for py in range(2):
                for px in range(2):
                    for dy in range(2):
                        for dx in range(2):
                            mats.append(Wf[:, :, py + 2 * dy, px + 2 * dx])
            Wm = jnp.stack(mats, axis=0)                      # (16, Cin, Cout)
            if cp != cout:
                Wm = jnp.pad(Wm, ((0, 0), (0, 0), (0, cp - cout)))
            prepped.append(Wm.astype(jnp.bfloat16))
        else:
            phase_mats = []
            for py in range(2):
                for px in range(2):
                    Wsub = Wf[:, :, py::2, px::2]             # (Cin, Cout, 2, 2)
                    phase_mats.append(Wsub.transpose(2, 3, 0, 1)
                                      .reshape(4 * cin, cout).astype(jnp.bfloat16))
            prepped.append(phase_mats)
        spatial *= 2
    return prepped


def generator_256_forward(z, prepped, latent_dim, channels=3):
    """z: (B, latent_dim) -> image (B, channels, 224, 224), NCHW float32."""
    cfg = generator_256_config(latent_dim, channels)
    B = z.shape[0]
    c0 = cfg[0][1]

    # layer 0: 1x1 -> 4x4 (+ BN + ReLU; tiny stats done in plain JAX)
    y = pallas_matmul(z.astype(jnp.bfloat16), prepped[0])       # (B, 16*c0) f32
    y = y.reshape(B * 16, c0)
    m1 = jnp.mean(y, axis=0)
    m2 = jnp.mean(y * y, axis=0)
    var = jnp.maximum(m2 - m1 * m1, 0.0)
    inv = lax.rsqrt(var + _BN_EPS)
    x = pallas_bn_act(y, inv, -m1 * inv, "relu").reshape(B, 4, 4, c0)

    # layer 1: 4x4 -> 7x7
    x = conv_t1_full(x, prepped[1])

    # layers 2..6: stride-2 transposed convs
    n = len(cfg)
    for i in range(2, n):
        last = (i == n - 1)
        use_bn = not last
        act = "tanh" if last else "relu"
        wi = prepped[i]
        if isinstance(wi, (list, tuple)):
            x = conv_t2_patches(x, wi, use_bn=use_bn, act=act)
        else:
            x = conv_t2_fused(x, wi, cfg[i][1], use_bn=use_bn, act=act)

    return x.transpose(0, 3, 1, 2).astype(jnp.float32)          # NHWC -> NCHW


# ----------------------------------------------------------------------------
# Pure-JAX f32 reference (PyTorch semantics) for an in-script correctness check
# ----------------------------------------------------------------------------
def _ref_conv_transpose(x, W, s, p):
    B, Ci, H, Wd = x.shape
    Co, k = W.shape[1], W.shape[2]
    Hf, Wf = (H - 1) * s + k, (Wd - 1) * s + k
    t = jnp.einsum('bihw,iokl->bohwkl', x, W, precision=lax.Precision.HIGHEST)
    out = jnp.zeros((B, Co, Hf, Wf), jnp.float32)
    for ky in range(k):
        for kx in range(k):
            out = out.at[:, :, ky:ky + (H - 1) * s + 1:s,
                               kx:kx + (Wd - 1) * s + 1:s].add(t[..., ky, kx])
    OH, OW = (H - 1) * s - 2 * p + k, (Wd - 1) * s - 2 * p + k
    return out[:, :, p:p + OH, p:p + OW]


def generator_256_reference(z, params, latent_dim, channels=3):
    cfg = generator_256_config(latent_dim, channels)
    x = z.reshape(-1, latent_dim, 1, 1).astype(jnp.float32)
    n = len(cfg)
    for i, (W, (_, _, s, p)) in enumerate(zip(params, cfg)):
        x = _ref_conv_transpose(x, W, s, p)
        if i < n - 1:
            mean = x.mean(axis=(0, 2, 3), keepdims=True)
            var = ((x - mean) ** 2).mean(axis=(0, 2, 3), keepdims=True)
            x = jnp.maximum((x - mean) * lax.rsqrt(var + _BN_EPS), 0.0)
        else:
            x = jnp.tanh(x)
    return x


# ----------------------------------------------------------------------------
if __name__ == "__main__":
    LATENT_DIM = 128
    CHANNELS = 3
    BATCH = 2

    key = jax.random.PRNGKey(0)
    kz, kp = jax.random.split(key)
    z = jax.random.normal(kz, (BATCH, LATENT_DIM), jnp.float32)
    params = init_generator_256_params(kp, LATENT_DIM, CHANNELS)

    use_fused = _probe_fused()

    prep_fn = jax.jit(functools.partial(prepare_params, latent_dim=LATENT_DIM,
                                        channels=CHANNELS, use_fused=use_fused))
    prepped = jax.block_until_ready(prep_fn(params))

    fwd = jax.jit(functools.partial(generator_256_forward,
                                    latent_dim=LATENT_DIM, channels=CHANNELS))
    out = jax.block_until_ready(fwd(z, prepped))

    assert out.shape == (BATCH, CHANNELS, 224, 224), out.shape
    assert out.dtype == jnp.float32
    assert bool(jnp.all(jnp.isfinite(out)))
    assert bool(jnp.all(jnp.abs(out) <= 1.0 + 1e-5))      # tanh output range

    # Cross-check the Pallas pipeline against a pure-JAX f32 reference.  bf16
    # operands give small elementwise drift; a structural bug (wrong sub-pixel
    # decomposition / weight packing) would produce O(1) errors.
    ref_fn = jax.jit(functools.partial(generator_256_reference,
                                       latent_dim=LATENT_DIM, channels=CHANNELS))
    ref = jax.block_until_ready(ref_fn(z, params))
    max_diff = float(jnp.max(jnp.abs(out - ref)))
    assert max_diff < 0.2, max_diff

    print("KERNEL_OK")
</pallas_src>

<mosaic_0001>
module attributes {stable_mosaic.version = 11 : i64} {
  func.func @_fused_ct2_kernel(%arg0: i32, %arg1: i32, %arg2: memref<1x18x18x64xbf16, #tpu.memory_space<vmem>>, %arg3: memref<16x64x128xbf16, #tpu.memory_space<vmem>>, %arg4: memref<4x1x128x128xbf16, #tpu.memory_space<vmem>>, %arg5: memref<1x8x128xf32, #tpu.memory_space<vmem>>, %arg6: memref<128x128xf32, #tpu.memory_space<vmem>>) attributes {dimension_semantics = [#tpu.dimension_semantics<parallel>, #tpu.dimension_semantics<arbitrary>], iteration_bounds = array<i64: 1, 2>, scalar_prefetch = 0 : i64, scratch_operands = 1 : i64, tpu.core_type = #tpu.core_type<tc>, window_params = [{transform_indices = @transform_0, window_bounds = array<i64: 1, 18, 18, 64>}, {pipeline_mode = #tpu.pipeline_mode<synchronous>, transform_indices = @transform_1, window_bounds = array<i64: 16, 64, 128>}, {transform_indices = @transform_2, window_bounds = array<i64: 4, 1, 128, 128>}, {transform_indices = @transform_3, window_bounds = array<i64: 1, 8, 128>}]} {
    %c8_i32 = arith.constant 8 : i32
    %0 = arith.muli %arg1, %c8_i32 : i32
    %cst = arith.constant 0.000000e+00 : f32
    %1 = vector.broadcast %cst : f32 to vector<1x128xf32>
    %cst_0 = arith.constant 0.000000e+00 : f32
    %2 = vector.broadcast %cst_0 : f32 to vector<1x128xf32>
    %cst_1 = arith.constant 0.000000e+00 : f32
    %3 = vector.broadcast %cst_1 : f32 to vector<128x128xf32>
    %c0 = arith.constant 0 : index
    %c0_2 = arith.constant 0 : index
    %4 = vector.load %arg6[%c0, %c0_2] : memref<128x128xf32, #tpu.memory_space<vmem>>, vector<128x128xf32>
    tpu.vector_store %arg6[%c0, %c0_2], %3 {strides = array<i32>} : memref<128x128xf32, #tpu.memory_space<vmem>>, vector<128x128xf32>,
    %c0_i32 = arith.constant 0 : i32
    %5 = arith.addi %0, %c0_i32 : i32
    %c0_i32_3 = arith.constant 0 : i32
    %6 = arith.addi %5, %c0_i32_3 : i32
    %c0_4 = arith.constant 0 : index
    %7 = arith.index_cast %6 : i32 to index
    %c0_5 = arith.constant 0 : index
    %c0_6 = arith.constant 0 : index
    %8 = vector.load %arg2[%c0_4, %7, %c0_5, %c0_6] : memref<1x18x18x64xbf16, #tpu.memory_space<vmem>>, vector<1x8x16x64xbf16>
    %9 = vector.shape_cast %8 : vector<1x8x16x64xbf16> to vector<8x16x64xbf16>
    %10 = vector.shape_cast %9 : vector<8x16x64xbf16> to vector<128x64xbf16>
    %c0_7 = arith.constant 0 : index
    %c0_8 = arith.constant 0 : index
    %11 = vector.load %arg6[%c0_7, %c0_8] : memref<128x128xf32, #tpu.memory_space<vmem>>, vector<128x128xf32>
    %c0_9 = arith.constant 0 : index
    %c0_10 = arith.constant 0 : index
    %c0_11 = arith.constant 0 : index
    %12 = vector.load %arg3[%c0_9, %c0_10, %c0_11] : memref<16x64x128xbf16, #tpu.memory_space<vmem>>, vector<1x64x128xbf16>
    %13 = vector.shape_cast %12 : vector<1x64x128xbf16> to vector<64x128xbf16>
    %cst_12 = arith.constant dense<0.000000e+00> : vector<128x128xf32>
    %14 = tpu.matmul %10, %13, %cst_12 {dimension_numbers = #tpu.dot_dimension_numbers<[1], [0], [0], [1], [0, 0, 1, 1], [], []>} : vector<128x64xbf16>, vector<64x128xbf16>, vector<128x128xf32> -> vector<128x128xf32>
    %15 = arith.addf %11, %14 : vector<128x128xf32>
    %c0_13 = arith.constant 0 : index
    %c0_14 = arith.constant 0 : index
    %16 = vector.load %arg6[%c0_13, %c0_14] : memref<128x128xf32, #tpu.memory_space<vmem>>, vector<128x128xf32>
    tpu.vector_store %arg6[%c0_13, %c0_14], %15 {strides = array<i32>} : memref<128x128xf32, #tpu.memory_space<vmem>>, vector<128x128xf32>,
    %c0_i32_15 = arith.constant 0 : i32
    %17 = arith.addi %0, %c0_i32_15 : i32
    %c0_i32_16 = arith.constant 0 : i32
    %18 = arith.addi %17, %c0_i32_16 : i32
    %c0_17 = arith.constant 0 : index
    %19 = arith.index_cast %18 : i32 to index
    %c1 = arith.constant 1 : index
    %c0_18 = arith.constant 0 : index
    %20 = vector.load %arg2[%c0_17, %19, %c1, %c0_18] : memref<1x18x18x64xbf16, #tpu.memory_space<vmem>>, vector<1x8x16x64xbf16>
    %21 = vector.shape_cast %20 : vector<1x8x16x64xbf16> to vector<8x16x64xbf16>
    %22 = vector.shape_cast %21 : vector<8x16x64xbf16> to vector<128x64xbf16>
    %c0_19 = arith.constant 0 : index
    %c0_20 = arith.constant 0 : index
    %23 = vector.load %arg6[%c0_19, %c0_20] : memref<128x128xf32, #tpu.memory_space<vmem>>, vector<128x128xf32>
    %c1_21 = arith.constant 1 : index
    %c0_22 = arith.constant 0 : index
    %c0_23 = arith.constant 0 : index
    %24 = vector.load %arg3[%c1_21, %c0_22, %c0_23] : memref<16x64x128xbf16, #tpu.memory_space<vmem>>, vector<1x64x128xbf16>
    %25 = vector.shape_cast %24 : vector<1x64x128xbf16> to vector<64x128xbf16>
    %cst_24 = arith.constant dense<0.000000e+00> : vector<128x128xf32>
    %26 = tpu.matmul %22, %25, %cst_24 {dimension_numbers = #tpu.dot_dimension_numbers<[1], [0], [0], [1], [0, 0, 1, 1], [], []>} : vector<128x64xbf16>, vector<64x128xbf16>, vector<128x128xf32> -> vector<128x128xf32>
    %27 = arith.addf %23, %26 : vector<128x128xf32>
    %c0_25 = arith.constant 0 : index
    %c0_26 = arith.constant 0 : index
    %28 = vector.load %arg6[%c0_25, %c0_26] : memref<128x128xf32, #tpu.memory_space<vmem>>, vector<128x128xf32>
    tpu.vector_store %arg6[%c0_25, %c0_26], %27 {strides = array<i32>} : memref<128x128xf32, #tpu.memory_space<vmem>>, vector<128x128xf32>,
    %c0_i32_27 = arith.constant 0 : i32
    %29 = arith.addi %0, %c0_i32_27 : i32
    %c1_i32 = arith.constant 1 : i32
    %30 = arith.addi %29, %c1_i32 : i32
    %c0_28 = arith.constant 0 : index
    %31 = arith.index_cast %30 : i32 to index
    %c0_29 = arith.constant 0 : index
    %c0_30 = arith.constant 0 : index
    %32 = vector.load %arg2[%c0_28, %31, %c0_29, %c0_30] : memref<1x18x18x64xbf16, #tpu.memory_space<vmem>>, vector<1x8x16x64xbf16>
    %33 = vector.shape_cast %32 : vector<1x8x16x64xbf16> to vector<8x16x64xbf16>
    %34 = vector.shape_cast %33 : vector<8x16x64xbf16> to vector<128x64xbf16>
    %c0_31 = arith.constant 0 : index
    %c0_32 = arith.constant 0 : index
    %35 = vector.load %arg6[%c0_31, %c0_32] : memref<128x128xf32, #tpu.memory_space<vmem>>, vector<128x128xf32>
    %c2 = arith.constant 2 : index
    %c0_33 = arith.constant 0 : index
    %c0_34 = arith.constant 0 : index
    %36 = vector.load %arg3[%c2, %c0_33, %c0_34] : memref<16x64x128xbf16, #tpu.memory_space<vmem>>, vector<1x64x128xbf16>
    %37 = vector.shape_cast %36 : vector<1x64x128xbf16> to vector<64x128xbf16>
    %cst_35 = arith.constant dense<0.000000e+00> : vector<128x128xf32>
    %38 = tpu.matmul %34, %37, %cst_35 {dimension_numbers = #tpu.dot_dimension_numbers<[1], [0], [0], [1], [0, 0, 1, 1], [], []>} : vector<128x64xbf16>, vector<64x128xbf16>, vector<128x128xf32> -> vector<128x128xf32>
    %39 = arith.addf %35, %38 : vector<128x128xf32>
    %c0_36 = arith.constant 0 : index
    %c0_37 = arith.constant 0 : index
    %40 = vector.load %arg6[%c0_36, %c0_37] : memref<128x128xf32, #tpu.memory_space<vmem>>, vector<128x128xf32>
    tpu.vector_store %arg6[%c0_36, %c0_37], %39 {strides = array<i32>} : memref<128x128xf32, #tpu.memory_space<vmem>>, vector<128x128xf32>,
    %c0_i32_38 = arith.constant 0 : i32
    %41 = arith.addi %0, %c0_i32_38 : i32
    %c1_i32_39 = arith.constant 1 : i32
    %42 = arith.addi %41, %c1_i32_39 : i32
    %c0_40 = arith.constant 0 : index
    %43 = arith.index_cast %42 : i32 to index
    %c1_41 = arith.constant 1 : index
    %c0_42 = arith.constant 0 : index
    %44 = vector.load %arg2[%c0_40, %43, %c1_41, %c0_42] : memref<1x18x18x64xbf16, #tpu.memory_space<vmem>>, vector<1x8x16x64xbf16>
    %45 = vector.shape_cast %44 : vector<1x8x16x64xbf16> to vector<8x16x64xbf16>
    %46 = vector.shape_cast %45 : vector<8x16x64xbf16> to vector<128x64xbf16>
    %c0_43 = arith.constant 0 : index
    %c0_44 = arith.constant 0 : index
    %47 = vector.load %arg6[%c0_43, %c0_44] : memref<128x128xf32, #tpu.memory_space<vmem>>, vector<128x128xf32>
    %c3 = arith.constant 3 : index
    %c0_45 = arith.constant 0 : index
    %c0_46 = arith.constant 0 : index
    %48 = vector.load %arg3[%c3, %c0_45, %c0_46] : memref<16x64x128xbf16, #tpu.memory_space<vmem>>, vector<1x64x128xbf16>
    %49 = vector.shape_cast %48 : vector<1x64x128xbf16> to vector<64x128xbf16>
    %cst_47 = arith.constant dense<0.000000e+00> : vector<128x128xf32>
    %50 = tpu.matmul %46, %49, %cst_47 {dimension_numbers = #tpu.dot_dimension_numbers<[1], [0], [0], [1], [0, 0, 1, 1], [], []>} : vector<128x64xbf16>, vector<64x128xbf16>, vector<128x128xf32> -> vector<128x128xf32>
    %51 = arith.addf %47, %50 : vector<128x128xf32>
    %c0_48 = arith.constant 0 : index
    %c0_49 = arith.constant 0 : index
    %52 = vector.load %arg6[%c0_48, %c0_49] : memref<128x128xf32, #tpu.memory_space<vmem>>, vector<128x128xf32>
    tpu.vector_store %arg6[%c0_48, %c0_49], %51 {strides = array<i32>} : memref<128x128xf32, #tpu.memory_space<vmem>>, vector<128x128xf32>,
    %c0_50 = arith.constant 0 : index
    %c0_51 = arith.constant 0 : index
    %53 = vector.load %arg6[%c0_50, %c0_51] : memref<128x128xf32, #tpu.memory_space<vmem>>, vector<128x128xf32>
    %cst_52 = arith.constant dense<0.000000e+00> : vector<128xf32>
    %54 = vector.multi_reduction <add>, %53, %cst_52 [0] : vector<128x128xf32> to vector<128xf32>
    %55 = vector.shape_cast %54 : vector<128xf32> to vector<1x128xf32>
    %56 = arith.addf %1, %55 : vector<1x128xf32>
    %57 = arith.mulf %53, %53 : vector<128x128xf32>
    %cst_53 = arith.constant dense<0.000000e+00> : vector<128xf32>
    %58 = vector.multi_reduction <add>, %57, %cst_53 [0] : vector<128x128xf32> to vector<128xf32>
    %59 = vector.shape_cast %58 : vector<128xf32> to vector<1x128xf32>
    %60 = arith.addf %2, %59 : vector<1x128xf32>
    %61 = arith.truncf %53 : vector<128x128xf32> to vector<128x128xbf16>
    %c0_54 = arith.constant 0 : index
    %c0_55 = arith.constant 0 : index
    %c0_56 = arith.constant 0 : index
    %c0_57 = arith.constant 0 : index
    %62 = vector.load %arg4[%c0_54, %c0_55, %c0_56, %c0_57] : memref<4x1x128x128xbf16, #tpu.memory_space<vmem>>, vector<1x1x128x128xbf16>
    %63 = vector.shape_cast %62 : vector<1x1x128x128xbf16> to vector<128x128xbf16>
    %64 = vector.shape_cast %61 : vector<128x128xbf16> to vector<1x1x128x128xbf16>
    tpu.vector_store %arg4[%c0_54, %c0_55, %c0_56, %c0_57], %64 {strides = array<i32>} : memref<4x1x128x128xbf16, #tpu.memory_space<vmem>>, vector<1x1x128x128xbf16>,
    %cst_58 = arith.constant 0.000000e+00 : f32
    %65 = vector.broadcast %cst_58 : f32 to vector<128x128xf32>
    %c0_59 = arith.constant 0 : index
    %c0_60 = arith.constant 0 : index
    %66 = vector.load %arg6[%c0_59, %c0_60] : memref<128x128xf32, #tpu.memory_space<vmem>>, vector<128x128xf32>
    tpu.vector_store %arg6[%c0_59, %c0_60], %65 {strides = array<i32>} : memref<128x128xf32, #tpu.memory_space<vmem>>, vector<128x128xf32>,
    %c0_i32_61 = arith.constant 0 : i32
    %67 = arith.addi %0, %c0_i32_61 : i32
    %c0_i32_62 = arith.constant 0 : i32
    %68 = arith.addi %67, %c0_i32_62 : i32
    %c0_63 = arith.constant 0 : index
    %69 = arith.index_cast %68 : i32 to index
    %c1_64 = arith.constant 1 : index
    %c0_65 = arith.constant 0 : index
    %70 = vector.load %arg2[%c0_63, %69, %c1_64, %c0_65] : memref<1x18x18x64xbf16, #tpu.memory_space<vmem>>, vector<1x8x16x64xbf16>
    %71 = vector.shape_cast %70 : vector<1x8x16x64xbf16> to vector<8x16x64xbf16>
    %72 = vector.shape_cast %71 : vector<8x16x64xbf16> to vector<128x64xbf16>
    %c0_66 = arith.constant 0 : index
    %c0_67 = arith.constant 0 : index
    %73 = vector.load %arg6[%c0_66, %c0_67] : memref<128x128xf32, #tpu.memory_space<vmem>>, vector<128x128xf32>
    %c4 = arith.constant 4 : index
    %c0_68 = arith.constant 0 : index
    %c0_69 = arith.constant 0 : index
    %74 = vector.load %arg3[%c4, %c0_68, %c0_69] : memref<16x64x128xbf16, #tpu.memory_space<vmem>>, vector<1x64x128xbf16>
    %75 = vector.shape_cast %74 : vector<1x64x128xbf16> to vector<64x128xbf16>
    %cst_70 = arith.constant dense<0.000000e+00> : vector<128x128xf32>
    %76 = tpu.matmul %72, %75, %cst_70 {dimension_numbers = #tpu.dot_dimension_numbers<[1], [0], [0], [1], [0, 0, 1, 1], [], []>} : vector<128x64xbf16>, vector<64x128xbf16>, vector<128x128xf32> -> vector<128x128xf32>
    %77 = arith.addf %73, %76 : vector<128x128xf32>
    %c0_71 = arith.constant 0 : index
    %c0_72 = arith.constant 0 : index
    %78 = vector.load %arg6[%c0_71, %c0_72] : memref<128x128xf32, #tpu.memory_space<vmem>>, vector<128x128xf32>
    tpu.vector_store %arg6[%c0_71, %c0_72], %77 {strides = array<i32>} : memref<128x128xf32, #tpu.memory_space<vmem>>, vector<128x128xf32>,
    %c0_i32_73 = arith.constant 0 : i32
    %79 = arith.addi %0, %c0_i32_73 : i32
    %c0_i32_74 = arith.constant 0 : i32
    %80 = arith.addi %79, %c0_i32_74 : i32
    %c0_75 = arith.constant 0 : index
    %81 = arith.index_cast %80 : i32 to index
    %c2_76 = arith.constant 2 : index
    %c0_77 = arith.constant 0 : index
    %82 = vector.load %arg2[%c0_75, %81, %c2_76, %c0_77] : memref<1x18x18x64xbf16, #tpu.memory_space<vmem>>, vector<1x8x16x64xbf16>
    %83 = vector.shape_cast %82 : vector<1x8x16x64xbf16> to vector<8x16x64xbf16>
    %84 = vector.shape_cast %83 : vector<8x16x64xbf16> to vector<128x64xbf16>
    %c0_78 = arith.constant 0 : index
    %c0_79 = arith.constant 0 : index
    %85 = vector.load %arg6[%c0_78, %c0_79] : memref<128x128xf32, #tpu.memory_space<vmem>>, vector<128x128xf32>
    %c5 = arith.constant 5 : index
    %c0_80 = arith.constant 0 : index
    %c0_81 = arith.constant 0 : index
    %86 = vector.load %arg3[%c5, %c0_80, %c0_81] : memref<16x64x128xbf16, #tpu.memory_space<vmem>>, vector<1x64x128xbf16>
    %87 = vector.shape_cast %86 : vector<1x64x128xbf16> to vector<64x128xbf16>
    %cst_82 = arith.constant dense<0.000000e+00> : vector<128x128xf32>
    %88 = tpu.matmul %84, %87, %cst_82 {dimension_numbers = #tpu.dot_dimension_numbers<[1], [0], [0], [1], [0, 0, 1, 1], [], []>} : vector<128x64xbf16>, vector<64x128xbf16>, vector<128x128xf32> -> vector<128x128xf32>
    %89 = arith.addf %85, %88 : vector<128x128xf32>
    %c0_83 = arith.constant 0 : index
    %c0_84 = arith.constant 0 : index
    %90 = vector.load %arg6[%c0_83, %c0_84] : memref<128x128xf32, #tpu.memory_space<vmem>>, vector<128x128xf32>
    tpu.vector_store %arg6[%c0_83, %c0_84], %89 {strides = array<i32>} : memref<128x128xf32, #tpu.memory_space<vmem>>, vector<128x128xf32>,
    %c0_i32_85 = arith.constant 0 : i32
    %91 = arith.addi %0, %c0_i32_85 : i32
    %c1_i32_86 = arith.constant 1 : i32
    %92 = arith.addi %91, %c1_i32_86 : i32
    %c0_87 = arith.constant 0 : index
    %93 = arith.index_cast %92 : i32 to index
    %c1_88 = arith.constant 1 : index
    %c0_89 = arith.constant 0 : index
    %94 = vector.load %arg2[%c0_87, %93, %c1_88, %c0_89] : memref<1x18x18x64xbf16, #tpu.memory_space<vmem>>, vector<1x8x16x64xbf16>
    %95 = vector.shape_cast %94 : vector<1x8x16x64xbf16> to vector<8x16x64xbf16>
    %96 = vector.shape_cast %95 : vector<8x16x64xbf16> to vector<128x64xbf16>
    %c0_90 = arith.constant 0 : index
    %c0_91 = arith.constant 0 : index
    %97 = vector.load %arg6[%c0_90, %c0_91] : memref<128x128xf32, #tpu.memory_space<vmem>>, vector<128x128xf32>
    %c6 = arith.constant 6 : index
    %c0_92 = arith.constant 0 : index
    %c0_93 = arith.constant 0 : index
    %98 = vector.load %arg3[%c6, %c0_92, %c0_93] : memref<16x64x128xbf16, #tpu.memory_space<vmem>>, vector<1x64x128xbf16>
    %99 = vector.shape_cast %98 : vector<1x64x128xbf16> to vector<64x128xbf16>
    %cst_94 = arith.constant dense<0.000000e+00> : vector<128x128xf32>
    %100 = tpu.matmul %96, %99, %cst_94 {dimension_numbers = #tpu.dot_dimension_numbers<[1], [0], [0], [1], [0, 0, 1, 1], [], []>} : vector<128x64xbf16>, vector<64x128xbf16>, vector<128x128xf32> -> vector<128x128xf32>
    %101 = arith.addf %97, %100 : vector<128x128xf32>
    %c0_95 = arith.constant 0 : index
    %c0_96 = arith.constant 0 : index
    %102 = vector.load %arg6[%c0_95, %c0_96] : memref<128x128xf32, #tpu.memory_space<vmem>>, vector<128x128xf32>
    tpu.vector_store %arg6[%c0_95, %c0_96], %101 {strides = array<i32>} : memref<128x128xf32, #tpu.memory_space<vmem>>, vector<128x128xf32>,
    %c0_i32_97 = arith.constant 0 : i32
    %103 = arith.addi %0, %c0_i32_97 : i32
    %c1_i32_98 = arith.constant 1 : i32
    %104 = arith.addi %103, %c1_i32_98 : i32
    %c0_99 = arith.constant 0 : index
    %105 = arith.index_cast %104 : i32 to index
    %c2_100 = arith.constant 2 : index
    %c0_101 = arith.constant 0 : index
    %106 = vector.load %arg2[%c0_99, %105, %c2_100, %c0_101] : memref<1x18x18x64xbf16, #tpu.memory_space<vmem>>, vector<1x8x16x64xbf16>
    %107 = vector.shape_cast %106 : vector<1x8x16x64xbf16> to vector<8x16x64xbf16>
    %108 = vector.shape_cast %107 : vector<8x16x64xbf16> to vector<128x64xbf16>
    %c0_102 = arith.constant 0 : index
    %c0_103 = arith.constant 0 : index
    %109 = vector.load %arg6[%c0_102, %c0_103] : memref<128x128xf32, #tpu.memory_space<vmem>>, vector<128x128xf32>
    %c7 = arith.constant 7 : index
    %c0_104 = arith.constant 0 : index
    %c0_105 = arith.constant 0 : index
    %110 = vector.load %arg3[%c7, %c0_104, %c0_105] : memref<16x64x128xbf16, #tpu.memory_space<vmem>>, vector<1x64x128xbf16>
    %111 = vector.shape_cast %110 : vector<1x64x128xbf16> to vector<64x128xbf16>
    %cst_106 = arith.constant dense<0.000000e+00> : vector<128x128xf32>
    %112 = tpu.matmul %108, %111, %cst_106 {dimension_numbers = #tpu.dot_dimension_numbers<[1], [0], [0], [1], [0, 0, 1, 1], [], []>} : vector<128x64xbf16>, vector<64x128xbf16>, vector<128x128xf32> -> vector<128x128xf32>
    %113 = arith.addf %109, %112 : vector<128x128xf32>
    %c0_107 = arith.constant 0 : index
    %c0_108 = arith.constant 0 : index
    %114 = vector.load %arg6[%c0_107, %c0_108] : memref<128x128xf32, #tpu.memory_space<vmem>>, vector<128x128xf32>
    tpu.vector_store %arg6[%c0_107, %c0_108], %113 {strides = array<i32>} : memref<128x128xf32, #tpu.memory_space<vmem>>, vector<128x128xf32>,
    %c0_109 = arith.constant 0 : index
    %c0_110 = arith.constant 0 : index
    %115 = vector.load %arg6[%c0_109, %c0_110] : memref<128x128xf32, #tpu.memory_space<vmem>>, vector<128x128xf32>
    %cst_111 = arith.constant dense<0.000000e+00> : vector<128xf32>
    %116 = vector.multi_reduction <add>, %115, %cst_111 [0] : vector<128x128xf32> to vector<128xf32>
    %117 = vector.shape_cast %116 : vector<128xf32> to vector<1x128xf32>
    %118 = arith.addf %56, %117 : vector<1x128xf32>
    %119 = arith.mulf %115, %115 : vector<128x128xf32>
    %cst_112 = arith.constant dense<0.000000e+00> : vector<128xf32>
    %120 = vector.multi_reduction <add>, %119, %cst_112 [0] : vector<128x128xf32> to vector<128xf32>
    %121 = vector.shape_cast %120 : vector<128xf32> to vector<1x128xf32>
    %122 = arith.addf %60, %121 : vector<1x128xf32>
    %123 = arith.truncf %115 : vector<128x128xf32> to vector<128x128xbf16>
    %c1_113 = arith.constant 1 : index
    %c0_114 = arith.constant 0 : index
    %c0_115 = arith.constant 0 : index
    %c0_116 = arith.constant 0 : index
    %124 = vector.load %arg4[%c1_113, %c0_114, %c0_115, %c0_116] : memref<4x1x128x128xbf16, #tpu.memory_space<vmem>>, vector<1x1x128x128xbf16>
    %125 = vector.shape_cast %124 : vector<1x1x128x128xbf16> to vector<128x128xbf16>
    %126 = vector.shape_cast %123 : vector<128x128xbf16> to vector<1x1x128x128xbf16>
    tpu.vector_store %arg4[%c1_113, %c0_114, %c0_115, %c0_116], %126 {strides = array<i32>} : memref<4x1x128x128xbf16, #tpu.memory_space<vmem>>, vector<1x1x128x128xbf16>,
    %cst_117 = arith.constant 0.000000e+00 : f32
    %127 = vector.broadcast %cst_117 : f32 to vector<128x128xf32>
    %c0_118 = arith.constant 0 : index
    %c0_119 = arith.constant 0 : index
    %128 = vector.load %arg6[%c0_118, %c0_119] : memref<128x128xf32, #tpu.memory_space<vmem>>, vector<128x128xf32>
    tpu.vector_store %arg6[%c0_118, %c0_119], %127 {strides = array<i32>} : memref<128x128xf32, #tpu.memory_space<vmem>>, vector<128x128xf32>,
    %c1_i32_120 = arith.constant 1 : i32
    %129 = arith.addi %0, %c1_i32_120 : i32
    %c0_i32_121 = arith.constant 0 : i32
    %130 = arith.addi %129, %c0_i32_121 : i32
    %c0_122 = arith.constant 0 : index
    %131 = arith.index_cast %130 : i32 to index
    %c0_123 = arith.constant 0 : index
    %c0_124 = arith.constant 0 : index
    %132 = vector.load %arg2[%c0_122, %131, %c0_123, %c0_124] : memref<1x18x18x64xbf16, #tpu.memory_space<vmem>>, vector<1x8x16x64xbf16>
    %133 = vector.shape_cast %132 : vector<1x8x16x64xbf16> to vector<8x16x64xbf16>
    %134 = vector.shape_cast %133 : vector<8x16x64xbf16> to vector<128x64xbf16>
    %c0_125 = arith.constant 0 : index
    %c0_126 = arith.constant 0 : index
    %135 = vector.load %arg6[%c0_125, %c0_126] : memref<128x128xf32, #tpu.memory_space<vmem>>, vector<128x128xf32>
    %c8 = arith.constant 8 : index
    %c0_127 = arith.constant 0 : index
    %c0_128 = arith.constant 0 : index
    %136 = vector.load %arg3[%c8, %c0_127, %c0_128] : memref<16x64x128xbf16, #tpu.memory_space<vmem>>, vector<1x64x128xbf16>
    %137 = vector.shape_cast %136 : vector<1x64x128xbf16> to vector<64x128xbf16>
    %cst_129 = arith.constant dense<0.000000e+00> : vector<128x128xf32>
    %138 = tpu.matmul %134, %137, %cst_129 {dimension_numbers = #tpu.dot_dimension_numbers<[1], [0], [0], [1], [0, 0, 1, 1], [], []>} : vector<128x64xbf16>, vector<64x128xbf16>, vector<128x128xf32> -> vector<128x128xf32>
    %139 = arith.addf %135, %138 : vector<128x128xf32>
    %c0_130 = arith.constant 0 : index
    %c0_131 = arith.constant 0 : index
    %140 = vector.load %arg6[%c0_130, %c0_131] : memref<128x128xf32, #tpu.memory_space<vmem>>, vector<128x128xf32>
    tpu.vector_store %arg6[%c0_130, %c0_131], %139 {strides = array<i32>} : memref<128x128xf32, #tpu.memory_space<vmem>>, vector<128x128xf32>,
    %c1_i32_132 = arith.constant 1 : i32
    %141 = arith.addi %0, %c1_i32_132 : i32
    %c0_i32_133 = arith.constant 0 : i32
    %142 = arith.addi %141, %c0_i32_133 : i32
    %c0_134 = arith.constant 0 : index
    %143 = arith.index_cast %142 : i32 to index
    %c1_135 = arith.constant 1 : index
    %c0_136 = arith.constant 0 : index
    %144 = vector.load %arg2[%c0_134, %143, %c1_135, %c0_136] : memref<1x18x18x64xbf16, #tpu.memory_space<vmem>>, vector<1x8x16x64xbf16>
    %145 = vector.shape_cast %144 : vector<1x8x16x64xbf16> to vector<8x16x64xbf16>
    %146 = vector.shape_cast %145 : vector<8x16x64xbf16> to vector<128x64xbf16>
    %c0_137 = arith.constant 0 : index
    %c0_138 = arith.constant 0 : index
    %147 = vector.load %arg6[%c0_137, %c0_138] : memref<128x128xf32, #tpu.memory_space<vmem>>, vector<128x128xf32>
    %c9 = arith.constant 9 : index
    %c0_139 = arith.constant 0 : index
    %c0_140 = arith.constant 0 : index
    %148 = vector.load %arg3[%c9, %c0_139, %c0_140] : memref<16x64x128xbf16, #tpu.memory_space<vmem>>, vector<1x64x128xbf16>
    %149 = vector.shape_cast %148 : vector<1x64x128xbf16> to vector<64x128xbf16>
    %cst_141 = arith.constant dense<0.000000e+00> : vector<128x128xf32>
    %150 = tpu.matmul %146, %149, %cst_141 {dimension_numbers = #tpu.dot_dimension_numbers<[1], [0], [0], [1], [0, 0, 1, 1], [], []>} : vector<128x64xbf16>, vector<64x128xbf16>, vector<128x128xf32> -> vector<128x128xf32>
    %151 = arith.addf %147, %150 : vector<128x128xf32>
    %c0_142 = arith.constant 0 : index
    %c0_143 = arith.constant 0 : index
    %152 = vector.load %arg6[%c0_142, %c0_143] : memref<128x128xf32, #tpu.memory_space<vmem>>, vector<128x128xf32>
    tpu.vector_store %arg6[%c0_142, %c0_143], %151 {strides = array<i32>} : memref<128x128xf32, #tpu.memory_space<vmem>>, vector<128x128xf32>,
    %c1_i32_144 = arith.constant 1 : i32
    %153 = arith.addi %0, %c1_i32_144 : i32
    %c1_i32_145 = arith.constant 1 : i32
    %154 = arith.addi %153, %c1_i32_145 : i32
    %c0_146 = arith.constant 0 : index
    %155 = arith.index_cast %154 : i32 to index
    %c0_147 = arith.constant 0 : index
    %c0_148 = arith.constant 0 : index
    %156 = vector.load %arg2[%c0_146, %155, %c0_147, %c0_148] : memref<1x18x18x64xbf16, #tpu.memory_space<vmem>>, vector<1x8x16x64xbf16>
    %157 = vector.shape_cast %156 : vector<1x8x16x64xbf16> to vector<8x16x64xbf16>
    %158 = vector.shape_cast %157 : vector<8x16x64xbf16> to vector<128x64xbf16>
    %c0_149 = arith.constant 0 : index
    %c0_150 = arith.constant 0 : index
    %159 = vector.load %arg6[%c0_149, %c0_150] : memref<128x128xf32, #tpu.memory_space<vmem>>, vector<128x128xf32>
    %c10 = arith.constant 10 : index
    %c0_151 = arith.constant 0 : index
    %c0_152 = arith.constant 0 : index
    %160 = vector.load %arg3[%c10, %c0_151, %c0_152] : memref<16x64x128xbf16, #tpu.memory_space<vmem>>, vector<1x64x128xbf16>
    %161 = vector.shape_cast %160 : vector<1x64x128xbf16> to vector<64x128xbf16>
    %cst_153 = arith.constant dense<0.000000e+00> : vector<128x128xf32>
    %162 = tpu.matmul %158, %161, %cst_153 {dimension_numbers = #tpu.dot_dimension_numbers<[1], [0], [0], [1], [0, 0, 1, 1], [], []>} : vector<128x64xbf16>, vector<64x128xbf16>, vector<128x128xf32> -> vector<128x128xf32>
    %163 = arith.addf %159, %162 : vector<128x128xf32>
    %c0_154 = arith.constant 0 : index
    %c0_155 = arith.constant 0 : index
    %164 = vector.load %arg6[%c0_154, %c0_155] : memref<128x128xf32, #tpu.memory_space<vmem>>, vector<128x128xf32>
    tpu.vector_store %arg6[%c0_154, %c0_155], %163 {strides = array<i32>} : memref<128x128xf32, #tpu.memory_space<vmem>>, vector<128x128xf32>,
    %c1_i32_156 = arith.constant 1 : i32
    %165 = arith.addi %0, %c1_i32_156 : i32
    %c1_i32_157 = arith.constant 1 : i32
    %166 = arith.addi %165, %c1_i32_157 : i32
    %c0_158 = arith.constant 0 : index
    %167 = arith.index_cast %166 : i32 to index
    %c1_159 = arith.constant 1 : index
    %c0_160 = arith.constant 0 : index
    %168 = vector.load %arg2[%c0_158, %167, %c1_159, %c0_160] : memref<1x18x18x64xbf16, #tpu.memory_space<vmem>>, vector<1x8x16x64xbf16>
    %169 = vector.shape_cast %168 : vector<1x8x16x64xbf16> to vector<8x16x64xbf16>
    %170 = vector.shape_cast %169 : vector<8x16x64xbf16> to vector<128x64xbf16>
    %c0_161 = arith.constant 0 : index
    %c0_162 = arith.constant 0 : index
    %171 = vector.load %arg6[%c0_161, %c0_162] : memref<128x128xf32, #tpu.memory_space<vmem>>, vector<128x128xf32>
    %c11 = arith.constant 11 : index
    %c0_163 = arith.constant 0 : index
    %c0_164 = arith.constant 0 : index
    %172 = vector.load %arg3[%c11, %c0_163, %c0_164] : memref<16x64x128xbf16, #tpu.memory_space<vmem>>, vector<1x64x128xbf16>
    %173 = vector.shape_cast %172 : vector<1x64x128xbf16> to vector<64x128xbf16>
    %cst_165 = arith.constant dense<0.000000e+00> : vector<128x128xf32>
    %174 = tpu.matmul %170, %173, %cst_165 {dimension_numbers = #tpu.dot_dimension_numbers<[1], [0], [0], [1], [0, 0, 1, 1], [], []>} : vector<128x64xbf16>, vector<64x128xbf16>, vector<128x128xf32> -> vector<128x128xf32>
    %175 = arith.addf %171, %174 : vector<128x128xf32>
    %c0_166 = arith.constant 0 : index
    %c0_167 = arith.constant 0 : index
    %176 = vector.load %arg6[%c0_166, %c0_167] : memref<128x128xf32, #tpu.memory_space<vmem>>, vector<128x128xf32>
    tpu.vector_store %arg6[%c0_166, %c0_167], %175 {strides = array<i32>} : memref<128x128xf32, #tpu.memory_space<vmem>>, vector<128x128xf32>,
    %c0_168 = arith.constant 0 : index
    %c0_169 = arith.constant 0 : index
    %177 = vector.load %arg6[%c0_168, %c0_169] : memref<128x128xf32, #tpu.memory_space<vmem>>, vector<128x128xf32>
    %cst_170 = arith.constant dense<0.000000e+00> : vector<128xf32>
    %178 = vector.multi_reduction <add>, %177, %cst_170 [0] : vector<128x128xf32> to vector<128xf32>
    %179 = vector.shape_cast %178 : vector<128xf32> to vector<1x128xf32>
    %180 = arith.addf %118, %179 : vector<1x128xf32>
    %181 = arith.mulf %177, %177 : vector<128x128xf32>
    %cst_171 = arith.constant dense<0.000000e+00> : vector<128xf32>
    %182 = vector.multi_reduction <add>, %181, %cst_171 [0] : vector<128x128xf32> to vector<128xf32>
    %183 = vector.shape_cast %182 : vector<128xf32> to vector<1x128xf32>
    %184 = arith.addf %122, %183 : vector<1x128xf32>
    %185 = arith.truncf %177 : vector<128x128xf32> to vector<128x128xbf16>
    %c2_172 = arith.constant 2 : index
    %c0_173 = arith.constant 0 : index
    %c0_174 = arith.constant 0 : index
    %c0_175 = arith.constant 0 : index
    %186 = vector.load %arg4[%c2_172, %c0_173, %c0_174, %c0_175] : memref<4x1x128x128xbf16, #tpu.memory_space<vmem>>, vector<1x1x128x128xbf16>
    %187 = vector.shape_cast %186 : vector<1x1x128x128xbf16> to vector<128x128xbf16>
    %188 = vector.shape_cast %185 : vector<128x128xbf16> to vector<1x1x128x128xbf16>
    tpu.vector_store %arg4[%c2_172, %c0_173, %c0_174, %c0_175], %188 {strides = array<i32>} : memref<4x1x128x128xbf16, #tpu.memory_space<vmem>>, vector<1x1x128x128xbf16>,
    %cst_176 = arith.constant 0.000000e+00 : f32
    %189 = vector.broadcast %cst_176 : f32 to vector<128x128xf32>
    %c0_177 = arith.constant 0 : index
    %c0_178 = arith.constant 0 : index
    %190 = vector.load %arg6[%c0_177, %c0_178] : memref<128x128xf32, #tpu.memory_space<vmem>>, vector<128x128xf32>
    tpu.vector_store %arg6[%c0_177, %c0_178], %189 {strides = array<i32>} : memref<128x128xf32, #tpu.memory_space<vmem>>, vector<128x128xf32>,
    %c1_i32_179 = arith.constant 1 : i32
    %191 = arith.addi %0, %c1_i32_179 : i32
    %c0_i32_180 = arith.constant 0 : i32
    %192 = arith.addi %191, %c0_i32_180 : i32
    %c0_181 = arith.constant 0 : index
    %193 = arith.index_cast %192 : i32 to index
    %c1_182 = arith.constant 1 : index
    %c0_183 = arith.constant 0 : index
    %194 = vector.load %arg2[%c0_181, %193, %c1_182, %c0_183] : memref<1x18x18x64xbf16, #tpu.memory_space<vmem>>, vector<1x8x16x64xbf16>
    %195 = vector.shape_cast %194 : vector<1x8x16x64xbf16> to vector<8x16x64xbf16>
    %196 = vector.shape_cast %195 : vector<8x16x64xbf16> to vector<128x64xbf16>
    %c0_184 = arith.constant 0 : index
    %c0_185 = arith.constant 0 : index
    %197 = vector.load %arg6[%c0_184, %c0_185] : memref<128x128xf32, #tpu.memory_space<vmem>>, vector<128x128xf32>
    %c12 = arith.constant 12 : index
    %c0_186 = arith.constant 0 : index
    %c0_187 = arith.constant 0 : index
    %198 = vector.load %arg3[%c12, %c0_186, %c0_187] : memref<16x64x128xbf16, #tpu.memory_space<vmem>>, vector<1x64x128xbf16>
    %199 = vector.shape_cast %198 : vector<1x64x128xbf16> to vector<64x128xbf16>
    %cst_188 = arith.constant dense<0.000000e+00> : vector<128x128xf32>
    %200 = tpu.matmul %196, %199, %cst_188 {dimension_numbers = #tpu.dot_dimension_numbers<[1], [0], [0], [1], [0, 0, 1, 1], [], []>} : vector<128x64xbf16>, vector<64x128xbf16>, vector<128x128xf32> -> vector<128x128xf32>
    %201 = arith.addf %197, %200 : vector<128x128xf32>
    %c0_189 = arith.constant 0 : index
    %c0_190 = arith.constant 0 : index
    %202 = vector.load %arg6[%c0_189, %c0_190] : memref<128x128xf32, #tpu.memory_space<vmem>>, vector<128x128xf32>
    tpu.vector_store %arg6[%c0_189, %c0_190], %201 {strides = array<i32>} : memref<128x128xf32, #tpu.memory_space<vmem>>, vector<128x128xf32>,
    %c1_i32_191 = arith.constant 1 : i32
    %203 = arith.addi %0, %c1_i32_191 : i32
    %c0_i32_192 = arith.constant 0 : i32
    %204 = arith.addi %203, %c0_i32_192 : i32
    %c0_193 = arith.constant 0 : index
    %205 = arith.index_cast %204 : i32 to index
    %c2_194 = arith.constant 2 : index
    %c0_195 = arith.constant 0 : index
    %206 = vector.load %arg2[%c0_193, %205, %c2_194, %c0_195] : memref<1x18x18x64xbf16, #tpu.memory_space<vmem>>, vector<1x8x16x64xbf16>
    %207 = vector.shape_cast %206 : vector<1x8x16x64xbf16> to vector<8x16x64xbf16>
    %208 = vector.shape_cast %207 : vector<8x16x64xbf16> to vector<128x64xbf16>
    %c0_196 = arith.constant 0 : index
    %c0_197 = arith.constant 0 : index
    %209 = vector.load %arg6[%c0_196, %c0_197] : memref<128x128xf32, #tpu.memory_space<vmem>>, vector<128x128xf32>
    %c13 = arith.constant 13 : index
    %c0_198 = arith.constant 0 : index
    %c0_199 = arith.constant 0 : index
    %210 = vector.load %arg3[%c13, %c0_198, %c0_199] : memref<16x64x128xbf16, #tpu.memory_space<vmem>>, vector<1x64x128xbf16>
    %211 = vector.shape_cast %210 : vector<1x64x128xbf16> to vector<64x128xbf16>
    %cst_200 = arith.constant dense<0.000000e+00> : vector<128x128xf32>
    %212 = tpu.matmul %208, %211, %cst_200 {dimension_numbers = #tpu.dot_dimension_numbers<[1], [0], [0], [1], [0, 0, 1, 1], [], []>} : vector<128x64xbf16>, vector<64x128xbf16>, vector<128x128xf32> -> vector<128x128xf32>
    %213 = arith.addf %209, %212 : vector<128x128xf32>
    %c0_201 = arith.constant 0 : index
    %c0_202 = arith.constant 0 : index
    %214 = vector.load %arg6[%c0_201, %c0_202] : memref<128x128xf32, #tpu.memory_space<vmem>>, vector<128x128xf32>
    tpu.vector_store %arg6[%c0_201, %c0_202], %213 {strides = array<i32>} : memref<128x128xf32, #tpu.memory_space<vmem>>, vector<128x128xf32>,
    %c1_i32_203 = arith.constant 1 : i32
    %215 = arith.addi %0, %c1_i32_203 : i32
    %c1_i32_204 = arith.constant 1 : i32
    %216 = arith.addi %215, %c1_i32_204 : i32
    %c0_205 = arith.constant 0 : index
    %217 = arith.index_cast %216 : i32 to index
    %c1_206 = arith.constant 1 : index
    %c0_207 = arith.constant 0 : index
    %218 = vector.load %arg2[%c0_205, %217, %c1_206, %c0_207] : memref<1x18x18x64xbf16, #tpu.memory_space<vmem>>, vector<1x8x16x64xbf16>
    %219 = vector.shape_cast %218 : vector<1x8x16x64xbf16> to vector<8x16x64xbf16>
    %220 = vector.shape_cast %219 : vector<8x16x64xbf16> to vector<128x64xbf16>
    %c0_208 = arith.constant 0 : index
    %c0_209 = arith.constant 0 : index
    %221 = vector.load %arg6[%c0_208, %c0_209] : memref<128x128xf32, #tpu.memory_space<vmem>>, vector<128x128xf32>
    %c14 = arith.constant 14 : index
    %c0_210 = arith.constant 0 : index
    %c0_211 = arith.constant 0 : index
    %222 = vector.load %arg3[%c14, %c0_210, %c0_211] : memref<16x64x128xbf16, #tpu.memory_space<vmem>>, vector<1x64x128xbf16>
    %223 = vector.shape_cast %222 : vector<1x64x128xbf16> to vector<64x128xbf16>
    %cst_212 = arith.constant dense<0.000000e+00> : vector<128x128xf32>
    %224 = tpu.matmul %220, %223, %cst_212 {dimension_numbers = #tpu.dot_dimension_numbers<[1], [0], [0], [1], [0, 0, 1, 1], [], []>} : vector<128x64xbf16>, vector<64x128xbf16>, vector<128x128xf32> -> vector<128x128xf32>
    %225 = arith.addf %221, %224 : vector<128x128xf32>
    %c0_213 = arith.constant 0 : index
    %c0_214 = arith.constant 0 : index
    %226 = vector.load %arg6[%c0_213, %c0_214] : memref<128x128xf32, #tpu.memory_space<vmem>>, vector<128x128xf32>
    tpu.vector_store %arg6[%c0_213, %c0_214], %225 {strides = array<i32>} : memref<128x128xf32, #tpu.memory_space<vmem>>, vector<128x128xf32>,
    %c1_i32_215 = arith.constant 1 : i32
    %227 = arith.addi %0, %c1_i32_215 : i32
    %c1_i32_216 = arith.constant 1 : i32
    %228 = arith.addi %227, %c1_i32_216 : i32
    %c0_217 = arith.constant 0 : index
    %229 = arith.index_cast %228 : i32 to index
    %c2_218 = arith.constant 2 : index
    %c0_219 = arith.constant 0 : index
    %230 = vector.load %arg2[%c0_217, %229, %c2_218, %c0_219] : memref<1x18x18x64xbf16, #tpu.memory_space<vmem>>, vector<1x8x16x64xbf16>
    %231 = vector.shape_cast %230 : vector<1x8x16x64xbf16> to vector<8x16x64xbf16>
    %232 = vector.shape_cast %231 : vector<8x16x64xbf16> to vector<128x64xbf16>
    %c0_220 = arith.constant 0 : index
    %c0_221 = arith.constant 0 : index
    %233 = vector.load %arg6[%c0_220, %c0_221] : memref<128x128xf32, #tpu.memory_space<vmem>>, vector<128x128xf32>
    %c15 = arith.constant 15 : index
    %c0_222 = arith.constant 0 : index
    %c0_223 = arith.constant 0 : index
    %234 = vector.load %arg3[%c15, %c0_222, %c0_223] : memref<16x64x128xbf16, #tpu.memory_space<vmem>>, vector<1x64x128xbf16>
    %235 = vector.shape_cast %234 : vector<1x64x128xbf16> to vector<64x128xbf16>
    %cst_224 = arith.constant dense<0.000000e+00> : vector<128x128xf32>
    %236 = tpu.matmul %232, %235, %cst_224 {dimension_numbers = #tpu.dot_dimension_numbers<[1], [0], [0], [1], [0, 0, 1, 1], [], []>} : vector<128x64xbf16>, vector<64x128xbf16>, vector<128x128xf32> -> vector<128x128xf32>
    %237 = arith.addf %233, %236 : vector<128x128xf32>
    %c0_225 = arith.constant 0 : index
    %c0_226 = arith.constant 0 : index
    %238 = vector.load %arg6[%c0_225, %c0_226] : memref<128x128xf32, #tpu.memory_space<vmem>>, vector<128x128xf32>
    tpu.vector_store %arg6[%c0_225, %c0_226], %237 {strides = array<i32>} : memref<128x128xf32, #tpu.memory_space<vmem>>, vector<128x128xf32>,
    %c0_227 = arith.constant 0 : index
    %c0_228 = arith.constant 0 : index
    %239 = vector.load %arg6[%c0_227, %c0_228] : memref<128x128xf32, #tpu.memory_space<vmem>>, vector<128x128xf32>
    %cst_229 = arith.constant dense<0.000000e+00> : vector<128xf32>
    %240 = vector.multi_reduction <add>, %239, %cst_229 [0] : vector<128x128xf32> to vector<128xf32>
    %241 = vector.shape_cast %240 : vector<128xf32> to vector<1x128xf32>
    %242 = arith.addf %180, %241 : vector<1x128xf32>
    %243 = arith.mulf %239, %239 : vector<128x128xf32>
    %cst_230 = arith.constant dense<0.000000e+00> : vector<128xf32>
    %244 = vector.multi_reduction <add>, %243, %cst_230 [0] : vector<128x128xf32> to vector<128xf32>
    %245 = vector.shape_cast %244 : vector<128xf32> to vector<1x128xf32>
    %246 = arith.addf %184, %245 : vector<1x128xf32>
    %247 = arith.truncf %239 : vector<128x128xf32> to vector<128x128xbf16>
    %c3_231 = arith.constant 3 : index
    %c0_232 = arith.constant 0 : index
    %c0_233 = arith.constant 0 : index
    %c0_234 = arith.constant 0 : index
    %248 = vector.load %arg4[%c3_231, %c0_232, %c0_233, %c0_234] : memref<4x1x128x128xbf16, #tpu.memory_space<vmem>>, vector<1x1x128x128xbf16>
    %249 = vector.shape_cast %248 : vector<1x1x128x128xbf16> to vector<128x128xbf16>
    %250 = vector.shape_cast %247 : vector<128x128xbf16> to vector<1x1x128x128xbf16>
    tpu.vector_store %arg4[%c3_231, %c0_232, %c0_233, %c0_234], %250 {strides = array<i32>} : memref<4x1x128x128xbf16, #tpu.memory_space<vmem>>, vector<1x1x128x128xbf16>,
    %cst_235 = arith.constant 0.000000e+00 : f32
    %251 = vector.broadcast %cst_235 : f32 to vector<1x8x128xf32>
    %c0_236 = arith.constant 0 : index
    %c0_237 = arith.constant 0 : index
    %c0_238 = arith.constant 0 : index
    %252 = vector.load %arg5[%c0_236, %c0_237, %c0_238] : memref<1x8x128xf32, #tpu.memory_space<vmem>>, vector<1x8x128xf32>
    tpu.vector_store %arg5[%c0_236, %c0_237, %c0_238], %251 {strides = array<i32>} : memref<1x8x128xf32, #tpu.memory_space<vmem>>, vector<1x8x128xf32>,
    %c0_239 = arith.constant 0 : index
    %c0_240 = arith.constant 0 : index
    %c0_241 = arith.constant 0 : index
    %253 = vector.load %arg5[%c0_239, %c0_240, %c0_241] : memref<1x8x128xf32, #tpu.memory_space<vmem>>, vector<1x1x128xf32>
    %254 = vector.shape_cast %253 : vector<1x1x128xf32> to vector<1x128xf32>
    %255 = vector.shape_cast %242 : vector<1x128xf32> to vector<1x1x128xf32>
    tpu.vector_store %arg5[%c0_239, %c0_240, %c0_241], %255 {strides = array<i32>} : memref<1x8x128xf32, #tpu.memory_space<vmem>>, vector<1x1x128xf32>,
    %c0_242 = arith.constant 0 : index
    %c1_243 = arith.constant 1 : index
    %c0_244 = arith.constant 0 : index
    %256 = vector.load %arg5[%c0_242, %c1_243, %c0_244] : memref<1x8x128xf32, #tpu.memory_space<vmem>>, vector<1x1x128xf32>
    %257 = vector.shape_cast %256 : vector<1x1x128xf32> to vector<1x128xf32>
    %258 = vector.shape_cast %246 : vector<1x128xf32> to vector<1x1x128xf32>
    tpu.vector_store %arg5[%c0_242, %c1_243, %c0_244], %258 {strides = array<i32>} : memref<1x8x128xf32, #tpu.memory_space<vmem>>, vector<1x1x128xf32>,
    return
  }
  func.func @transform_0(%arg0: i32, %arg1: i32) -> (i32, i32, i32, i32) {
    %c0_i32 = arith.constant 0 : i32
    %c0_i32_0 = arith.constant 0 : i32
    %c0_i32_1 = arith.constant 0 : i32
    %c0_i32_2 = arith.constant 0 : i32
    return %arg0, %c0_i32, %c0_i32_0, %c0_i32_1 : i32, i32, i32, i32
  }
  func.func @transform_1(%arg0: i32, %arg1: i32) -> (i32, i32, i32) {
    %c0_i32 = arith.constant 0 : i32
    %c0_i32_0 = arith.constant 0 : i32
    %c0_i32_1 = arith.constant 0 : i32
    %c0_i32_2 = arith.constant 0 : i32
    return %c0_i32, %c0_i32_0, %c0_i32_1 : i32, i32, i32
  }
  func.func @transform_2(%arg0: i32, %arg1: i32) -> (i32, i32, i32, i32) {
    %c0_i32 = arith.constant 0 : i32
    %c0_i32_0 = arith.constant 0 : i32
    %c0_i32_1 = arith.constant 0 : i32
    return %c0_i32, %arg0, %arg1, %c0_i32_0 : i32, i32, i32, i32
  }
  func.func @transform_3(%arg0: i32, %arg1: i32) -> (i32, i32, i32) {
    %c0_i32 = arith.constant 0 : i32
    %c0_i32_0 = arith.constant 0 : i32
    return %arg0, %arg1, %c0_i32 : i32, i32, i32
  }
}

</mosaic_0001>

<bundles_post_ra>
// kernel: tpu_custom_call.1
= control target key start
LH: loop header
LB: loop body
LE: loop exit
PB: predicated region body
PF: predicated region fallthrough
CT: control target
= control target key end

     0   :  { %9 = vsyncpa [#allocation4], 0  ;;  %s10666_s0 = inlined_call_operand.hbm [shape: bf16[1,18,18,64], index: 0, kind: input, shape index: {}]   ;;  %s10667_s1 = inlined_call_operand.hbm [shape: bf16[16,64,128], index: 1, kind: input, shape index: {}]   ;;  %s10668_s2 = inlined_call_operand.hbm [shape: bf16[4,1,256,128], index: 2, kind: output, shape index: {0}]   ;;  %s10669_s3 = inlined_call_operand.hbm [shape: f32[1,16,128], index: 3, kind: output, shape index: {1}]  }
   0x1   :  { %10 = vsyncpa [#allocation7], 0 }
   0x2   :  { %11 = vsyncpa [#allocation5], 0 }
   0x3   :  { %13 = vsyncpa [#allocation5 + $0x1], 0 }
   0x4   :  { %14 = vsyncpa [#allocation10], 0 }
   0x5   :  { %16 = vsyncpa [#allocation10 + $0x1], 0  ;;  %s8957_s12 = smov 0   ;;  %s8959_s13 = smov 0  }
   0x6   :  { %s8961_s14 = smov 0   ;;  %s8963_s15 = smov 0  }
   0x7   :  { %s8965_s16 = smov 0   ;;  %s8967_s17 = smov 0  }
   0x8 LB: > { %s7004_s18 = sadd.s32 4294967295, %s8922_s17   ;;  %s7005_s19 = sadd.s32 4294967294, %s8922_s17   ;;  %s8922_s17 = sphi %s8967_s17, %s22_s17   ;;  %s8918_s16 = sphi %s8965_s16, %s10770_s16   ;;  %s8914_s15 = sphi %s8963_s15, %s10769_s15   ;;  %s8910_s14 = sphi %s8961_s14, %s10768_s14   ;;  %s8906_s13 = sphi %s8959_s13, %s10767_s13   ;;  %s8902_s12 = sphi %s8957_s12, %s10766_s12  }
   0x9   : > { %s31_s20 = sadd.s32 1, %s8918_s16  ;;  %s90_s21 = sadd.s32 1, %s8910_s14 }
   0xa   : > { %p32_p0 = scmp.ge.s32.totalorder %s31_s20, 2  ;;  %p100_p1 = scmp.ne.s32.totalorder %s8910_s14, %s8906_s13 }
   0xb   : > { %p101_p2 = scmp.eq.s32.totalorder %s7004_s18, 1  ;;  %p106_p3 = scmp.ne.s32.totalorder %s8906_s13, %s8902_s12 }
   0xc   : > { %s10772_s20 = smov (%p32_p0, %s31_s20), 0  ;;  %p107_p5 = scmp.eq.s32.totalorder %s7005_s19, 1 }
   0xd   : > { %p8997_p4 = por %p101_p2, %p100_p1  ;;  %s86_s23 = ssub.s32 %s8918_s16, %s10772_s20 }
   0xe   : > { %p7006_p6 = scmp.ge.s32.totalorder %s8922_s17, 1  ;;  %p88_p7 = scmp.eq.s32.totalorder %s86_s23, 0 }
   0xf   : > { %s10671_s22 = scalar_select %p8997_p4, 1, 0 }
  0x10   : > { %p9004_p8 = por %p107_p5, %p106_p3  ;;  %p142_p9 = scmp.lt.s32.totalorder %s8922_s17, 3 }
  0x11   : > { %s9010_s25 = scalar_select %p88_p7, %s8910_s14, %s90_s21  }
  0x12   : > { %s10672_s24 = scalar_select %p9004_p8, 1, 0 }
  0x13   : > { %p9012_p10 = pnand %p7006_p6, %p142_p9  ;;  %p9016_p11 = scmp.eq.s32.totalorder %s7004_s18, 0 }
  0x14   : > { %s8924_s28 = smov [#allocation3]   ;;  %s8925_s4 = smov [#allocation6]  }
  0x15   : > { %p8607_p12 = pneg %p9012_p10  ;;  %s157_s29 = sshll.u32 %s8924_s28, 4  ;;  %s158_s29 = int_to_ptr.vmem [resolvable:$true] %s157_s29 }
  0x16   : > { %s170_s5 = sshll.u32 %s8925_s4, 4  ;;  %s8793_s6 = scalar_lea.vmem %s158_s29, 3456  ;;  %s171_s5 = int_to_ptr.vmem [resolvable:$true] %s170_s5 }
  0x17   : > { %p9024_p13 = pnand %p9016_p11, %p8607_p12  ;;  %p8794_p1 = scmp.ne.s32.totalorder %s158_s29, %s8793_s6 }
  0x18   : > { %p8801_p5 = scmp.lt.s32.totalorder %s158_s29, %s158_s29  ;;  %p8802_p6 = scmp.lt.s32.totalorder %s8793_s6, %s8793_s6 }
  0x19   : > { %p8784_p0 = pneg %p9024_p13 }
  0x1a   : > { %p8803_p7 = por %p8802_p6, %p8801_p5 }
  0x1b   : > { %p8796_p2 = pnand %p8794_p1, %p8784_p0 }
  0x1d   : > { %p8797_p3 = pneg %p8796_p2 }
  0x1f   : > { %p8804_p9 = pnand %p8803_p7, %p8797_p3 }
  0x21   : > { %8807 = shalt.err (!%p8804_p9)
}
  0x22   : > { %s8926_s7 = smov 64   ;;  %s8927_s8 = smov 4  }
  0x23   : > { %8610 = dma.hbm_to_vmem [thread:$0]  (!%p9024_p13), %s10666_s0, 3456, %s158_s29, [#allocation4], %s8926_s7, %s8926_s7, %s8927_s8  }
  0x24   : > { %s8819_s11 = scalar_lea.vmem %s171_s5, 8192  ;;  %p8827_p8 = scmp.lt.s32.totalorder %s171_s5, %s171_s5 }
  0x25   : > { %p8820_p12 = scmp.ne.s32.totalorder %s171_s5, %s8819_s11  ;;  %p8828_p4 = scmp.lt.s32.totalorder %s8819_s11, %s8819_s11 }
  0x27   : > { %p8822_p1 = pnand %p8820_p12, %p8784_p0  ;;  %p8829_p5 = por %p8828_p4, %p8827_p8 }
  0x29   : > { %p8823_p2 = pneg %p8822_p1 }
  0x2b   : > { %p8830_p3 = pnand %p8829_p5, %p8823_p2 }
  0x2d   : > { %8833 = shalt.err (!%p8830_p3)
}
  0x2e   : > { %8613 = dma.hbm_to_vmem [thread:$0]  (!%p9024_p13), %s10667_s1, 8192, %s171_s5, [#allocation7], %s8926_s7, %s8926_s7, %s8927_s8  }
  0x2f   : > { %186 = sbr.rel (%p9012_p10) target bundleno = 672 (0x2a0), region = 28 }
  0x34   : > { %8885 = dma.done.wait (%p9016_p11), [#allocation4], 3456  }
  0x35   : > { %8887 = vsyncadd (%p9016_p11), [#allocation4], 4294963840 }
  0x36   : > { %8889 = dma.done.wait (%p9016_p11), [#allocation7], 8192  }
  0x37   : > { %8891 = vsyncadd (%p9016_p11), [#allocation7], 4294959104  ;;  %v8686_v0 = vld [vmem:[#allocation6 + $0x18] sm:$0xff]   ;;  %v8688_v2 = vld [vmem:[#allocation6 + $0x10] sm:$0xff]   ;;  %s7756_s21 = smul.u32 96, %s8914_s15  ;;  %vm340_vm2 = vcmask 523264  }
  0x38   : > { %v8687_v1 = vld [vmem:[#allocation6 + $0x38] sm:$0xff]   ;;  %8205 = vmatprep.subr.bf16.mxu0 %v8686_v0  ;;  %v8689_v3 = vld [vmem:[#allocation6 + $0x30] sm:$0xff]   ;;  %v8690_v4 = vld [vmem:[#allocation6 + $0x8] sm:$0xff]   ;;  %vm518_vm0 = vsmask.f32 3328  ;;  %vm2305_vm4 = vcmask 1042432  }
  0x39   : > { %8229 = vmatprep.subr.bf16.mxu1 %v8687_v1  ;;  %8206 = vmatpush3.bf16.msra.mxu0 %v8686_v0  ;;  %vm519_vm1 = vsmask.f32 7440  ;;  %v8691_v5 = vld [vmem:[#allocation6 + $0x28] sm:$0xff]   ;;  %v8692_v6 = vld [vmem:[#allocation6] sm:$0xff]   ;;  %s9057_s23 = scalar_lea.vmem [#allocation3], %s7756_s21  ;;  %v8696_v37 = vld [vmem:[#allocation6 + $0x58] sm:$0xff]  }
  0x3a   : > { %8230 = vmatpush3.bf16.msra.mxu1 %v8687_v1  ;;  %8207 = vmatprep.subr.bf16.mxu0 %v8688_v2  ;;  %v8693_v7 = vld [vmem:[#allocation6 + $0x20] sm:$0xff]   ;;  %v8694_v8 = vld [vmem:[%s9057_s23] sm:$0xff]   ;;  %v496_v11 = vld [vmem:[%s9057_s23 + $0x8] sm:$0x1]  ;;  %vm2306_vm5 = vcmask 1046532   ;;  %s9549_s26 = sand.u32 1, %s8906_s13  }
  0x3b   : > { %8231 = vmatprep.subr.bf16.mxu1 %v8689_v3  ;;  %v494_v9 = vld [vmem:[%s9057_s23] sm:$0xf]  ;;  %v495_v10 = vld [vmem:[%s9057_s23 + $0x4] sm:$0xf]  ;;  %8213 = vmatprep.mubr.msk.bf16.mxu0 %vm340_vm2, %v8694_v8  ;;  %v541_v16 = vshll.u32 %v496_v11, 16  ;;  %v8695_v22 = vld [vmem:[%s9057_s23 + $0xc] sm:$0xff]  }
  0x3c   : > { %v522_v12 = vshrl.u32 %v494_v9, 16  ;;  %v525_v13 = vshll.u32 %v494_v9, 16  ;;  %v531_v14 = vshll.u32 %v495_v10, 16  ;;  %v535_v15 = vshrl.u32 %v495_v10, 16  ;;  %v497_v17 = vld [vmem:[%s9057_s23 + $0xc] sm:$0xf]  ;;  %vm9070_vm3 = vmor %vm518_vm0, %vm519_vm1 }
  0x3d   : > { %8208 = vmatpush3.bf16.msra.mxu0 %v8688_v2  ;;  %v498_v23 = vld [vmem:[%s9057_s23 + $0x10] sm:$0xf]  ;;  %v543_v24 = vrot.slane %v541_v16, 5  ;;  %v499_v25 = vld [vmem:[%s9057_s23 + $0x14] sm:$0x1]  ;;  %v546_v26 = vshrl.u32 %v497_v17, 16  ;;  %vm9236_vm6 = vmor %vm2305_vm4, %vm2306_vm5 }
  0x3e   : > { %8232 = vmatpush3.bf16.msra.mxu1 %v8689_v3  ;;  %8209 = vmatprep.subr.bf16.mxu0 %v8690_v4  ;;  %v524_v18 = vrot.slane %v522_v12, 4  ;;  %v527_v19 = vrot.slane %v525_v13, 5  ;;  %v533_v20 = vrot.slane %v531_v14, 5  ;;  %v537_v21 = vrot.slane %v535_v15, 4  ;;  %v8697_v42 = vld [vmem:[#allocation6 + $0x78] sm:$0xff]   ;;  %v8698_v47 = vld [vmem:[%s9057_s23 + $0x18] sm:$0xff]  }
  0x3f   : > { %8233 = vmatprep.subr.bf16.mxu1 %v8691_v5  ;;  %v549_v27 = vshll.u32 %v497_v17, 16  ;;  %v555_v28 = vshll.u32 %v498_v23, 16  ;;  %v559_v31 = vshrl.u32 %v498_v23, 16  ;;  %v565_v32 = vshll.u32 %v499_v25, 16  ;;  %v500_v48 = vld [vmem:[%s9057_s23 + $0x18] sm:$0xf] }
  0x40   : > { %v528_v29 = vor.u32 %v527_v19, %v524_v18  ;;  %v538_v30 = vor.u32 %v537_v21, %v533_v20  ;;  %v548_v34 = vrot.slane %v546_v26, 4  ;;  %v501_v49 = vld [vmem:[%s9057_s23 + $0x1c] sm:$0xf]  ;;  %v502_v52 = vld [vmem:[%s9057_s23 + $0x20] sm:$0x1]  ;;  %v570_v53 = vshrl.u32 %v500_v48, 16 }
  0x41   : > { %8210 = vmatpush3.bf16.msra.mxu0 %v8690_v4  ;;  %v551_v35 = vrot.slane %v549_v27, 5  ;;  %v557_v36 = vrot.slane %v555_v28, 5  ;;  %v561_v40 = vrot.slane %v559_v31, 4  ;;  %v567_v46 = vrot.slane %v565_v32, 5  ;;  %v8699_v59 = vld [vmem:[%s9057_s23 + $0x24] sm:$0xff]   ;;  %v8702_v19 = vld [vmem:[%s9057_s23 + $0x30] sm:$0xff]  }
  0x42   : > { %8234 = vmatpush3.bf16.msra.mxu1 %v8691_v5  ;;  %8211 = vmatprep.subr.bf16.mxu0 %v8692_v6  ;;  %v529_v38 = vrot.slane %v528_v29, 4  ;;  %v539_v39 = vrot.slane %v538_v30, 4  ;;  %v573_v54 = vshll.u32 %v500_v48, 16  ;;  %v579_v56 = vshll.u32 %v501_v49, 16  ;;  %v503_v63 = vld [vmem:[%s9057_s23 + $0x24] sm:$0xf] }
  0x43   : > { %8235 = vmatprep.subr.bf16.mxu1 %v8693_v7  ;;  %v552_v41 = vor.u32 %v551_v35, %v548_v34  ;;  %v562_v45 = vor.u32 %v561_v40, %v557_v36  ;;  %v583_v57 = vshrl.u32 %v501_v49, 16  ;;  %v589_v58 = vshll.u32 %v502_v52, 16  ;;  %v504_v4 = vld [vmem:[%s9057_s23 + $0x28] sm:$0xf]  ;;  %v505_v8 = vld [vmem:[%s9057_s23 + $0x2c] sm:$0x1] }
  0x44   : > { %v534_v43 = vsel %vm9070_vm3, %v529_v38, %v533_v20  ;;  %v544_v44 = vsel %vm9070_vm3, %v539_v39, %v543_v24  ;;  %v572_v61 = vrot.slane %v570_v53, 4  ;;  %v575_v62 = vrot.slane %v573_v54, 5  ;;  %v8700_v5 = vld [vmem:[#allocation6 + $0x50] sm:$0xff]   ;;  %v506_v26 = vld [vmem:[%s9057_s23 + $0x30] sm:$0xf]  ;;  %v8703_v38 = vld [vmem:[%s9057_s23 + $0x3c] sm:$0xff]  }
  0x45   : > { %8212 = vmatpush3.bf16.msra.mxu0 %v8692_v6  ;;  %v7037_v50 = vcombine.low %v534_v43, %v544_v44  ;;  %v553_v51 = vrot.slane %v552_v41, 4  ;;  %v563_v55 = vrot.slane %v562_v45, 4  ;;  %v581_v1 = vrot.slane %v579_v56, 5  ;;  %v8701_v15 = vld [vmem:[#allocation6 + $0x70] sm:$0xff]   ;;  %v507_v29 = vld [vmem:[%s9057_s23 + $0x34] sm:$0xf] }
  0x46   : > { %8236 = vmatpush3.bf16.msra.mxu1 %v8693_v7  ;;  %8253 = vmatprep.subr.bf16.mxu0 %v8696_v37  ;;  %v585_v2 = vrot.slane %v583_v57, 4  ;;  %v591_v3 = vrot.slane %v589_v58, 5  ;;  %v576_v7 = vor.u32 %v575_v62, %v572_v61  ;;  %v594_v9 = vshrl.u32 %v503_v63, 16  ;;  %v508_v30 = vld [vmem:[%s9057_s23 + $0x38] sm:$0x1]  ;;  %v8704_v57 = vld [vmem:[#allocation6 + $0x48] sm:$0xff]  }
  0x47   : > { %8277 = vmatprep.subr.bf16.mxu1 %v8697_v42  ;;  %8237 = vmatprep.mubr.msk.bf16.mxu1 %vm340_vm2, %v7037_v50  ;;  %v558_v60 = vsel %vm9070_vm3, %v553_v51, %v557_v36  ;;  %v568_v0 = vsel %vm9070_vm3, %v563_v55, %v567_v46  ;;  %v597_v10 = vshll.u32 %v503_v63, 16  ;;  %v603_v12 = vshll.u32 %v504_v4, 16  ;;  %v509_v46 = vld [vmem:[%s9057_s23 + $0x3c] sm:$0xf]  ;;  %v511_v51 = vld [vmem:[%s9057_s23 + $0x44] sm:$0x1] }
  0x48   : > { %8214 = vmatmul.mubr.msk.bf16.vlgmr.msra.gmra.mxu0 %vm340_vm2, %v8695_v22  ;;  %v7038_v6 = vcombine.low %v558_v60, %v568_v0  ;;  %v586_v11 = vor.u32 %v585_v2, %v581_v1  ;;  %v607_v13 = vshrl.u32 %v504_v4, 16  ;;  %v613_v14 = vshll.u32 %v505_v8, 16  ;;  %v8705_v58 = vld [vmem:[#allocation6 + $0x68] sm:$0xff]   ;;  %v8706_v2 = vld [vmem:[%s9057_s23 + $0x48] sm:$0xff]   ;;  %s7012_s27 = sshll.u32 %s9549_s26, 8  ;;  %s7013_s29 = sshll.u32 %s9549_s26, 3 }
  0x49   : > { %8254 = vmatpush3.bf16.msra.mxu0 %v8696_v37  ;;  %8217 = vmatprep.mubr.msk.bf16.mxu0 %vm340_vm2, %v8698_v47  ;;  %v577_v16 = vrot.slane %v576_v7, 4  ;;  %v596_v17 = vrot.slane %v594_v9, 4  ;;  %v599_v18 = vrot.slane %v597_v10, 5  ;;  %v605_v21 = vrot.slane %v603_v12, 5  ;;  %v510_v47 = vld [vmem:[%s9057_s23 + $0x40] sm:$0xf] }
  0x4a   : > { %8255 = vmatprep.subr.bf16.mxu0 %v8700_v5  ;;  %8238 = vmatmul.mubr.msk.bf16.vlgmr.msra.gmra.mxu1 %vm340_vm2, %v7038_v6  ;;  %v587_v20 = vrot.slane %v586_v11, 4  ;;  %v609_v22 = vrot.slane %v607_v13, 4  ;;  %v615_v23 = vrot.slane %v613_v14, 5  ;;  %v618_v31 = vshrl.u32 %v506_v26, 16  ;;  %v512_v8 = vld [vmem:[%s9057_s23 + $0x48] sm:$0xf] }
  0x4b   : > { %8278 = vmatpush3.bf16.msra.mxu1 %v8697_v42  ;;  %v582_v24 = vsel %vm9070_vm3, %v577_v16, %v581_v1  ;;  %v600_v25 = vor.u32 %v599_v18, %v596_v17  ;;  %v621_v32 = vshll.u32 %v506_v26, 16  ;;  %v627_v36 = vshll.u32 %v507_v29, 16  ;;  %v513_v9 = vld [vmem:[%s9057_s23 + $0x4c] sm:$0xf]  ;;  %v514_v10 = vld [vmem:[%s9057_s23 + $0x50] sm:$0x1] }
  0x4c   : > { %8279 = vmatprep.subr.bf16.mxu1 %v8701_v15  ;;  %v592_v27 = vsel %vm9070_vm3, %v587_v20, %v591_v3  ;;  %v610_v28 = vor.u32 %v609_v22, %v605_v21  ;;  %v631_v37 = vshrl.u32 %v507_v29, 16  ;;  %v620_v40 = vrot.slane %v618_v31, 4  ;;  %v8708_v20 = vld [vmem:[#allocation6 + $0x40] sm:$0xff]   ;;  %v8710_v31 = vld [vmem:[%s9057_s23 + $0xc] sm:$0xff]   ;;  %s10105_s28 = scalar_lea.vmem [#allocation8], %s7012_s27  ;;  %s10535_s30 = scalar_lea.vmem [#allocation9], %s7013_s29 }
  0x4d   : > { %8256 = vmatpush3.bf16.msra.mxu0 %v8700_v5  ;;  %v7039_v34 = vcombine.low %v582_v24, %v592_v27  ;;  %v601_v35 = vrot.slane %v600_v25, 4  ;;  %v623_v41 = vrot.slane %v621_v32, 5  ;;  %v637_v42 = vshll.u32 %v508_v30, 16  ;;  %v515_v24 = vld [vmem:[%s9057_s23 + $0x54] sm:$0xf]  ;;  %v8709_v25 = vld [vmem:[#allocation6 + $0x60] sm:$0xff]  }
  0x4e   : > { %v611_v39 = vrot.slane %v610_v28, 4  ;;  %v629_v44 = vrot.slane %v627_v36, 5  ;;  %v633_v45 = vrot.slane %v631_v37, 4  ;;  %v642_v52 = vshrl.u32 %v509_v46, 16  ;;  %8257 = vmatprep.subr.bf16.mxu0 %v8704_v57  ;;  %v516_v30 = vld [vmem:[%s9057_s23 + $0x58] sm:$0xf] }
  0x4f   : > { %8280 = vmatpush3.bf16.msra.mxu1 %v8701_v15  ;;  %8241 = vmatprep.mubr.msk.bf16.mxu1 %vm340_vm2, %v7039_v34  ;;  %v606_v43 = vsel %vm9070_vm3, %v601_v35, %v605_v21  ;;  %v624_v49 = vor.u32 %v623_v41, %v620_v40  ;;  %v639_v50 = vrot.slane %v637_v42, 5  ;;  %v645_v55 = vshll.u32 %v509_v46, 16  ;;  %v517_v35 = vld [vmem:[%s9057_s23 + $0x5c] sm:$0x1]  ;;  %s6817_s4 = scalar_lea.sflag [#allocation5], %s9549_s26  ;;  %s6822_s5 = scalar_lea.sflag [#allocation10], %s9549_s26 }
  0x50   : > { %8218 = vmatmul.mubr.msk.bf16.gmra.mxu0 %vm340_vm2, %v8699_v59  ;;  %v616_v48 = vsel %vm9070_vm3, %v611_v39, %v615_v23  ;;  %v634_v54 = vor.u32 %v633_v45, %v629_v44  ;;  %v651_v56 = vshll.u32 %v510_v47, 16  ;;  %v644_v60 = vrot.slane %v642_v52, 4  ;;  %8281 = vmatprep.subr.bf16.mxu1 %v8705_v58 }
  0x51   : > { %8221 = vmatprep.mubr.msk.bf16.mxu0 %vm340_vm2, %v8702_v19  ;;  %v7040_v53 = vcombine.low %v606_v43, %v616_v48  ;;  %v625_v59 = vrot.slane %v624_v49, 4  ;;  %v655_v61 = vshrl.u32 %v510_v47, 16  ;;  %v661_v62 = vshll.u32 %v511_v51, 16  ;;  %8258 = vmatpush3.bf16.msra.mxu0 %v8704_v57  ;;  %v8707_v19 = vld [vmem:[%s9057_s23 + $0x54] sm:$0xff]   ;;  %v7096_v57 = vld [vmem:[%s9057_s23 + $0x10] sm:$0xf] }
  0x52   : > { %v635_v63 = vrot.slane %v634_v54, 4  ;;  %v647_v0 = vrot.slane %v645_v55, 5  ;;  %v653_v1 = vrot.slane %v651_v56, 5  ;;  %v666_v13 = vshrl.u32 %v512_v8, 16  ;;  %8259 = vmatprep.subr.bf16.mxu0 %v8708_v20  ;;  %v8711_v49 = vld [vmem:[%s9057_s23 + $0x18] sm:$0xff]   ;;  %v8712_v54 = vld [vmem:[#allocation6 + $0x98] sm:$0xff]  }
  0x53   : > { %8242 = vmatmul.mubr.msk.bf16.gmra.mxu1 %vm340_vm2, %v7040_v53  ;;  %v630_v3 = vsel %vm9070_vm3, %v625_v59, %v629_v44  ;;  %v657_v4 = vrot.slane %v655_v61, 4  ;;  %v663_v5 = vrot.slane %v661_v62, 5  ;;  %v669_v14 = vshll.u32 %v512_v8, 16  ;;  %v7095_v53 = vld [vmem:[%s9057_s23 + $0xc] sm:$0xf] }
  0x54   : > { %v640_v6 = vsel %vm9070_vm3, %v635_v63, %v639_v50  ;;  %v648_v7 = vor.u32 %v647_v0, %v644_v60  ;;  %8282 = vmatpush3.bf16.msra.mxu1 %v8705_v58  ;;  %v675_v16 = vshll.u32 %v513_v9, 16  ;;  %v679_v17 = vshrl.u32 %v513_v9, 16  ;;  %v7097_v58 = vld [vmem:[%s9057_s23 + $0x14] sm:$0x1]  ;;  %v7098_v9 = vld [vmem:[%s9057_s23 + $0x18] sm:$0xf] }
  0x55   : > { %v7041_v11 = vcombine.low %v630_v3, %v640_v6  ;;  %v658_v12 = vor.u32 %v657_v4, %v653_v1  ;;  %v685_v18 = vshll.u32 %v514_v10, 16  ;;  %v668_v22 = vrot.slane %v666_v13, 4  ;;  %8283 = vmatprep.subr.bf16.mxu1 %v8709_v25  ;;  %8260 = vmatpush3.bf16.msra.mxu0 %v8708_v20  ;;  %v7099_v10 = vld [vmem:[%s9057_s23 + $0x1c] sm:$0xf] }
  0x56   : > { %v649_v15 = vrot.slane %v648_v7, 4  ;;  %v671_v23 = vrot.slane %v669_v14, 5  ;;  %v677_v27 = vrot.slane %v675_v16, 5  ;;  %v681_v28 = vrot.slane %v679_v17, 4  ;;  %8301 = vmatprep.subr.bf16.mxu0 %v8712_v54  ;;  %v7100_v14 = vld [vmem:[%s9057_s23 + $0x20] sm:$0x1] }
  0x57   : > { %8245 = vmatprep.mubr.msk.bf16.mxu1 %vm340_vm2, %v7041_v11  ;;  %v659_v21 = vrot.slane %v658_v12, 4  ;;  %v687_v29 = vrot.slane %v685_v18, 5  ;;  %v690_v36 = vshrl.u32 %v515_v24, 16  ;;  %v693_v37 = vshll.u32 %v515_v24, 16 }
  0x58   : > { %8222 = vmatmul.mubr.msk.bf16.gmra.mxu0 %vm340_vm2, %v8703_v38  ;;  %v654_v26 = vsel %vm9070_vm3, %v649_v15, %v653_v1  ;;  %v672_v34 = vor.u32 %v671_v23, %v668_v22  ;;  %v682_v39 = vor.u32 %v681_v28, %v677_v27  ;;  %v699_v40 = vshll.u32 %v516_v30, 16  ;;  %8284 = vmatpush3.bf16.msra.mxu1 %v8709_v25  ;;  %v9145_v1 = vld [vmem:[#allocation6 + $0xb8] sm:$0xff]  }
  0x59   : > { %8225 = vmatprep.mubr.msk.bf16.mxu0 %vm340_vm2, %v8706_v2  ;;  %v664_v32 = vsel %vm9070_vm3, %v659_v21, %v663_v5  ;;  %v703_v41 = vshrl.u32 %v516_v30, 16  ;;  %v692_v43 = vrot.slane %v690_v36, 4  ;;  %v695_v44 = vrot.slane %v693_v37, 5  ;;  %8325 = vmatprep.subr.bf16.mxu1 %v9145_v1  ;;  %v7103_v36 = vld [vmem:[%s9057_s23 + $0x2c] sm:$0x1] }
  0x5a   : > { %v7042_v38 = vcombine.low %v654_v26, %v664_v32  ;;  %v673_v42 = vrot.slane %v672_v34, 4  ;;  %v709_v45 = vshll.u32 %v517_v35, 16  ;;  %v683_v46 = vrot.slane %v682_v39, 4  ;;  %v7102_v35 = vld [vmem:[%s9057_s23 + $0x28] sm:$0xf] }
  0x5b   : > { %v701_v47 = vrot.slane %v699_v40, 5  ;;  %v705_v48 = vrot.slane %v703_v41, 4  ;;  %v696_v51 = vor.u32 %v695_v44, %v692_v43  ;;  %v1226_v59 = vshrl.u32 %v7095_v53, 16 }
  0x5c   : > { %8246 = vmatmul.mubr.msk.bf16.gmra.mxu1 %vm340_vm2, %v7042_v38  ;;  %v678_v50 = vsel %vm9070_vm3, %v673_v42, %v677_v27  ;;  %v711_v52 = vrot.slane %v709_v45, 5  ;;  %v688_v55 = vsel %vm9070_vm3, %v683_v46, %v687_v29  ;;  %v1229_v60 = vshll.u32 %v7095_v53, 16  ;;  %v8714_v27 = vld [vmem:[%s9057_s23 + $0x24] sm:$0xff]  }
  0x5d   : > { %v706_v56 = vor.u32 %v705_v48, %v701_v47  ;;  %v7043_v61 = vcombine.low %v678_v50, %v688_v55  ;;  %v697_v62 = vrot.slane %v696_v51, 4  ;;  %v1235_v63 = vshll.u32 %v7096_v57, 16  ;;  %v8716_v48 = vld [vmem:[#allocation6 + $0x90] sm:$0xff]  }
  0x5e   : > { %v1239_v0 = vshrl.u32 %v7096_v57, 16  ;;  %v1228_v3 = vrot.slane %v1226_v59, 4  ;;  %v1231_v4 = vrot.slane %v1229_v60, 5  ;;  %v1245_v5 = vshll.u32 %v7097_v58, 16  ;;  %v7106_v57 = vld [vmem:[%s9057_s23 + $0x38] sm:$0x1] }
  0x5f   : > { %v707_v2 = vrot.slane %v706_v56, 4  ;;  %8249 = vmatprep.mubr.msk.bf16.mxu1 %vm340_vm2, %v7043_v61  ;;  %v702_v6 = vsel %vm9070_vm3, %v697_v62, %v701_v47  ;;  %v1237_v7 = vrot.slane %v1235_v63, 5  ;;  %v1250_v15 = vshrl.u32 %v7098_v9, 16  ;;  %v8715_v47 = vld [vmem:[%s9057_s23 + $0x30] sm:$0xff]   ;;  %v8717_v59 = vld [vmem:[#allocation6 + $0xb0] sm:$0xff]  }
  0x60   : > { %8226 = vmatmul.mubr.msk.bf16.gmra.mxu0 %vm340_vm2, %v8707_v19  ;;  %v1241_v8 = vrot.slane %v1239_v0, 4  ;;  %v1232_v12 = vor.u32 %v1231_v4, %v1228_v3  ;;  %v1247_v13 = vrot.slane %v1245_v5, 5  ;;  %v1253_v18 = vshll.u32 %v7098_v9, 16  ;;  %v7105_v56 = vld [vmem:[%s9057_s23 + $0x34] sm:$0xf]  ;;  %v8718_v5 = vld [vmem:[%s9057_s23 + $0x3c] sm:$0xff]  }
  0x61   : > { %8261 = vmatprep.mubr.msk.bf16.mxu0 %vm340_vm2, %v8710_v31  ;;  %v712_v11 = vsel %vm9070_vm3, %v707_v2, %v711_v52  ;;  %v1259_v19 = vshll.u32 %v7099_v10, 16  ;;  %v1252_v21 = vrot.slane %v1250_v15, 4  ;;  %v1263_v22 = vshrl.u32 %v7099_v10, 16  ;;  %v7101_v31 = vld [vmem:[%s9057_s23 + $0x24] sm:$0xf] }
  0x62   : > { %v7044_v16 = vcombine.low %v702_v6, %v712_v11  ;;  %v1242_v17 = vor.u32 %v1241_v8, %v1237_v7  ;;  %v1233_v20 = vrot.slane %v1232_v12, 4  ;;  %v1269_v23 = vshll.u32 %v7100_v14, 16  ;;  %v7104_v52 = vld [vmem:[%s9057_s23 + $0x30] sm:$0xf]  ;;  %v8719_v12 = vld [vmem:[%s9057_s23 + $0x48] sm:$0xff]  }
  0x63   : > { %v1255_v25 = vrot.slane %v1253_v18, 5  ;;  %v1261_v26 = vrot.slane %v1259_v19, 5  ;;  %v1265_v29 = vrot.slane %v1263_v22, 4  ;;  %v1274_v37 = vshrl.u32 %v7101_v31, 16  ;;  %v8720_v18 = vld [vmem:[#allocation6 + $0x88] sm:$0xff]  }
  0x64   : > { %8250 = vmatmul.mubr.msk.bf16.gmra.mxu1 %vm340_vm2, %v7044_v16  ;;  %v1243_v24 = vrot.slane %v1242_v17, 4  ;;  %v1238_v28 = vsel %vm9070_vm3, %v1233_v20, %v1237_v7  ;;  %v1271_v30 = vrot.slane %v1269_v23, 5  ;;  %v1277_v38 = vshll.u32 %v7101_v31, 16  ;;  %v7107_v16 = vld [vmem:[%s9057_s23 + $0x3c] sm:$0xf]  ;;  %v8721_v31 = vld [vmem:[#allocation6 + $0xa8] sm:$0xff]  }
  0x65   : > { %v1256_v34 = vor.u32 %v1255_v25, %v1252_v21  ;;  %v1266_v40 = vor.u32 %v1265_v29, %v1261_v26  ;;  %v1283_v41 = vshll.u32 %v7102_v35, 16  ;;  %v1287_v42 = vshrl.u32 %v7102_v35, 16  ;;  %v7108_v17 = vld [vmem:[%s9057_s23 + $0x40] sm:$0xf]  ;;  %v7109_v21 = vld [vmem:[%s9057_s23 + $0x44] sm:$0x1] }
  0x66   : > { %v1248_v32 = vsel %vm9070_vm3, %v1243_v24, %v1247_v13  ;;  %v1276_v44 = vrot.slane %v1274_v37, 4  ;;  %v1279_v45 = vrot.slane %v1277_v38, 5  ;;  %v1293_v46 = vshll.u32 %v7103_v36, 16  ;;  %v7111_v37 = vld [vmem:[%s9057_s23 + $0x4c] sm:$0xf]  ;;  %v8722_v38 = vld [vmem:[%s9057_s23 + $0x54] sm:$0xff]  }
  0x67   : > { %v7119_v39 = vcombine.low %v1238_v28, %v1248_v32  ;;  %v1257_v43 = vrot.slane %v1256_v34, 4  ;;  %v1285_v50 = vrot.slane %v1283_v41, 5  ;;  %v1289_v51 = vrot.slane %v1287_v42, 4  ;;  %v7112_v41 = vld [vmem:[%s9057_s23 + $0x50] sm:$0x1] }
  0x68   : > { %8262 = vmatmul.mubr.msk.bf16.vlgmr.msra.gmra.mxu0 %vm340_vm2, %v8711_v49  ;;  %v1267_v49 = vrot.slane %v1266_v40, 4  ;;  %v1295_v55 = vrot.slane %v1293_v46, 5  ;;  %v1298_v58 = vshrl.u32 %v7104_v52, 16  ;;  %v1301_v62 = vshll.u32 %v7104_v52, 16 }
  0x69   : > { %8302 = vmatpush3.bf16.msra.mxu0 %v8712_v54  ;;  %8265 = vmatprep.mubr.msk.bf16.mxu0 %vm340_vm2, %v8714_v27  ;;  %v1262_v53 = vsel %vm9070_vm3, %v1257_v43, %v1261_v26  ;;  %v1280_v54 = vor.u32 %v1279_v45, %v1276_v44  ;;  %v1290_v61 = vor.u32 %v1289_v51, %v1285_v50  ;;  %v1307_v63 = vshll.u32 %v7105_v56, 16 }
  0x6a   : > { %8285 = vmatprep.mubr.msk.bf16.mxu1 %vm340_vm2, %v7119_v39  ;;  %8303 = vmatprep.subr.bf16.mxu0 %v8716_v48  ;;  %v1272_v60 = vsel %vm9070_vm3, %v1267_v49, %v1271_v30  ;;  %v1300_v3 = vrot.slane %v1298_v58, 4  ;;  %v1311_v4 = vshrl.u32 %v7105_v56, 16  ;;  %v1303_v7 = vrot.slane %v1301_v62, 5  ;;  %v7110_v30 = vld [vmem:[%s9057_s23 + $0x48] sm:$0xf] }
  0x6b   : > { %v7120_v0 = vcombine.low %v1262_v53, %v1272_v60  ;;  %v1281_v2 = vrot.slane %v1280_v54, 4  ;;  %v1291_v6 = vrot.slane %v1290_v61, 4  ;;  %v1309_v8 = vrot.slane %v1307_v63, 5  ;;  %v8724_v60 = vld [vmem:[#allocation6 + $0x80] sm:$0xff]  }
  0x6c   : > { %v1317_v9 = vshll.u32 %v7106_v57, 16  ;;  %v1313_v11 = vrot.slane %v1311_v4, 4  ;;  %v1304_v14 = vor.u32 %v1303_v7, %v1300_v3  ;;  %v1322_v22 = vshrl.u32 %v7107_v16, 16  ;;  %v7114_v63 = vld [vmem:[%s9057_s23 + $0x58] sm:$0xf] }
  0x6d   : > { %8304 = vmatpush3.bf16.msra.mxu0 %v8716_v48  ;;  %8286 = vmatmul.mubr.msk.bf16.vlgmr.msra.gmra.mxu1 %vm340_vm2, %v7120_v0  ;;  %v1286_v10 = vsel %vm9070_vm3, %v1281_v2, %v1285_v50  ;;  %v1296_v13 = vsel %vm9070_vm3, %v1291_v6, %v1295_v55  ;;  %v1325_v23 = vshll.u32 %v7107_v16, 16  ;;  %v1331_v25 = vshll.u32 %v7108_v17, 16  ;;  %v8723_v55 = vld [vmem:[%s9057_s23 + $0x60] sm:$0xff]   ;;  %v7115_v0 = vld [vmem:[%s9057_s23 + $0x5c] sm:$0x1] }
  0x6e   : > { %8326 = vmatpush3.bf16.msra.mxu1 %v9145_v1  ;;  %v1319_v15 = vrot.slane %v1317_v9, 5  ;;  %v7121_v19 = vcombine.low %v1286_v10, %v1296_v13  ;;  %v1314_v20 = vor.u32 %v1313_v11, %v1309_v8  ;;  %v1305_v24 = vrot.slane %v1304_v14, 4  ;;  %8305 = vmatprep.subr.bf16.mxu0 %v8720_v18  ;;  %v7116_v16 = vld [vmem:[%s9057_s23 + $0x60] sm:$0xf] }
  0x6f   : > { %8327 = vmatprep.subr.bf16.mxu1 %v8717_v59  ;;  %v1335_v26 = vshrl.u32 %v7108_v17, 16  ;;  %v1341_v1 = vshll.u32 %v7109_v21, 16  ;;  %v1324_v28 = vrot.slane %v1322_v22, 4  ;;  %v1327_v29 = vrot.slane %v1325_v23, 5  ;;  %v7117_v17 = vld [vmem:[%s9057_s23 + $0x64] sm:$0xf] }
  0x70   : > { %8266 = vmatmul.mubr.msk.bf16.gmra.mxu0 %vm340_vm2, %v8715_v47  ;;  %8289 = vmatprep.mubr.msk.bf16.mxu1 %vm340_vm2, %v7121_v19  ;;  %v1315_v27 = vrot.slane %v1314_v20, 4  ;;  %v1310_v32 = vsel %vm9070_vm3, %v1305_v24, %v1309_v8  ;;  %v1333_v34 = vrot.slane %v1331_v25, 5  ;;  %v1346_v42 = vshrl.u32 %v7110_v30, 16  ;;  %v8725_v8 = vld [vmem:[#allocation6 + $0xa0] sm:$0xff]   ;;  %v7118_v21 = vld [vmem:[%s9057_s23 + $0x68] sm:$0x1] }
  0x71   : > { %8269 = vmatprep.mubr.msk.bf16.mxu0 %vm340_vm2, %v8718_v5  ;;  %v1337_v35 = vrot.slane %v1335_v26, 4  ;;  %v1343_v36 = vrot.slane %v1341_v1, 5  ;;  %8306 = vmatpush3.bf16.msra.mxu0 %v8720_v18  ;;  %v1328_v40 = vor.u32 %v1327_v29, %v1324_v28  ;;  %v1349_v43 = vshll.u32 %v7110_v30, 16 }
  0x72   : > { %8328 = vmatpush3.bf16.msra.mxu1 %v8717_v59  ;;  %v1320_v39 = vsel %vm9070_vm3, %v1315_v27, %v1319_v15  ;;  %v1355_v46 = vshll.u32 %v7111_v37, 16  ;;  %v1359_v47 = vshrl.u32 %v7111_v37, 16  ;;  %v1348_v49 = vrot.slane %v1346_v42, 4  ;;  %v7113_v59 = vld [vmem:[%s9057_s23 + $0x54] sm:$0xf]  ;;  %8307 = vmatprep.subr.bf16.mxu0 %v8724_v60 }
  0x73   : > { %8329 = vmatprep.subr.bf16.mxu1 %v8721_v31  ;;  %v7122_v44 = vcombine.low %v1310_v32, %v1320_v39  ;;  %v1338_v45 = vor.u32 %v1337_v35, %v1333_v34  ;;  %v1329_v48 = vrot.slane %v1328_v40, 4  ;;  %v1351_v50 = vrot.slane %v1349_v43, 5  ;;  %v9220_v35 = vld [vmem:[#allocation6 + $0xd8] sm:$0xff]   ;;  %v1816_v39 = vld [vmem:[%s9057_s23 + $0x4] sm:$0xf] }
  0x74   : > { %v1365_v51 = vshll.u32 %v7112_v41, 16  ;;  %v1357_v53 = vrot.slane %v1355_v46, 5  ;;  %v1361_v54 = vrot.slane %v1359_v47, 4  ;;  %v1370_v2 = vshrl.u32 %v7113_v59, 16  ;;  %v1817_v40 = vld [vmem:[%s9057_s23 + $0x8] sm:$0x1] }
  0x75   : > { %8290 = vmatmul.mubr.msk.bf16.gmra.mxu1 %vm340_vm2, %v7122_v44  ;;  %v1339_v52 = vrot.slane %v1338_v45, 4  ;;  %v1334_v56 = vsel %vm9070_vm3, %v1329_v48, %v1333_v34  ;;  %v1352_v57 = vor.u32 %v1351_v50, %v1348_v49  ;;  %v1373_v3 = vshll.u32 %v7113_v59, 16  ;;  %8308 = vmatpush3.bf16.msra.mxu0 %v8724_v60  ;;  %v1815_v34 = vld [vmem:[%s9057_s23] sm:$0xf]  ;;  %v2258_v50 = vld [vmem:[%s9057_s23 + $0x4] sm:$0xf] }
  0x76   : > { %v1367_v58 = vrot.slane %v1365_v51, 5  ;;  %8330 = vmatpush3.bf16.msra.mxu1 %v8721_v31  ;;  %v1362_v62 = vor.u32 %v1361_v54, %v1357_v53  ;;  %v1379_v6 = vshll.u32 %v7114_v63, 16  ;;  %v1383_v7 = vshrl.u32 %v7114_v63, 16  ;;  %v2257_v45 = vld [vmem:[%s9057_s23] sm:$0xe]  ;;  %8349 = vmatprep.subr.bf16.mxu0 %v9220_v35 }
  0x77   : > { %v1344_v61 = vsel %vm9070_vm3, %v1339_v52, %v1343_v36  ;;  %v1353_v5 = vrot.slane %v1352_v57, 4  ;;  %v1372_v10 = vrot.slane %v1370_v2, 4  ;;  %v1375_v11 = vrot.slane %v1373_v3, 5  ;;  %8331 = vmatprep.subr.bf16.mxu1 %v8725_v8  ;;  %v2259_v51 = vld [vmem:[%s9057_s23 + $0x8] sm:$0x1] }
  0x78   : > { %8270 = vmatmul.mubr.msk.bf16.gmra.mxu0 %vm340_vm2, %v8719_v12  ;;  %v7123_v4 = vcombine.low %v1334_v56, %v1344_v61  ;;  %v1363_v9 = vrot.slane %v1362_v62, 4  ;;  %v1389_v12 = vshll.u32 %v7115_v0, 16  ;;  %v1381_v14 = vrot.slane %v1379_v6, 5  ;;  %v1818_v56 = vld [vmem:[%s9057_s23 + $0xc] sm:$0xf] }
  0x79   : > { %8273 = vmatprep.mubr.msk.bf16.mxu0 %vm340_vm2, %v8722_v38  ;;  %v1358_v13 = vsel %vm9070_vm3, %v1353_v5, %v1357_v53  ;;  %v1385_v15 = vrot.slane %v1383_v7, 4  ;;  %v1376_v19 = vor.u32 %v1375_v11, %v1372_v10  ;;  %v1394_v22 = vshrl.u32 %v7116_v16, 16  ;;  %v1819_v3 = vld [vmem:[%s9057_s23 + $0x10] sm:$0xf] }
  0x7a   : > { %8293 = vmatprep.mubr.msk.bf16.mxu1 %vm340_vm2, %v7123_v4  ;;  %v1368_v18 = vsel %vm9070_vm3, %v1363_v9, %v1367_v58  ;;  %v1391_v20 = vrot.slane %v1389_v12, 5  ;;  %8332 = vmatpush3.bf16.msra.mxu1 %v8725_v8  ;;  %v1397_v25 = vshll.u32 %v7116_v16, 16  ;;  %v1403_v26 = vshll.u32 %v7117_v17, 16  ;;  %v1820_v4 = vld [vmem:[%s9057_s23 + $0x14] sm:$0x1] }
  0x7b   : > { %v7124_v23 = vcombine.low %v1358_v13, %v1368_v18  ;;  %v1386_v24 = vor.u32 %v1385_v15, %v1381_v14  ;;  %v1377_v1 = vrot.slane %v1376_v19, 4  ;;  %v1396_v27 = vrot.slane %v1394_v22, 4  ;;  %v2260_v9 = vld [vmem:[%s9057_s23 + $0xc] sm:$0xe]  ;;  %v2262_v15 = vld [vmem:[%s9057_s23 + $0x14] sm:$0x1] }
  0x7c   : > { %v1407_v28 = vshrl.u32 %v7117_v17, 16  ;;  %v1413_v29 = vshll.u32 %v7118_v21, 16  ;;  %v1399_v31 = vrot.slane %v1397_v25, 5  ;;  %v1405_v32 = vrot.slane %v1403_v26, 5  ;;  %v1821_v25 = vld [vmem:[%s9057_s23 + $0x18] sm:$0xf] }
  0x7d   : > { %8294 = vmatmul.mubr.msk.bf16.gmra.mxu1 %vm340_vm2, %v7124_v23  ;;  %v1387_v30 = vrot.slane %v1386_v24, 4  ;;  %v1382_v36 = vsel %vm9070_vm3, %v1377_v1, %v1381_v14  ;;  %v1840_v43 = vshrl.u32 %v1815_v34, 16  ;;  %v1843_v44 = vshll.u32 %v1815_v34, 16  ;;  %v2261_v14 = vld [vmem:[%s9057_s23 + $0x10] sm:$0xf] }
  0x7e   : > { %v1409_v37 = vrot.slane %v1407_v28, 4  ;;  %v1415_v38 = vrot.slane %v1413_v29, 5  ;;  %v1400_v42 = vor.u32 %v1399_v31, %v1396_v27  ;;  %v1849_v48 = vshll.u32 %v1816_v39, 16  ;;  %v8727_v24 = vld [vmem:[#allocation6 + $0xf8] sm:$0xff]   ;;  %v1822_v29 = vld [vmem:[%s9057_s23 + $0x1c] sm:$0xf] }
  0x7f   : > { %v1392_v41 = vsel %vm9070_vm3, %v1387_v30, %v1391_v20  ;;  %v1853_v49 = vshrl.u32 %v1816_v39, 16  ;;  %v1842_v53 = vrot.slane %v1840_v43, 4  ;;  %v1845_v54 = vrot.slane %v1843_v44, 5  ;;  %8373 = vmatprep.subr.bf16.mxu1 %v8727_v24  ;;  %v1823_v39 = vld [vmem:[%s9057_s23 + $0x20] sm:$0x1] }
  0x80   : > { %8274 = vmatmul.mubr.msk.bf16.gmra.mxu0 %vm340_vm2, %v8723_v55  ;;  %v7125_v46 = vcombine.low %v1382_v36, %v1392_v41  ;;  %v1410_v47 = vor.u32 %v1409_v37, %v1405_v32  ;;  %v1401_v52 = vrot.slane %v1400_v42, 4  ;;  %v1859_v55 = vshll.u32 %v1817_v40, 16 }
  0x81   : > { %v1851_v58 = vrot.slane %v1849_v48, 5  ;;  %v1855_v59 = vrot.slane %v1853_v49, 4  ;;  %v7175_v61 = vrot.slane %v2257_v45, 9  ;;  %v1846_v63 = vor.u32 %v1845_v54, %v1842_v53  ;;  %v2263_v45 = vld [vmem:[%s9057_s23 + $0x18] sm:$0xe] }
  0x82   : > { %8297 = vmatprep.mubr.msk.bf16.mxu1 %vm340_vm2, %v7125_v46  ;;  %v1411_v57 = vrot.slane %v1410_v47, 4  ;;  %v1406_v62 = vsel %vm9070_vm3, %v1401_v52, %v1405_v32  ;;  %v1861_v0 = vrot.slane %v1859_v55, 5  ;;  %v2310_v2 = vrot.slane %v2258_v50, 5  ;;  %v2264_v50 = vld [vmem:[%s9057_s23 + $0x1c] sm:$0xf] }
  0x83   : > { %v1856_v6 = vor.u32 %v1855_v59, %v1851_v58  ;;  %v2313_v7 = vrot.slane %v2259_v51, 5  ;;  %v1864_v8 = vshrl.u32 %v1818_v56, 16  ;;  %v1847_v11 = vrot.slane %v1846_v63, 4  ;;  %v2265_v55 = vld [vmem:[%s9057_s23 + $0x20] sm:$0x1] }
  0x84   : > { %v1416_v5 = vsel %vm9070_vm3, %v1411_v57, %v1415_v38  ;;  %v2311_v12 = vsel %vm9236_vm6, %v7175_v61, %v2310_v2  ;;  %v2312_v13 = vrot.slane %v2310_v2, 4  ;;  %v1867_v18 = vshll.u32 %v1818_v56, 16  ;;  %v1824_v61 = vld [vmem:[%s9057_s23 + $0x24] sm:$0xf] }
  0x85   : > { %v7126_v10 = vcombine.low %v1406_v62, %v1416_v5  ;;  %v1857_v16 = vrot.slane %v1856_v6, 4  ;;  %v1866_v17 = vrot.slane %v1864_v8, 4  ;;  %v1873_v19 = vshll.u32 %v1819_v3, 16 }
  0x86   : > { %v1852_v20 = vsel %vm9070_vm3, %v1847_v11, %v1851_v58  ;;  %v2314_v21 = vsel %vm9236_vm6, %v2312_v13, %v2313_v7  ;;  %v1877_v22 = vshrl.u32 %v1819_v3, 16  ;;  %v1883_v23 = vshll.u32 %v1820_v4, 16  ;;  %v1825_v3 = vld [vmem:[%s9057_s23 + $0x28] sm:$0xf] }
  0x87   : > { %8298 = vmatmul.mubr.msk.bf16.gmra.mxu1 %vm340_vm2, %v7126_v10  ;;  %v1862_v26 = vsel %vm9070_vm3, %v1857_v16, %v1861_v0  ;;  %v7183_v1 = vcombine.low %v2311_v12, %v2314_v21  ;;  %v1869_v27 = vrot.slane %v1867_v18, 5  ;;  %v1875_v28 = vrot.slane %v1873_v19, 5  ;;  %v8729_v4 = vld [vmem:[#allocation6 + $0xf0] sm:$0xff]   ;;  %v2266_v10 = vld [vmem:[%s9057_s23 + $0x24] sm:$0xe] }
  0x88   : > { %v7155_v30 = vcombine.low %v1852_v20, %v1862_v26  ;;  %v1879_v31 = vrot.slane %v1877_v22, 4  ;;  %v1885_v32 = vrot.slane %v1883_v23, 5  ;;  %v7176_v34 = vrot.slane %v2260_v9, 9  ;;  %v1826_v9 = vld [vmem:[%s9057_s23 + $0x2c] sm:$0x1] }
  0x89   : > { %8333 = vmatprep.mubr.msk.bf16.mxu1 %vm340_vm2, %v7183_v1  ;;  %v1870_v36 = vor.u32 %v1869_v27, %v1866_v17  ;;  %v2317_v37 = vrot.slane %v2261_v14, 5  ;;  %v2320_v38 = vrot.slane %v2262_v15, 5  ;;  %v1888_v40 = vshrl.u32 %v1821_v25, 16  ;;  %v8728_v11 = vld [vmem:[#allocation6 + $0xd0] sm:$0xff]  }
  0x8a   : > { %8309 = vmatprep.mubr.msk.bf16.mxu0 %vm340_vm2, %v7155_v30  ;;  %v1880_v41 = vor.u32 %v1879_v31, %v1875_v28  ;;  %v1891_v42 = vshll.u32 %v1821_v25, 16  ;;  %v1897_v43 = vshll.u32 %v1822_v29, 16  ;;  %v1901_v44 = vshrl.u32 %v1822_v29, 16  ;;  %v2267_v16 = vld [vmem:[%s9057_s23 + $0x28] sm:$0xf]  ;;  %v8730_v30 = vld [vmem:[#allocation6 + $0xc8] sm:$0xff]  }
  0x8b   : > { %v1871_v46 = vrot.slane %v1870_v36, 4  ;;  %v2318_v47 = vsel %vm9236_vm6, %v7176_v34, %v2317_v37  ;;  %v2319_v48 = vrot.slane %v2317_v37, 4  ;;  %v1890_v49 = vrot.slane %v1888_v40, 4  ;;  %v2268_v26 = vld [vmem:[%s9057_s23 + $0x2c] sm:$0x1]  ;;  %v8731_v31 = vld [vmem:[#allocation6 + $0xe8] sm:$0xff]  }
  0x8c   : > { %v1881_v51 = vrot.slane %v1880_v41, 4  ;;  %v1893_v52 = vrot.slane %v1891_v42, 5  ;;  %v1899_v53 = vrot.slane %v1897_v43, 5  ;;  %v1903_v54 = vrot.slane %v1901_v44, 4  ;;  %v2269_v43 = vld [vmem:[%s9057_s23 + $0x30] sm:$0xe] }
  0x8d   : > { %v1876_v56 = vsel %vm9070_vm3, %v1871_v46, %v1875_v28  ;;  %v2321_v57 = vsel %vm9236_vm6, %v2319_v48, %v2320_v38  ;;  %v1907_v58 = vshll.u32 %v1823_v39, 16  ;;  %v7177_v59 = vrot.slane %v2263_v45, 9  ;;  %v1829_v38 = vld [vmem:[%s9057_s23 + $0x38] sm:$0x1] }
  0x8e   : > { %v1886_v62 = vsel %vm9070_vm3, %v1881_v51, %v1885_v32  ;;  %v7184_v63 = vcombine.low %v2318_v47, %v2321_v57  ;;  %v1894_v0 = vor.u32 %v1893_v52, %v1890_v49  ;;  %v1904_v2 = vor.u32 %v1903_v54, %v1899_v53  ;;  %v8733_v44 = vld [vmem:[#allocation6 + $0xe0] sm:$0xff]   ;;  %v2270_v49 = vld [vmem:[%s9057_s23 + $0x34] sm:$0xf] }
  0x8f   : > { %v7156_v5 = vcombine.low %v1876_v56, %v1886_v62  ;;  %v1909_v6 = vrot.slane %v1907_v58, 5  ;;  %v2324_v7 = vrot.slane %v2264_v50, 5  ;;  %v2327_v8 = vrot.slane %v2265_v55, 5  ;;  %v2271_v54 = vld [vmem:[%s9057_s23 + $0x38] sm:$0x1] }
  0x90   : > { %8334 = vmatmul.mubr.msk.bf16.vlgmr.msra.gmra.mxu1 %vm340_vm2, %v7184_v63  ;;  %v1895_v12 = vrot.slane %v1894_v0, 4  ;;  %v1905_v13 = vrot.slane %v1904_v2, 4  ;;  %v1912_v14 = vshrl.u32 %v1824_v61, 16  ;;  %v1915_v15 = vshll.u32 %v1824_v61, 16  ;;  %v8732_v55 = vld [vmem:[#allocation6 + $0xc0] sm:$0xff]  }
  0x91   : > { %8310 = vmatmul.mubr.msk.bf16.vlgmr.msra.gmra.mxu0 %vm340_vm2, %v7156_v5  ;;  %8374 = vmatpush3.bf16.msra.mxu1 %v8727_v24  ;;  %v2325_v17 = vsel %vm9236_vm6, %v7177_v59, %v2324_v7  ;;  %v2326_v18 = vrot.slane %v2324_v7, 4  ;;  %v1921_v19 = vshll.u32 %v1825_v3, 16  ;;  %v1925_v20 = vshrl.u32 %v1825_v3, 16  ;;  %v1827_v24 = vld [vmem:[%s9057_s23 + $0x30] sm:$0xf] }
  0x92   : > { %8350 = vmatpush3.bf16.msra.mxu0 %v9220_v35  ;;  %v1900_v21 = vsel %vm9070_vm3, %v1895_v12, %v1899_v53  ;;  %v1910_v22 = vsel %vm9070_vm3, %v1905_v13, %v1909_v6  ;;  %v1914_v23 = vrot.slane %v1912_v14, 4  ;;  %v1917_v25 = vrot.slane %v1915_v15, 5  ;;  %8375 = vmatprep.subr.bf16.mxu1 %v8729_v4  ;;  %v1828_v35 = vld [vmem:[%s9057_s23 + $0x34] sm:$0xf]  ;;  %v1830_v61 = vld [vmem:[%s9057_s23 + $0x3c] sm:$0xf] }
  0x93   : > { %v7157_v1 = vcombine.low %v1900_v21, %v1910_v22  ;;  %v2328_v27 = vsel %vm9236_vm6, %v2326_v18, %v2327_v8  ;;  %v1923_v28 = vrot.slane %v1921_v19, 5  ;;  %v1927_v29 = vrot.slane %v1925_v20, 4  ;;  %8351 = vmatprep.subr.bf16.mxu0 %v8728_v11  ;;  %v1831_v3 = vld [vmem:[%s9057_s23 + $0x40] sm:$0xf] }
  0x94   : > { %v7185_v32 = vcombine.low %v2325_v17, %v2328_v27  ;;  %v1918_v34 = vor.u32 %v1917_v25, %v1914_v23  ;;  %v1931_v36 = vshll.u32 %v1826_v9, 16  ;;  %v7178_v37 = vrot.slane %v2266_v10, 9  ;;  %v1832_v9 = vld [vmem:[%s9057_s23 + $0x44] sm:$0x1]  ;;  %v2272_v10 = vld [vmem:[%s9057_s23 + $0x3c] sm:$0xe] }
  0x95   : > { %8313 = vmatprep.mubr.msk.bf16.mxu0 %vm340_vm2, %v7157_v1  ;;  %v1928_v39 = vor.u32 %v1927_v29, %v1923_v28  ;;  %v2331_v40 = vrot.slane %v2267_v16, 5  ;;  %v2334_v41 = vrot.slane %v2268_v26, 5  ;;  %8376 = vmatpush3.bf16.msra.mxu1 %v8729_v4  ;;  %v1936_v42 = vshrl.u32 %v1827_v24, 16  ;;  %v9309_v4 = vld [vmem:[#allocation6 + $0x118] sm:$0xff]   ;;  %v2273_v25 = vld [vmem:[%s9057_s23 + $0x40] sm:$0xf] }
  0x96   : > { %8337 = vmatprep.mubr.msk.bf16.mxu1 %vm340_vm2, %v7185_v32  ;;  %v1919_v45 = vrot.slane %v1918_v34, 4  ;;  %v1933_v46 = vrot.slane %v1931_v36, 5  ;;  %8352 = vmatpush3.bf16.msra.mxu0 %v8728_v11  ;;  %v1939_v47 = vshll.u32 %v1827_v24, 16  ;;  %v1945_v48 = vshll.u32 %v1828_v35, 16  ;;  %v9313_v11 = vld [vmem:[#allocation6 + $0x138] sm:$0xff]  }
  0x97   : > { %v1929_v50 = vrot.slane %v1928_v39, 4  ;;  %v2332_v51 = vsel %vm9236_vm6, %v7178_v37, %v2331_v40  ;;  %v2333_v52 = vrot.slane %v2331_v40, 4  ;;  %v1938_v53 = vrot.slane %v1936_v42, 4  ;;  %8353 = vmatprep.subr.bf16.mxu0 %v8730_v30  ;;  %8377 = vmatprep.subr.bf16.mxu1 %v8731_v31  ;;  %v1833_v32 = vld [vmem:[%s9057_s23 + $0x48] sm:$0xf] }
  0x98   : > { %v1924_v56 = vsel %vm9070_vm3, %v1919_v45, %v1923_v28  ;;  %v1941_v57 = vrot.slane %v1939_v47, 5  ;;  %v1947_v58 = vrot.slane %v1945_v48, 5  ;;  %v1949_v59 = vshrl.u32 %v1828_v35, 16  ;;  %v2274_v28 = vld [vmem:[%s9057_s23 + $0x44] sm:$0x1] }
  0x99   : > { %v1934_v62 = vsel %vm9070_vm3, %v1929_v50, %v1933_v46  ;;  %v2335_v63 = vsel %vm9236_vm6, %v2333_v52, %v2334_v41  ;;  %v1955_v0 = vshll.u32 %v1829_v38, 16  ;;  %v7179_v2 = vrot.slane %v2269_v43, 9  ;;  %8378 = vmatpush3.bf16.msra.mxu1 %v8731_v31  ;;  %v1834_v39 = vld [vmem:[%s9057_s23 + $0x4c] sm:$0xf] }
  0x9a   : > { %v7158_v5 = vcombine.low %v1924_v56, %v1934_v62  ;;  %v7186_v6 = vcombine.low %v2332_v51, %v2335_v63  ;;  %v1942_v7 = vor.u32 %v1941_v57, %v1938_v53  ;;  %v1951_v8 = vrot.slane %v1949_v59, 4  ;;  %8354 = vmatpush3.bf16.msra.mxu0 %v8730_v30  ;;  %8379 = vmatprep.subr.bf16.mxu1 %v8733_v44  ;;  %v2277_v59 = vld [vmem:[%s9057_s23 + $0x50] sm:$0x1] }
  0x9b   : > { %v1957_v12 = vrot.slane %v1955_v0, 5  ;;  %v2338_v13 = vrot.slane %v2270_v49, 5  ;;  %v2341_v14 = vrot.slane %v2271_v54, 5  ;;  %v1960_v15 = vshrl.u32 %v1830_v61, 16  ;;  %8355 = vmatprep.subr.bf16.mxu0 %v8732_v55  ;;  %v2275_v49 = vld [vmem:[%s9057_s23 + $0x48] sm:$0xe] }
  0x9c   : > { %8314 = vmatmul.mubr.msk.bf16.gmra.mxu0 %vm340_vm2, %v7158_v5  ;;  %8338 = vmatmul.mubr.msk.bf16.gmra.mxu1 %vm340_vm2, %v7186_v6  ;;  %v1943_v16 = vrot.slane %v1942_v7, 4  ;;  %v1952_v17 = vor.u32 %v1951_v8, %v1947_v58  ;;  %v1963_v18 = vshll.u32 %v1830_v61, 16  ;;  %v1969_v19 = vshll.u32 %v1831_v3, 16  ;;  %v2276_v54 = vld [vmem:[%s9057_s23 + $0x4c] sm:$0xf] }
  0x9d   : > { %v2339_v20 = vsel %vm9236_vm6, %v7179_v2, %v2338_v13  ;;  %v2340_v21 = vrot.slane %v2338_v13, 4  ;;  %v1962_v22 = vrot.slane %v1960_v15, 4  ;;  %v1973_v23 = vshrl.u32 %v1831_v3, 16  ;;  %8380 = vmatpush3.bf16.msra.mxu1 %v8733_v44  ;;  %v1835_v44 = vld [vmem:[%s9057_s23 + $0x50] sm:$0x1] }
  0x9e   : > { %v1948_v26 = vsel %vm9070_vm3, %v1943_v16, %v1947_v58  ;;  %v1953_v24 = vrot.slane %v1952_v17, 4  ;;  %v1965_v1 = vrot.slane %v1963_v18, 5  ;;  %v1971_v27 = vrot.slane %v1969_v19, 5  ;;  %8356 = vmatpush3.bf16.msra.mxu0 %v8732_v55  ;;  %8421 = vmatprep.subr.bf16.mxu1 %v9313_v11  ;;  %v1836_v61 = vld [vmem:[%s9057_s23 + $0x54] sm:$0xf] }
  0x9f   : > { %v2342_v29 = vsel %vm9236_vm6, %v2340_v21, %v2341_v14  ;;  %v1975_v35 = vrot.slane %v1973_v23, 4  ;;  %v1979_v30 = vshll.u32 %v1832_v9, 16  ;;  %v7180_v31 = vrot.slane %v2272_v10, 9  ;;  %8397 = vmatprep.subr.bf16.mxu0 %v9309_v4  ;;  %v1837_v3 = vld [vmem:[%s9057_s23 + $0x58] sm:$0xf] }
  0xa0   : > { %v1958_v34 = vsel %vm9070_vm3, %v1953_v24, %v1957_v12  ;;  %v7187_v36 = vcombine.low %v2339_v20, %v2342_v29  ;;  %v1966_v37 = vor.u32 %v1965_v1, %v1962_v22  ;;  %v2345_v38 = vrot.slane %v2273_v25, 5  ;;  %v1838_v9 = vld [vmem:[%s9057_s23 + $0x5c] sm:$0x1]  ;;  %v2278_v10 = vld [vmem:[%s9057_s23 + $0x54] sm:$0xe] }
  0xa1   : > { %v7159_v40 = vcombine.low %v1948_v26, %v1958_v34  ;;  %v1976_v41 = vor.u32 %v1975_v35, %v1971_v27  ;;  %v1981_v42 = vrot.slane %v1979_v30, 5  ;;  %v2348_v43 = vrot.slane %v2274_v28, 5  ;;  %v2279_v25 = vld [vmem:[%s9057_s23 + $0x58] sm:$0xf]  ;;  %v2280_v28 = vld [vmem:[%s9057_s23 + $0x5c] sm:$0x1] }
  0xa2   : > { %8341 = vmatprep.mubr.msk.bf16.mxu1 %vm340_vm2, %v7187_v36  ;;  %v1967_v45 = vrot.slane %v1966_v37, 4  ;;  %v2346_v46 = vsel %vm9236_vm6, %v7180_v31, %v2345_v38  ;;  %v2347_v47 = vrot.slane %v2345_v38, 4  ;;  %v1984_v48 = vshrl.u32 %v1833_v32, 16 }
  0xa3   : > { %8317 = vmatprep.mubr.msk.bf16.mxu0 %vm340_vm2, %v7159_v40  ;;  %v1977_v50 = vrot.slane %v1976_v41, 4  ;;  %v1987_v51 = vshll.u32 %v1833_v32, 16  ;;  %v1993_v52 = vshll.u32 %v1834_v39, 16  ;;  %v1997_v53 = vshrl.u32 %v1834_v39, 16  ;;  %v7203_v32 = vld [vmem:[%s9057_s23 + $0xc] sm:$0xf] }
  0xa4   : > { %v1972_v55 = vsel %vm9070_vm3, %v1967_v45, %v1971_v27  ;;  %v2349_v56 = vsel %vm9236_vm6, %v2347_v47, %v2348_v43  ;;  %v1986_v57 = vrot.slane %v1984_v48, 4  ;;  %v2003_v58 = vshll.u32 %v1835_v44, 16  ;;  %v7204_v39 = vld [vmem:[%s9057_s23 + $0x10] sm:$0xf]  ;;  %v7205_v44 = vld [vmem:[%s9057_s23 + $0x14] sm:$0x1] }
  0xa5   : > { %v1982_v62 = vsel %vm9070_vm3, %v1977_v50, %v1981_v42  ;;  %v7188_v63 = vcombine.low %v2346_v46, %v2349_v56  ;;  %v1989_v0 = vrot.slane %v1987_v51, 5  ;;  %v1995_v2 = vrot.slane %v1993_v52, 5  ;;  %v7247_v45 = vld [vmem:[%s9057_s23 + $0xc] sm:$0xe]  ;;  %v7248_v50 = vld [vmem:[%s9057_s23 + $0x10] sm:$0xf] }
  0xa6   : > { %v7160_v5 = vcombine.low %v1972_v55, %v1982_v62  ;;  %v1999_v6 = vrot.slane %v1997_v53, 4  ;;  %v2005_v7 = vrot.slane %v2003_v58, 5  ;;  %v7181_v8 = vrot.slane %v2275_v49, 9  ;;  %v7249_v55 = vld [vmem:[%s9057_s23 + $0x14] sm:$0x1] }
  0xa7   : > { %8342 = vmatmul.mubr.msk.bf16.gmra.mxu1 %vm340_vm2, %v7188_v63  ;;  %v1990_v12 = vor.u32 %v1989_v0, %v1986_v57  ;;  %v2352_v13 = vrot.slane %v2276_v54, 5  ;;  %v2355_v14 = vrot.slane %v2277_v59, 5  ;;  %v2008_v15 = vshrl.u32 %v1836_v61, 16  ;;  %v7207_v62 = vld [vmem:[%s9057_s23 + $0x1c] sm:$0xf] }
  0xa8   : > { %8318 = vmatmul.mubr.msk.bf16.gmra.mxu0 %vm340_vm2, %v7160_v5  ;;  %v2000_v16 = vor.u32 %v1999_v6, %v1995_v2  ;;  %v2011_v17 = vshll.u32 %v1836_v61, 16  ;;  %v2017_v18 = vshll.u32 %v1837_v3, 16  ;;  %v2021_v19 = vshrl.u32 %v1837_v3, 16  ;;  %v7206_v61 = vld [vmem:[%s9057_s23 + $0x18] sm:$0xf] }
  0xa9   : > { %v1991_v20 = vrot.slane %v1990_v12, 4  ;;  %v2353_v21 = vsel %vm9236_vm6, %v7181_v8, %v2352_v13  ;;  %v2354_v22 = vrot.slane %v2352_v13, 4  ;;  %v2010_v23 = vrot.slane %v2008_v15, 4  ;;  %v7250_v15 = vld [vmem:[%s9057_s23 + $0x18] sm:$0xe] }
  0xaa   : > { %v2001_v26 = vrot.slane %v2000_v16, 4  ;;  %v2013_v24 = vrot.slane %v2011_v17, 5  ;;  %v2019_v1 = vrot.slane %v2017_v18, 5  ;;  %v2023_v27 = vrot.slane %v2021_v19, 4 }
  0xab   : > { %v1996_v29 = vsel %vm9070_vm3, %v1991_v20, %v1995_v2  ;;  %v2356_v35 = vsel %vm9236_vm6, %v2354_v22, %v2355_v14  ;;  %v2027_v30 = vshll.u32 %v1838_v9, 16  ;;  %v7182_v31 = vrot.slane %v2278_v10, 9  ;;  %v7208_v9 = vld [vmem:[%s9057_s23 + $0x20] sm:$0x1]  ;;  %v7251_v20 = vld [vmem:[%s9057_s23 + $0x1c] sm:$0xf] }
  0xac   : > { %v2006_v34 = vsel %vm9070_vm3, %v2001_v26, %v2005_v7  ;;  %v7189_v36 = vcombine.low %v2353_v21, %v2356_v35  ;;  %v2014_v37 = vor.u32 %v2013_v24, %v2010_v23  ;;  %v2024_v38 = vor.u32 %v2023_v27, %v2019_v1  ;;  %v7252_v26 = vld [vmem:[%s9057_s23 + $0x20] sm:$0x1] }
  0xad   : > { %v7161_v40 = vcombine.low %v1996_v29, %v2006_v34  ;;  %v2029_v41 = vrot.slane %v2027_v30, 5  ;;  %v2359_v42 = vrot.slane %v2279_v25, 5  ;;  %v2362_v43 = vrot.slane %v2280_v28, 5  ;;  %v7209_v29 = vld [vmem:[%s9057_s23 + $0x24] sm:$0xf] }
  0xae   : > { %8345 = vmatprep.mubr.msk.bf16.mxu1 %vm340_vm2, %v7189_v36  ;;  %v2015_v46 = vrot.slane %v2014_v37, 4  ;;  %v2025_v47 = vrot.slane %v2024_v38, 4  ;;  %v2615_v48 = vshrl.u32 %v7203_v32, 16  ;;  %v2618_v49 = vshll.u32 %v7203_v32, 16  ;;  %v7210_v34 = vld [vmem:[%s9057_s23 + $0x28] sm:$0xf] }
  0xaf   : > { %8321 = vmatprep.mubr.msk.bf16.mxu0 %vm340_vm2, %v7161_v40  ;;  %v2360_v51 = vsel %vm9236_vm6, %v7182_v31, %v2359_v42  ;;  %v2361_v52 = vrot.slane %v2359_v42, 4  ;;  %v2624_v53 = vshll.u32 %v7204_v39, 16  ;;  %v2628_v54 = vshrl.u32 %v7204_v39, 16  ;;  %v7211_v40 = vld [vmem:[%s9057_s23 + $0x2c] sm:$0x1] }
  0xb0   : > { %v2020_v56 = vsel %vm9070_vm3, %v2015_v46, %v2019_v1  ;;  %v2030_v57 = vsel %vm9070_vm3, %v2025_v47, %v2029_v41  ;;  %v2617_v58 = vrot.slane %v2615_v48, 4  ;;  %v2620_v59 = vrot.slane %v2618_v49, 5  ;;  %v7253_v41 = vld [vmem:[%s9057_s23 + $0x24] sm:$0xe]  ;;  %v7254_v46 = vld [vmem:[%s9057_s23 + $0x28] sm:$0xf] }
  0xb1   : > { %v7162_v63 = vcombine.low %v2020_v56, %v2030_v57  ;;  %v2363_v0 = vsel %vm9236_vm6, %v2361_v52, %v2362_v43  ;;  %v2626_v2 = vrot.slane %v2624_v53, 5  ;;  %v2630_v3 = vrot.slane %v2628_v54, 4  ;;  %v7212_v56 = vld [vmem:[%s9057_s23 + $0x30] sm:$0xf] }
  0xb2   : > { %v7190_v5 = vcombine.low %v2360_v51, %v2363_v0  ;;  %v2621_v6 = vor.u32 %v2620_v59, %v2617_v58  ;;  %v2634_v7 = vshll.u32 %v7205_v44, 16  ;;  %v7271_v8 = vrot.slane %v7247_v45, 9  ;;  %v7255_v51 = vld [vmem:[%s9057_s23 + $0x2c] sm:$0x1] }
  0xb3   : > { %8322 = vmatmul.mubr.msk.bf16.gmra.mxu0 %vm340_vm2, %v7162_v63  ;;  %v2631_v10 = vor.u32 %v2630_v3, %v2626_v2  ;;  %v3082_v12 = vrot.slane %v7248_v50, 5  ;;  %v3085_v13 = vrot.slane %v7249_v55, 5  ;;  %v2639_v14 = vshrl.u32 %v7206_v61, 16 }
  0xb4   : > { %8346 = vmatmul.mubr.msk.bf16.gmra.mxu1 %vm340_vm2, %v7190_v5  ;;  %v2622_v16 = vrot.slane %v2621_v6, 4  ;;  %v2636_v17 = vrot.slane %v2634_v7, 5  ;;  %v2642_v18 = vshll.u32 %v7206_v61, 16  ;;  %v2648_v19 = vshll.u32 %v7207_v62, 16  ;;  %v8736_v5 = vld [vmem:[#allocation6 + $0x110] sm:$0xff]  }
  0xb5   : > { %v2632_v21 = vrot.slane %v2631_v10, 4  ;;  %v3083_v22 = vsel %vm9236_vm6, %v7271_v8, %v3082_v12  ;;  %v3084_v23 = vrot.slane %v3082_v12, 4  ;;  %v2641_v25 = vrot.slane %v2639_v14, 4  ;;  %v8737_v10 = vld [vmem:[#allocation6 + $0x130] sm:$0xff]  }
  0xb6   : > { %v2627_v24 = vsel %vm9070_vm3, %v2622_v16, %v2626_v2  ;;  %v2644_v1 = vrot.slane %v2642_v18, 5  ;;  %v2650_v27 = vrot.slane %v2648_v19, 5  ;;  %v2652_v28 = vshrl.u32 %v7207_v62, 16  ;;  %v7213_v62 = vld [vmem:[%s9057_s23 + $0x34] sm:$0xf] }
  0xb7   : > { %v2637_v35 = vsel %vm9070_vm3, %v2632_v21, %v2636_v17  ;;  %v3086_v30 = vsel %vm9236_vm6, %v3084_v23, %v3085_v13  ;;  %v2658_v31 = vshll.u32 %v7208_v9, 16  ;;  %v7272_v32 = vrot.slane %v7250_v15, 9  ;;  %v7214_v16 = vld [vmem:[%s9057_s23 + $0x38] sm:$0x1]  ;;  %v7256_v21 = vld [vmem:[%s9057_s23 + $0x30] sm:$0xe] }
  0xb8   : > { %v7227_v36 = vcombine.low %v2627_v24, %v2637_v35  ;;  %v7279_v37 = vcombine.low %v3083_v22, %v3086_v30  ;;  %v2645_v38 = vor.u32 %v2644_v1, %v2641_v25  ;;  %v2654_v39 = vrot.slane %v2652_v28, 4  ;;  %v7257_v24 = vld [vmem:[%s9057_s23 + $0x34] sm:$0xf]  ;;  %v7258_v35 = vld [vmem:[%s9057_s23 + $0x38] sm:$0x1] }
  0xb9   : > { %v2660_v42 = vrot.slane %v2658_v31, 5  ;;  %v3089_v43 = vrot.slane %v7251_v20, 5  ;;  %v3092_v44 = vrot.slane %v7252_v26, 5  ;;  %v2663_v45 = vshrl.u32 %v7209_v29, 16 }
  0xba   : > { %8357 = vmatprep.mubr.msk.bf16.mxu0 %vm340_vm2, %v7227_v36  ;;  %8381 = vmatprep.mubr.msk.bf16.mxu1 %vm340_vm2, %v7279_v37  ;;  %v2646_v47 = vrot.slane %v2645_v38, 4  ;;  %v2655_v48 = vor.u32 %v2654_v39, %v2650_v27  ;;  %v2666_v49 = vshll.u32 %v7209_v29, 16  ;;  %v2672_v50 = vshll.u32 %v7210_v34, 16  ;;  %v8738_v36 = vld [vmem:[#allocation6 + $0x108] sm:$0xff]  }
  0xbb   : > { %v3090_v52 = vsel %vm9236_vm6, %v7272_v32, %v3089_v43  ;;  %v3091_v53 = vrot.slane %v3089_v43, 4  ;;  %v2665_v54 = vrot.slane %v2663_v45, 4  ;;  %v2676_v55 = vshrl.u32 %v7210_v34, 16  ;;  %v8739_v37 = vld [vmem:[#allocation6 + $0x128] sm:$0xff]  }
  0xbc   : > { %v2651_v57 = vsel %vm9070_vm3, %v2646_v47, %v2650_v27  ;;  %v2656_v58 = vrot.slane %v2655_v48, 4  ;;  %v2668_v59 = vrot.slane %v2666_v49, 5  ;;  %v2674_v61 = vrot.slane %v2672_v50, 5  ;;  %v7259_v47 = vld [vmem:[%s9057_s23 + $0x3c] sm:$0xe] }
  0xbd   : > { %v3093_v63 = vsel %vm9236_vm6, %v3091_v53, %v3092_v44  ;;  %v2678_v0 = vrot.slane %v2676_v55, 4  ;;  %v2682_v2 = vshll.u32 %v7211_v40, 16  ;;  %v7273_v3 = vrot.slane %v7253_v41, 9  ;;  %v8740_v53 = vld [vmem:[#allocation6 + $0x100] sm:$0xff]  }
  0xbe   : > { %v2661_v6 = vsel %vm9070_vm3, %v2656_v58, %v2660_v42  ;;  %v7280_v7 = vcombine.low %v3090_v52, %v3093_v63  ;;  %v2669_v8 = vor.u32 %v2668_v59, %v2665_v54  ;;  %v3096_v9 = vrot.slane %v7254_v46, 5  ;;  %v7217_v42 = vld [vmem:[%s9057_s23 + $0x44] sm:$0x1]  ;;  %v7260_v52 = vld [vmem:[%s9057_s23 + $0x40] sm:$0xf]  ;;  %v8741_v59 = vld [vmem:[#allocation6 + $0x120] sm:$0xff]  }
  0xbf   : > { %v7228_v12 = vcombine.low %v2651_v57, %v2661_v6  ;;  %v2679_v13 = vor.u32 %v2678_v0, %v2674_v61  ;;  %v2684_v14 = vrot.slane %v2682_v2, 5  ;;  %v3099_v15 = vrot.slane %v7255_v51, 5  ;;  %v7261_v58 = vld [vmem:[%s9057_s23 + $0x44] sm:$0x1]  ;;  %v7218_v2 = vld [vmem:[%s9057_s23 + $0x48] sm:$0xf] }
  0xc0   : > { %8382 = vmatmul.mubr.msk.bf16.vlgmr.msra.gmra.mxu1 %vm340_vm2, %v7280_v7  ;;  %v2670_v17 = vrot.slane %v2669_v8, 4  ;;  %v3097_v18 = vsel %vm9236_vm6, %v7273_v3, %v3096_v9  ;;  %v3098_v19 = vrot.slane %v3096_v9, 4  ;;  %v2687_v20 = vshrl.u32 %v7212_v56, 16  ;;  %v9438_v3 = vld [vmem:[#allocation6 + $0x178] sm:$0xff]  }
  0xc1   : > { %8358 = vmatmul.mubr.msk.bf16.vlgmr.msra.gmra.mxu0 %vm340_vm2, %v7228_v12  ;;  %8422 = vmatpush3.bf16.msra.mxu1 %v9313_v11  ;;  %v2680_v22 = vrot.slane %v2679_v13, 4  ;;  %v2690_v23 = vshll.u32 %v7212_v56, 16  ;;  %v2696_v25 = vshll.u32 %v7213_v62, 16  ;;  %v2700_v26 = vshrl.u32 %v7213_v62, 16  ;;  %v7215_v11 = vld [vmem:[%s9057_s23 + $0x3c] sm:$0xf] }
  0xc2   : > { %8398 = vmatpush3.bf16.msra.mxu0 %v9309_v4  ;;  %v2675_v1 = vsel %vm9070_vm3, %v2670_v17, %v2674_v61  ;;  %v3100_v27 = vsel %vm9236_vm6, %v3098_v19, %v3099_v15  ;;  %v2689_v28 = vrot.slane %v2687_v20, 4  ;;  %v2706_v29 = vshll.u32 %v7214_v16, 16  ;;  %8423 = vmatprep.subr.bf16.mxu1 %v8737_v10  ;;  %v7216_v4 = vld [vmem:[%s9057_s23 + $0x40] sm:$0xf]  ;;  %v7220_v19 = vld [vmem:[%s9057_s23 + $0x50] sm:$0x1] }
  0xc3   : > { %v2685_v30 = vsel %vm9070_vm3, %v2680_v22, %v2684_v14  ;;  %v7281_v31 = vcombine.low %v3097_v18, %v3100_v27  ;;  %v2692_v32 = vrot.slane %v2690_v23, 5  ;;  %v2698_v34 = vrot.slane %v2696_v25, 5  ;;  %8399 = vmatprep.subr.bf16.mxu0 %v8736_v5  ;;  %v7219_v14 = vld [vmem:[%s9057_s23 + $0x4c] sm:$0xf]  ;;  %v9448_v20 = vld [vmem:[#allocation6 + $0x158] sm:$0xff]  }
  0xc4   : > { %v7229_v38 = vcombine.low %v2675_v1, %v2685_v30  ;;  %v2702_v39 = vrot.slane %v2700_v26, 4  ;;  %v2708_v40 = vrot.slane %v2706_v29, 5  ;;  %v7274_v41 = vrot.slane %v7256_v21, 9  ;;  %v7262_v26 = vld [vmem:[%s9057_s23 + $0x48] sm:$0xe] }
  0xc5   : > { %8385 = vmatprep.mubr.msk.bf16.mxu1 %vm340_vm2, %v7281_v31  ;;  %v2693_v43 = vor.u32 %v2692_v32, %v2689_v28  ;;  %v3103_v44 = vrot.slane %v7257_v24, 5  ;;  %v3106_v45 = vrot.slane %v7258_v35, 5  ;;  %8424 = vmatpush3.bf16.msra.mxu1 %v8737_v10  ;;  %v2711_v46 = vshrl.u32 %v7215_v11, 16  ;;  %v7263_v29 = vld [vmem:[%s9057_s23 + $0x4c] sm:$0xf] }
  0xc6   : > { %8361 = vmatprep.mubr.msk.bf16.mxu0 %vm340_vm2, %v7229_v38  ;;  %v2703_v48 = vor.u32 %v2702_v39, %v2698_v34  ;;  %8400 = vmatpush3.bf16.msra.mxu0 %v8736_v5  ;;  %v2714_v49 = vshll.u32 %v7215_v11, 16  ;;  %v2720_v50 = vshll.u32 %v7216_v4, 16  ;;  %v2724_v51 = vshrl.u32 %v7216_v4, 16  ;;  %v7264_v32 = vld [vmem:[%s9057_s23 + $0x50] sm:$0x1] }
  0xc7   : > { %v2694_v54 = vrot.slane %v2693_v43, 4  ;;  %v3104_v55 = vsel %vm9236_vm6, %v7274_v41, %v3103_v44  ;;  %v3105_v56 = vrot.slane %v3103_v44, 4  ;;  %v2713_v57 = vrot.slane %v2711_v46, 4  ;;  %8401 = vmatprep.subr.bf16.mxu0 %v8738_v36  ;;  %8425 = vmatprep.subr.bf16.mxu1 %v8739_v37  ;;  %v7222_v39 = vld [vmem:[%s9057_s23 + $0x58] sm:$0xf] }
  0xc8   : > { %v2704_v61 = vrot.slane %v2703_v48, 4  ;;  %v2716_v62 = vrot.slane %v2714_v49, 5  ;;  %v2722_v63 = vrot.slane %v2720_v50, 5  ;;  %v2726_v0 = vrot.slane %v2724_v51, 4  ;;  %v7223_v44 = vld [vmem:[%s9057_s23 + $0x5c] sm:$0x1] }
  0xc9   : > { %v2699_v5 = vsel %vm9070_vm3, %v2694_v54, %v2698_v34  ;;  %v3107_v6 = vsel %vm9236_vm6, %v3105_v56, %v3106_v45  ;;  %v2730_v7 = vshll.u32 %v7217_v42, 16  ;;  %v7275_v8 = vrot.slane %v7259_v47, 9  ;;  %8426 = vmatpush3.bf16.msra.mxu1 %v8739_v37  ;;  %v7221_v34 = vld [vmem:[%s9057_s23 + $0x54] sm:$0xf]  ;;  %v7266_v54 = vld [vmem:[%s9057_s23 + $0x58] sm:$0xf] }
  0xca   : > { %v2709_v9 = vsel %vm9070_vm3, %v2704_v61, %v2708_v40  ;;  %v7282_v10 = vcombine.low %v3104_v55, %v3107_v6  ;;  %v2717_v12 = vor.u32 %v2716_v62, %v2713_v57  ;;  %v2727_v13 = vor.u32 %v2726_v0, %v2722_v63  ;;  %8402 = vmatpush3.bf16.msra.mxu0 %v8738_v36  ;;  %v7265_v49 = vld [vmem:[%s9057_s23 + $0x54] sm:$0xe]  ;;  %v7267_v55 = vld [vmem:[%s9057_s23 + $0x5c] sm:$0x1]  ;;  %v7224_v56 = vld [vmem:[%s9057_s23 + $0x60] sm:$0xf] }
  0xcb   : > { %v7230_v15 = vcombine.low %v2699_v5, %v2709_v9  ;;  %v2732_v16 = vrot.slane %v2730_v7, 5  ;;  %v3110_v17 = vrot.slane %v7260_v52, 5  ;;  %v3113_v18 = vrot.slane %v7261_v58, 5  ;;  %8403 = vmatprep.subr.bf16.mxu0 %v8740_v53  ;;  %8427 = vmatprep.subr.bf16.mxu1 %v8741_v59  ;;  %v7225_v62 = vld [vmem:[%s9057_s23 + $0x64] sm:$0xf] }
  0xcc   : > { %8386 = vmatmul.mubr.msk.bf16.gmra.mxu1 %vm340_vm2, %v7282_v10  ;;  %v2718_v21 = vrot.slane %v2717_v12, 4  ;;  %v2728_v22 = vrot.slane %v2727_v13, 4  ;;  %v2735_v23 = vshrl.u32 %v7218_v2, 16  ;;  %v2738_v25 = vshll.u32 %v7218_v2, 16 }
  0xcd   : > { %8362 = vmatmul.mubr.msk.bf16.gmra.mxu0 %vm340_vm2, %v7230_v15  ;;  %v3111_v24 = vsel %vm9236_vm6, %v7275_v8, %v3110_v17  ;;  %v3112_v1 = vrot.slane %v3110_v17, 4  ;;  %v2744_v27 = vshll.u32 %v7219_v14, 16  ;;  %v2748_v28 = vshrl.u32 %v7219_v14, 16  ;;  %8428 = vmatpush3.bf16.msra.mxu1 %v8741_v59  ;;  %v7226_v15 = vld [vmem:[%s9057_s23 + $0x68] sm:$0x1] }
  0xce   : > { %v2723_v35 = vsel %vm9070_vm3, %v2718_v21, %v2722_v63  ;;  %v2733_v11 = vsel %vm9070_vm3, %v2728_v22, %v2732_v16  ;;  %v2737_v30 = vrot.slane %v2735_v23, 4  ;;  %v2740_v31 = vrot.slane %v2738_v25, 5  ;;  %8404 = vmatpush3.bf16.msra.mxu0 %v8740_v53  ;;  %8469 = vmatprep.subr.bf16.mxu1 %v9438_v3  ;;  %v7268_v16 = vld [vmem:[%s9057_s23 + $0x60] sm:$0xe]  ;;  %v7269_v22 = vld [vmem:[%s9057_s23 + $0x64] sm:$0xf] }
  0xcf   : > { %v7231_v4 = vcombine.low %v2723_v35, %v2733_v11  ;;  %v3114_v36 = vsel %vm9236_vm6, %v3112_v1, %v3113_v18  ;;  %v2746_v37 = vrot.slane %v2744_v27, 5  ;;  %v2750_v38 = vrot.slane %v2748_v28, 4  ;;  %8445 = vmatprep.subr.bf16.mxu0 %v9448_v20  ;;  %v7270_v1 = vld [vmem:[%s9057_s23 + $0x68] sm:$0x1]  ;;  %v7367_v11 = vld [vmem:[%s9057_s23 + $0xc] sm:$0xf] }
  0xd0   : > { %v7283_v40 = vcombine.low %v3111_v24, %v3114_v36  ;;  %v2741_v41 = vor.u32 %v2740_v31, %v2737_v30  ;;  %v2754_v42 = vshll.u32 %v7220_v19, 16  ;;  %v7276_v43 = vrot.slane %v7262_v26, 9 }
  0xd1   : > { %8365 = vmatprep.mubr.msk.bf16.mxu0 %vm340_vm2, %v7231_v4  ;;  %v2751_v45 = vor.u32 %v2750_v38, %v2746_v37  ;;  %v3117_v46 = vrot.slane %v7263_v29, 5  ;;  %v3120_v47 = vrot.slane %v7264_v32, 5  ;;  %v2759_v48 = vshrl.u32 %v7221_v34, 16 }
  0xd2   : > { %8389 = vmatprep.mubr.msk.bf16.mxu1 %vm340_vm2, %v7283_v40  ;;  %v2742_v50 = vrot.slane %v2741_v41, 4  ;;  %v2756_v51 = vrot.slane %v2754_v42, 5  ;;  %v2762_v52 = vshll.u32 %v7221_v34, 16  ;;  %v2768_v53 = vshll.u32 %v7222_v39, 16 }
  0xd3   : > { %v2752_v57 = vrot.slane %v2751_v45, 4  ;;  %v3118_v58 = vsel %vm9236_vm6, %v7276_v43, %v3117_v46  ;;  %v3119_v59 = vrot.slane %v3117_v46, 4  ;;  %v2761_v61 = vrot.slane %v2759_v48, 4  ;;  %v7368_v43 = vld [vmem:[%s9057_s23 + $0x10] sm:$0xf] }
  0xd4   : > { %v2747_v63 = vsel %vm9070_vm3, %v2742_v50, %v2746_v37  ;;  %v2764_v0 = vrot.slane %v2762_v52, 5  ;;  %v2770_v2 = vrot.slane %v2768_v53, 5  ;;  %v2772_v5 = vshrl.u32 %v7222_v39, 16 }
  0xd5   : > { %v2757_v6 = vsel %vm9070_vm3, %v2752_v57, %v2756_v51  ;;  %v3121_v7 = vsel %vm9236_vm6, %v3119_v59, %v3120_v47  ;;  %v2778_v8 = vshll.u32 %v7223_v44, 16  ;;  %v7277_v9 = vrot.slane %v7265_v49, 9  ;;  %v7369_v44 = vld [vmem:[%s9057_s23 + $0x14] sm:$0x1]  ;;  %v7370_v49 = vld [vmem:[%s9057_s23 + $0x18] sm:$0xf] }
  0xd6   : > { %v7232_v10 = vcombine.low %v2747_v63, %v2757_v6  ;;  %v7284_v12 = vcombine.low %v3118_v58, %v3121_v7  ;;  %v2765_v13 = vor.u32 %v2764_v0, %v2761_v61  ;;  %v2774_v14 = vrot.slane %v2772_v5, 4  ;;  %v7372_v61 = vld [vmem:[%s9057_s23 + $0x20] sm:$0x1] }
  0xd7   : > { %v2780_v17 = vrot.slane %v2778_v8, 5  ;;  %v3124_v18 = vrot.slane %v7266_v54, 5  ;;  %v3127_v19 = vrot.slane %v7267_v55, 5  ;;  %v2783_v21 = vshrl.u32 %v7224_v56, 16  ;;  %v7371_v54 = vld [vmem:[%s9057_s23 + $0x1c] sm:$0xf] }
  0xd8   : > { %8366 = vmatmul.mubr.msk.bf16.gmra.mxu0 %vm340_vm2, %v7232_v10  ;;  %8390 = vmatmul.mubr.msk.bf16.gmra.mxu1 %vm340_vm2, %v7284_v12  ;;  %v2766_v23 = vrot.slane %v2765_v13, 4  ;;  %v2775_v25 = vor.u32 %v2774_v14, %v2770_v2  ;;  %v2786_v26 = vshll.u32 %v7224_v56, 16  ;;  %v2792_v24 = vshll.u32 %v7225_v62, 16  ;;  %v8742_v56 = vld [vmem:[%s9057_s23 + $0xc] sm:$0xff]  }
  0xd9   : > { %v3125_v27 = vsel %vm9236_vm6, %v7277_v9, %v3124_v18  ;;  %v3126_v28 = vrot.slane %v3124_v18, 4  ;;  %v2785_v29 = vrot.slane %v2783_v21, 4  ;;  %v2796_v35 = vshrl.u32 %v7225_v62, 16  ;;  %v7373_v9 = vld [vmem:[%s9057_s23 + $0x24] sm:$0xf] }
  0xda   : > { %v2771_v30 = vsel %vm9070_vm3, %v2766_v23, %v2770_v2  ;;  %v2776_v31 = vrot.slane %v2775_v25, 4  ;;  %v2788_v32 = vrot.slane %v2786_v26, 5  ;;  %v2794_v34 = vrot.slane %v2792_v24, 5  ;;  %v7375_v21 = vld [vmem:[%s9057_s23 + $0x2c] sm:$0x1] }
  0xdb   : > { %v3128_v4 = vsel %vm9236_vm6, %v3126_v28, %v3127_v19  ;;  %v2798_v36 = vrot.slane %v2796_v35, 4  ;;  %v2802_v37 = vshll.u32 %v7226_v15, 16  ;;  %v7278_v38 = vrot.slane %v7268_v16, 9  ;;  %v7374_v15 = vld [vmem:[%s9057_s23 + $0x28] sm:$0xf] }
  0xdc   : > { %v2781_v39 = vsel %vm9070_vm3, %v2776_v31, %v2780_v17  ;;  %v7285_v40 = vcombine.low %v3125_v27, %v3128_v4  ;;  %v2789_v41 = vor.u32 %v2788_v32, %v2785_v29  ;;  %v3131_v42 = vrot.slane %v7269_v22, 5  ;;  %v8743_v32 = vld [vmem:[%s9057_s23 + $0x18] sm:$0xff]  }
  0xdd   : > { %v7233_v45 = vcombine.low %v2771_v30, %v2781_v39  ;;  %v2799_v46 = vor.u32 %v2798_v36, %v2794_v34  ;;  %v2804_v47 = vrot.slane %v2802_v37, 5  ;;  %v3134_v48 = vrot.slane %v7270_v1, 5  ;;  %v7376_v37 = vld [vmem:[%s9057_s23 + $0x30] sm:$0xf] }
  0xde   : > { %8393 = vmatprep.mubr.msk.bf16.mxu1 %vm340_vm2, %v7285_v40  ;;  %v2790_v50 = vrot.slane %v2789_v41, 4  ;;  %v3132_v51 = vsel %vm9236_vm6, %v7278_v38, %v3131_v42  ;;  %v3133_v52 = vrot.slane %v3131_v42, 4  ;;  %v3818_v53 = vshrl.u32 %v7367_v11, 16  ;;  %v7377_v38 = vld [vmem:[%s9057_s23 + $0x34] sm:$0xf]  ;;  %v8746_v40 = vld [vmem:[%s9057_s23 + $0x24] sm:$0xff]  }
  0xdf   : > { %8369 = vmatprep.mubr.msk.bf16.mxu0 %vm340_vm2, %v7233_v45  ;;  %v2800_v55 = vrot.slane %v2799_v46, 4  ;;  %v3821_v57 = vshll.u32 %v7367_v11, 16  ;;  %v3827_v58 = vshll.u32 %v7368_v43, 16  ;;  %v3831_v59 = vshrl.u32 %v7368_v43, 16 }
  0xe0   : > { %v2795_v62 = vsel %vm9070_vm3, %v2790_v50, %v2794_v34  ;;  %v3135_v63 = vsel %vm9236_vm6, %v3133_v52, %v3134_v48  ;;  %v3820_v0 = vrot.slane %v3818_v53, 4  ;;  %v3837_v2 = vshll.u32 %v7369_v44, 16  ;;  %v7378_v44 = vld [vmem:[%s9057_s23 + $0x38] sm:$0x1] }
  0xe1   : > { %v2805_v5 = vsel %vm9070_vm3, %v2800_v55, %v2804_v47  ;;  %v7286_v6 = vcombine.low %v3132_v51, %v3135_v63  ;;  %v3823_v7 = vrot.slane %v3821_v57, 5  ;;  %v3829_v8 = vrot.slane %v3827_v58, 5 }
  0xe2   : > { %v7234_v10 = vcombine.low %v2795_v62, %v2805_v5  ;;  %v3833_v12 = vrot.slane %v3831_v59, 4  ;;  %v3839_v13 = vrot.slane %v3837_v2, 5  ;;  %v3842_v14 = vshrl.u32 %v7370_v49, 16 }
  0xe3   : > { %8394 = vmatmul.mubr.msk.bf16.gmra.mxu1 %vm340_vm2, %v7286_v6  ;;  %v3824_v16 = vor.u32 %v3823_v7, %v3820_v0  ;;  %v3845_v17 = vshll.u32 %v7370_v49, 16  ;;  %v3851_v18 = vshll.u32 %v7371_v54, 16  ;;  %v3855_v19 = vshrl.u32 %v7371_v54, 16  ;;  %v8748_v49 = vld [vmem:[#allocation6 + $0x150] sm:$0xff]   ;;  %v7379_v0 = vld [vmem:[%s9057_s23 + $0x3c] sm:$0xf] }
  0xe4   : > { %8370 = vmatmul.mubr.msk.bf16.gmra.mxu0 %vm340_vm2, %v7234_v10  ;;  %v3834_v22 = vor.u32 %v3833_v12, %v3829_v8  ;;  %v3844_v23 = vrot.slane %v3842_v14, 4  ;;  %v3861_v25 = vshll.u32 %v7372_v61, 16  ;;  %v3866_v26 = vshrl.u32 %v7373_v9, 16  ;;  %v8749_v54 = vld [vmem:[#allocation6 + $0x170] sm:$0xff]   ;;  %v8747_v12 = vld [vmem:[%s9057_s23 + $0x30] sm:$0xff]  }
  0xe5   : > { %8405 = vmatprep.mubr.msk.bf16.mxu0 %vm340_vm2, %v8742_v56  ;;  %v3825_v24 = vrot.slane %v3824_v16, 4  ;;  %v3847_v1 = vrot.slane %v3845_v17, 5  ;;  %v3853_v27 = vrot.slane %v3851_v18, 5  ;;  %v3857_v28 = vrot.slane %v3855_v19, 4  ;;  %v8750_v19 = vld [vmem:[%s9057_s23 + $0x3c] sm:$0xff]  }
  0xe6   : > { %v3835_v29 = vrot.slane %v3834_v22, 4  ;;  %v3863_v35 = vrot.slane %v3861_v25, 5  ;;  %v3868_v11 = vrot.slane %v3866_v26, 4  ;;  %v3869_v30 = vshll.u32 %v7373_v9, 16  ;;  %v8753_v22 = vld [vmem:[#allocation6 + $0x168] sm:$0xff]  }
  0xe7   : > { %v3830_v31 = vsel %vm9070_vm3, %v3825_v24, %v3829_v8  ;;  %v3848_v34 = vor.u32 %v3847_v1, %v3844_v23  ;;  %v3858_v4 = vor.u32 %v3857_v28, %v3853_v27  ;;  %v3875_v36 = vshll.u32 %v7374_v15, 16  ;;  %v7380_v8 = vld [vmem:[%s9057_s23 + $0x40] sm:$0xf]  ;;  %v8756_v1 = vld [vmem:[#allocation6 + $0x140] sm:$0xff]  }
  0xe8   : > { %v3840_v39 = vsel %vm9070_vm3, %v3835_v29, %v3839_v13  ;;  %v3871_v41 = vrot.slane %v3869_v30, 5  ;;  %v3879_v42 = vshrl.u32 %v7374_v15, 16  ;;  %v3885_v43 = vshll.u32 %v7375_v21, 16  ;;  %v7381_v13 = vld [vmem:[%s9057_s23 + $0x44] sm:$0x1] }
  0xe9   : > { %v7391_v45 = vcombine.low %v3830_v31, %v3840_v39  ;;  %v3849_v46 = vrot.slane %v3848_v34, 4  ;;  %v3859_v47 = vrot.slane %v3858_v4, 4  ;;  %v3877_v48 = vrot.slane %v3875_v36, 5  ;;  %v8752_v15 = vld [vmem:[#allocation6 + $0x148] sm:$0xff]   ;;  %v7384_v34 = vld [vmem:[%s9057_s23 + $0x50] sm:$0x1] }
  0xea   : > { %v3872_v50 = vor.u32 %v3871_v41, %v3868_v11  ;;  %v3881_v51 = vrot.slane %v3879_v42, 4  ;;  %v3887_v52 = vrot.slane %v3885_v43, 5  ;;  %v3890_v53 = vshrl.u32 %v7376_v37, 16  ;;  %v7383_v11 = vld [vmem:[%s9057_s23 + $0x4c] sm:$0xf] }
  0xeb   : > { %8429 = vmatprep.mubr.msk.bf16.mxu1 %vm340_vm2, %v7391_v45  ;;  %v3854_v55 = vsel %vm9070_vm3, %v3849_v46, %v3853_v27  ;;  %v3864_v56 = vsel %vm9070_vm3, %v3859_v47, %v3863_v35  ;;  %v3893_v57 = vshll.u32 %v7376_v37, 16  ;;  %v3899_v58 = vshll.u32 %v7377_v38, 16  ;;  %v7382_v35 = vld [vmem:[%s9057_s23 + $0x48] sm:$0xf] }
  0xec   : > { %8406 = vmatmul.mubr.msk.bf16.vlgmr.msra.gmra.mxu0 %vm340_vm2, %v8743_v32  ;;  %v7392_v59 = vcombine.low %v3854_v55, %v3864_v56  ;;  %v3873_v61 = vrot.slane %v3872_v50, 4  ;;  %v3882_v62 = vor.u32 %v3881_v51, %v3877_v48  ;;  %v3892_v63 = vrot.slane %v3890_v53, 4  ;;  %v8751_v53 = vld [vmem:[%s9057_s23 + $0x48] sm:$0xff]  }
  0xed   : > { %8446 = vmatpush3.bf16.msra.mxu0 %v9448_v20  ;;  %8409 = vmatprep.mubr.msk.bf16.mxu0 %vm340_vm2, %v8746_v40  ;;  %v3895_v2 = vrot.slane %v3893_v57, 5  ;;  %v3901_v5 = vrot.slane %v3899_v58, 5  ;;  %v3903_v6 = vshrl.u32 %v7377_v38, 16  ;;  %v3909_v7 = vshll.u32 %v7378_v44, 16  ;;  %v8757_v44 = vld [vmem:[#allocation6 + $0x160] sm:$0xff]  }
  0xee   : > { %8430 = vmatmul.mubr.msk.bf16.vlgmr.msra.gmra.mxu1 %vm340_vm2, %v7392_v59  ;;  %v3878_v9 = vsel %vm9070_vm3, %v3873_v61, %v3877_v48  ;;  %v3883_v10 = vrot.slane %v3882_v62, 4  ;;  %8447 = vmatprep.subr.bf16.mxu0 %v8748_v49  ;;  %v3914_v14 = vshrl.u32 %v7379_v0, 16  ;;  %v3917_v20 = vshll.u32 %v7379_v0, 16  ;;  %v8754_v57 = vld [vmem:[%s9057_s23 + $0x54] sm:$0xff]   ;;  %v7387_v0 = vld [vmem:[%s9057_s23 + $0x5c] sm:$0x1] }
  0xef   : > { %8470 = vmatpush3.bf16.msra.mxu1 %v9438_v3  ;;  %v3896_v16 = vor.u32 %v3895_v2, %v3892_v63  ;;  %v3905_v17 = vrot.slane %v3903_v6, 4  ;;  %v3911_v18 = vrot.slane %v3909_v7, 5  ;;  %v3923_v21 = vshll.u32 %v7380_v8, 16  ;;  %v7385_v58 = vld [vmem:[%s9057_s23 + $0x54] sm:$0xf] }
  0xf0   : > { %v3888_v23 = vsel %vm9070_vm3, %v3883_v10, %v3887_v52  ;;  %8471 = vmatprep.subr.bf16.mxu1 %v8749_v54  ;;  %v3916_v25 = vrot.slane %v3914_v14, 4  ;;  %v3919_v26 = vrot.slane %v3917_v20, 5  ;;  %v3927_v24 = vshrl.u32 %v7380_v8, 16  ;;  %v9568_v59 = vld [vmem:[#allocation6 + $0x1b8] sm:$0xff]   ;;  %v7386_v63 = vld [vmem:[%s9057_s23 + $0x58] sm:$0xf] }
  0xf1   : > { %v7393_v3 = vcombine.low %v3878_v9, %v3888_v23  ;;  %v3897_v27 = vrot.slane %v3896_v16, 4  ;;  %v3906_v28 = vor.u32 %v3905_v17, %v3901_v5  ;;  %8448 = vmatpush3.bf16.msra.mxu0 %v8748_v49  ;;  %v3925_v29 = vrot.slane %v3923_v21, 5  ;;  %v9561_v49 = vld [vmem:[#allocation6 + $0x198] sm:$0xff]   ;;  %v7388_v14 = vld [vmem:[%s9057_s23 + $0x60] sm:$0xf] }
  0xf2   : > { %v3920_v30 = vor.u32 %v3919_v26, %v3916_v25  ;;  %v3929_v31 = vrot.slane %v3927_v24, 4  ;;  %v3933_v32 = vshll.u32 %v7381_v13, 16  ;;  %v3938_v4 = vshrl.u32 %v7382_v35, 16  ;;  %8449 = vmatprep.subr.bf16.mxu0 %v8752_v15  ;;  %v7389_v17 = vld [vmem:[%s9057_s23 + $0x64] sm:$0xf] }
  0xf3   : > { %8433 = vmatprep.mubr.msk.bf16.mxu1 %vm340_vm2, %v7393_v3  ;;  %v3902_v36 = vsel %vm9070_vm3, %v3897_v27, %v3901_v5  ;;  %v3907_v37 = vrot.slane %v3906_v28, 4  ;;  %8472 = vmatpush3.bf16.msra.mxu1 %v8749_v54  ;;  %v3941_v38 = vshll.u32 %v7382_v35, 16  ;;  %v3947_v39 = vshll.u32 %v7383_v11, 16 }
  0xf4   : > { %8410 = vmatmul.mubr.msk.bf16.gmra.mxu0 %vm340_vm2, %v8747_v12  ;;  %v3921_v40 = vrot.slane %v3920_v30, 4  ;;  %v3930_v41 = vor.u32 %v3929_v31, %v3925_v29  ;;  %v3935_v42 = vrot.slane %v3933_v32, 5  ;;  %v3940_v43 = vrot.slane %v3938_v4, 4  ;;  %8473 = vmatprep.subr.bf16.mxu1 %v8753_v22 }
  0xf5   : > { %v3912_v45 = vsel %vm9070_vm3, %v3907_v37, %v3911_v18  ;;  %8413 = vmatprep.mubr.msk.bf16.mxu0 %vm340_vm2, %v8750_v19  ;;  %v3943_v46 = vrot.slane %v3941_v38, 5  ;;  %v3949_v47 = vrot.slane %v3947_v39, 5  ;;  %v3951_v48 = vshrl.u32 %v7383_v11, 16  ;;  %8450 = vmatpush3.bf16.msra.mxu0 %v8752_v15  ;;  %v7390_v18 = vld [vmem:[%s9057_s23 + $0x68] sm:$0x1] }
  0xf6   : > { %v7394_v50 = vcombine.low %v3902_v36, %v3912_v45  ;;  %v3926_v51 = vsel %vm9070_vm3, %v3921_v40, %v3925_v29  ;;  %v3931_v52 = vrot.slane %v3930_v41, 4  ;;  %v3957_v54 = vshll.u32 %v7384_v34, 16  ;;  %8451 = vmatprep.subr.bf16.mxu0 %v8756_v1  ;;  %v8755_v29 = vld [vmem:[%s9057_s23 + $0x60] sm:$0xff]   ;;  %v8758_v36 = vld [vmem:[%s9057_s23 + $0x18] sm:$0xff]  }
  0xf7   : > { %v3944_v55 = vor.u32 %v3943_v46, %v3940_v43  ;;  %v3953_v56 = vrot.slane %v3951_v48, 4  ;;  %8474 = vmatpush3.bf16.msra.mxu1 %v8753_v22  ;;  %v3962_v2 = vshrl.u32 %v7385_v58, 16  ;;  %v3965_v8 = vshll.u32 %v7385_v58, 16  ;;  %v7449_v39 = vld [vmem:[%s9057_s23 + $0x18] sm:$0xf] }
  0xf8   : > { %8434 = vmatmul.mubr.msk.bf16.gmra.mxu1 %vm340_vm2, %v7394_v50  ;;  %v3936_v61 = vsel %vm9070_vm3, %v3931_v52, %v3935_v42  ;;  %v3959_v62 = vrot.slane %v3957_v54, 5  ;;  %8475 = vmatprep.subr.bf16.mxu1 %v8757_v44  ;;  %v3971_v10 = vshll.u32 %v7386_v63, 16  ;;  %v3975_v12 = vshrl.u32 %v7386_v63, 16  ;;  %v7450_v40 = vld [vmem:[%s9057_s23 + $0x1c] sm:$0xf] }
  0xf9   : > { %v7395_v5 = vcombine.low %v3926_v51, %v3936_v61  ;;  %v3945_v6 = vrot.slane %v3944_v55, 4  ;;  %v3954_v7 = vor.u32 %v3953_v56, %v3949_v47  ;;  %8452 = vmatpush3.bf16.msra.mxu0 %v8756_v1  ;;  %v3964_v9 = vrot.slane %v3962_v2, 4  ;;  %v7451_v45 = vld [vmem:[%s9057_s23 + $0x20] sm:$0x1]  ;;  %v7452_v52 = vld [vmem:[%s9057_s23 + $0x24] sm:$0xf] }
  0xfa   : > { %v3981_v13 = vshll.u32 %v7387_v0, 16  ;;  %8493 = vmatprep.subr.bf16.mxu0 %v9561_v49  ;;  %v3967_v16 = vrot.slane %v3965_v8, 5  ;;  %v3973_v19 = vrot.slane %v3971_v10, 5  ;;  %v3977_v21 = vrot.slane %v3975_v12, 4  ;;  %v7453_v58 = vld [vmem:[%s9057_s23 + $0x28] sm:$0xf] }
  0xfb   : > { %8437 = vmatprep.mubr.msk.bf16.mxu1 %vm340_vm2, %v7395_v5  ;;  %v3950_v20 = vsel %vm9070_vm3, %v3945_v6, %v3949_v47  ;;  %v3955_v15 = vrot.slane %v3954_v7, 4  ;;  %8476 = vmatpush3.bf16.msra.mxu1 %v8757_v44  ;;  %v3986_v23 = vshrl.u32 %v7388_v14, 16  ;;  %v3989_v1 = vshll.u32 %v7388_v14, 16  ;;  %v7454_v5 = vld [vmem:[%s9057_s23 + $0x2c] sm:$0x1] }
  0xfc   : > { %8414 = vmatmul.mubr.msk.bf16.gmra.mxu0 %vm340_vm2, %v8751_v53  ;;  %v3983_v22 = vrot.slane %v3981_v13, 5  ;;  %8517 = vmatprep.subr.bf16.mxu1 %v9568_v59  ;;  %v3968_v24 = vor.u32 %v3967_v16, %v3964_v9  ;;  %v3995_v3 = vshll.u32 %v7389_v17, 16  ;;  %v3978_v28 = vor.u32 %v3977_v21, %v3973_v19 }
  0xfd   : > { %v3960_v26 = vsel %vm9070_vm3, %v3955_v15, %v3959_v62  ;;  %8417 = vmatprep.mubr.msk.bf16.mxu0 %vm340_vm2, %v8754_v57  ;;  %v3988_v35 = vrot.slane %v3986_v23, 4  ;;  %v3999_v11 = vshrl.u32 %v7389_v17, 16  ;;  %v3991_v32 = vrot.slane %v3989_v1, 5  ;;  %v8759_v15 = vld [vmem:[%s9057_s23 + $0x24] sm:$0xff]  }
  0xfe   : > { %v7396_v27 = vcombine.low %v3950_v20, %v3960_v26  ;;  %v3969_v31 = vrot.slane %v3968_v24, 4  ;;  %v3997_v34 = vrot.slane %v3995_v3, 5  ;;  %v4005_v4 = vshll.u32 %v7390_v18, 16 }
  0xff   : > { %v3979_v37 = vrot.slane %v3978_v28, 4  ;;  %v4001_v38 = vrot.slane %v3999_v11, 4  ;;  %v3992_v43 = vor.u32 %v3991_v32, %v3988_v35  ;;  %v4522_v46 = vshrl.u32 %v7449_v39, 16  ;;  %v8762_v35 = vld [vmem:[%s9057_s23 + $0x30] sm:$0xff]  }
 0x100   : > { %8438 = vmatmul.mubr.msk.bf16.gmra.mxu1 %vm340_vm2, %v7396_v27  ;;  %v3974_v42 = vsel %vm9070_vm3, %v3969_v31, %v3973_v19  ;;  %v4007_v44 = vrot.slane %v4005_v4, 5  ;;  %v4525_v50 = vshll.u32 %v7449_v39, 16  ;;  %v4531_v51 = vshll.u32 %v7450_v40, 16  ;;  %v7455_v11 = vld [vmem:[%s9057_s23 + $0x30] sm:$0xf]  ;;  %v8764_v39 = vld [vmem:[#allocation6 + $0x190] sm:$0xff]  }
 0x101   : > { %v3984_v47 = vsel %vm9070_vm3, %v3979_v37, %v3983_v22  ;;  %v4002_v48 = vor.u32 %v4001_v38, %v3997_v34  ;;  %v3993_v55 = vrot.slane %v3992_v43, 4  ;;  %v4524_v56 = vrot.slane %v4522_v46, 4  ;;  %v7456_v31 = vld [vmem:[%s9057_s23 + $0x34] sm:$0xf]  ;;  %v7457_v37 = vld [vmem:[%s9057_s23 + $0x38] sm:$0x1] }
 0x102   : > { %v7397_v54 = vcombine.low %v3974_v42, %v3984_v47  ;;  %v4535_v57 = vshrl.u32 %v7450_v40, 16  ;;  %v4527_v63 = vrot.slane %v4525_v50, 5  ;;  %v4533_v0 = vrot.slane %v4531_v51, 5  ;;  %v7458_v51 = vld [vmem:[%s9057_s23 + $0x3c] sm:$0xf] }
 0x103   : > { %v4003_v62 = vrot.slane %v4002_v48, 4  ;;  %v4541_v2 = vshll.u32 %v7451_v45, 16  ;;  %v3998_v7 = vsel %vm9070_vm3, %v3993_v55, %v3997_v34  ;;  %v4546_v9 = vshrl.u32 %v7452_v52, 16 }
 0x104   : > { %8418 = vmatmul.mubr.msk.bf16.gmra.mxu0 %vm340_vm2, %v8755_v29  ;;  %8441 = vmatprep.mubr.msk.bf16.mxu1 %vm340_vm2, %v7397_v54  ;;  %v4537_v8 = vrot.slane %v4535_v57, 4  ;;  %v4549_v10 = vshll.u32 %v7452_v52, 16  ;;  %v4528_v14 = vor.u32 %v4527_v63, %v4524_v56  ;;  %v4555_v16 = vshll.u32 %v7453_v58, 16 }
 0x105   : > { %8453 = vmatprep.mubr.msk.bf16.mxu0 %vm340_vm2, %v8758_v36  ;;  %v4008_v13 = vsel %vm9070_vm3, %v4003_v62, %v4007_v44  ;;  %v4543_v20 = vrot.slane %v4541_v2, 5  ;;  %v4548_v21 = vrot.slane %v4546_v9, 4  ;;  %v4559_v1 = vshrl.u32 %v7453_v58, 16  ;;  %v7459_v58 = vld [vmem:[%s9057_s23 + $0x40] sm:$0xf] }
 0x106   : > { %v7398_v18 = vcombine.low %v3998_v7, %v4008_v13  ;;  %v4538_v19 = vor.u32 %v4537_v8, %v4533_v0  ;;  %v4551_v22 = vrot.slane %v4549_v10, 5  ;;  %v4529_v26 = vrot.slane %v4528_v14, 4  ;;  %v9650_v62 = vld [vmem:[#allocation6 + $0x188] sm:$0xff]  }
 0x107   : > { %v4557_v24 = vrot.slane %v4555_v16, 5  ;;  %v4565_v3 = vshll.u32 %v7454_v5, 16  ;;  %v4561_v4 = vrot.slane %v4559_v1, 4  ;;  %v4570_v38 = vshrl.u32 %v7455_v11, 16  ;;  %v8763_v5 = vld [vmem:[%s9057_s23 + $0x3c] sm:$0xff]   ;;  %v8766_v16 = vld [vmem:[%s9057_s23 + $0x48] sm:$0xff]  }
 0x108   : > { %v9584_v25 = vpop.f32.mrf.mxu0  ;;  %8442 = vmatmul.mubr.msk.bf16.gmra.mxu1 %vm340_vm2, %v7398_v18  ;;  %v4539_v28 = vrot.slane %v4538_v19, 4  ;;  %v4552_v29 = vor.u32 %v4551_v22, %v4548_v21  ;;  %v4534_v34 = vsel %vm9070_vm3, %v4529_v26, %v4533_v0  ;;  %v4573_v44 = vshll.u32 %v7455_v11, 16  ;;  %v7460_v7 = vld [vmem:[%s9057_s23 + $0x44] sm:$0x1] }
 0x109   : > { %v4567_v36 = vrot.slane %v4565_v3, 5  ;;  %v4579_v45 = vshll.u32 %v7456_v31, 16  ;;  %v4562_v47 = vor.u32 %v4561_v4, %v4557_v24  ;;  %v4572_v48 = vrot.slane %v4570_v38, 4 }
 0x10a   : > { %v9590_v30 = vpop.f32.mrf.mxu0  ;;  %v9607_v61 = vpop.f32.mrf.mxu1  ;;  %v4544_v42 = vsel %vm9070_vm3, %v4539_v28, %v4543_v20  ;;  %v4553_v43 = vrot.slane %v4552_v29, 4  ;;  %v4583_v50 = vshrl.u32 %v7456_v31, 16  ;;  %v4575_v55 = vrot.slane %v4573_v44, 5  ;;  %v7463_v44 = vld [vmem:[%s9057_s23 + $0x50] sm:$0x1] }
 0x10b   : > { %v7473_v46 = vcombine.low %v4534_v34, %v4544_v42  ;;  %v4581_v56 = vrot.slane %v4579_v45, 5  ;;  %v4589_v57 = vshll.u32 %v7457_v37, 16  ;;  %v4563_v0 = vrot.slane %v4562_v47, 4  ;;  %v7461_v42 = vld [vmem:[%s9057_s23 + $0x48] sm:$0xf] }
 0x10c   : > { %v9596_v41 = vpop.f32.mrf.mxu0  ;;  %v9617_v12 = vpop.f32.mrf.mxu1  ;;  %8454 = vmatmul.mubr.msk.bf16.vlgmr.msra.gmra.mxu0 %vm340_vm2, %v8759_v15  ;;  %v4558_v54 = vsel %vm9070_vm3, %v4553_v43, %v4557_v24  ;;  %v4585_v2 = vrot.slane %v4583_v50, 4  ;;  %v4594_v8 = vshrl.u32 %v7458_v51, 16  ;;  %v4597_v9 = vshll.u32 %v7458_v51, 16  ;;  %v9659_v15 = vld [vmem:[#allocation6 + $0x1b0] sm:$0xff]  }
 0x10d   : > { %8494 = vmatpush3.bf16.msra.mxu0 %v9561_v49  ;;  %8457 = vmatprep.mubr.msk.bf16.mxu0 %vm340_vm2, %v8762_v35  ;;  %v4576_v10 = vor.u32 %v4575_v55, %v4572_v48  ;;  %v4591_v13 = vrot.slane %v4589_v57, 5  ;;  %v4603_v14 = vshll.u32 %v7459_v58, 16  ;;  %v4607_v20 = vshrl.u32 %v7459_v58, 16  ;;  %v9668_v35 = vld [vmem:[#allocation6 + $0x180] sm:$0xff]   ;;  %v7462_v43 = vld [vmem:[%s9057_s23 + $0x4c] sm:$0xf] }
 0x10e   : > { %v9604_v53 = vpop.f32.mrf.mxu0  ;;  %v9624_v23 = vpop.f32.mrf.mxu1  ;;  %8477 = vmatprep.mubr.msk.bf16.mxu1 %vm340_vm2, %v7473_v46  ;;  %8495 = vmatprep.subr.bf16.mxu0 %v8764_v39  ;;  %v4568_v19 = vsel %vm9070_vm3, %v4563_v0, %v4567_v36  ;;  %v4586_v21 = vor.u32 %v4585_v2, %v4581_v56  ;;  %v4596_v22 = vrot.slane %v4594_v8, 4  ;;  %v4599_v26 = vrot.slane %v4597_v9, 5  ;;  %v8767_v58 = vld [vmem:[%s9057_s23 + $0x54] sm:$0xff]  }
 0x10f   : > { %v7474_v1 = vcombine.low %v4558_v54, %v4568_v19  ;;  %v4577_v3 = vrot.slane %v4576_v10, 4  ;;  %v4605_v28 = vrot.slane %v4603_v14, 5  ;;  %v4609_v29 = vrot.slane %v4607_v20, 4  ;;  %v7464_v0 = vld [vmem:[%s9057_s23 + $0x54] sm:$0xf] }
 0x110   : > { %v9611_v6 = vpop.f32.mrf.mxu0  ;;  %v9632_v32 = vpop.f32.mrf.mxu1  ;;  %v4587_v31 = vrot.slane %v4586_v21, 4  ;;  %v4600_v34 = vor.u32 %v4599_v26, %v4596_v22  ;;  %v4613_v4 = vshll.u32 %v7460_v7, 16  ;;  %v9675_v36 = vadd.f32 %v9607_v61, %v9584_v25  ;;  %v9708_v2 = vld [vmem:[#allocation6 + $0x1d8] sm:$0xff]   ;;  %v7465_v10 = vld [vmem:[%s9057_s23 + $0x58] sm:$0xf]  ;;  %v8770_v22 = vld [vmem:[%s9057_s23 + $0x60] sm:$0xff]  }
 0x111   : > { %8496 = vmatpush3.bf16.msra.mxu0 %v8764_v39  ;;  %8478 = vmatmul.mubr.msk.bf16.vlgmr.msra.gmra.mxu1 %vm340_vm2, %v7474_v1  ;;  %v4582_v38 = vsel %vm9070_vm3, %v4577_v3, %v4581_v56  ;;  %v4610_v39 = vor.u32 %v4609_v29, %v4605_v28  ;;  %v9687_v45 = vadd.f32 %v9617_v12, %v9590_v30  ;;  %v4618_v50 = vshrl.u32 %v7461_v42, 16 }
 0x112   : > { %v9622_v17 = vpop.f32.mrf.mxu0  ;;  %8497 = vmatprep.subr.bf16.mxu0 %v9650_v62  ;;  %v9691_v46 = vadd.f32 %v9624_v23, %v9596_v41  ;;  %8518 = vmatpush3.bf16.msra.mxu1 %v9568_v59  ;;  %v4592_v61 = vsel %vm9070_vm3, %v4587_v31, %v4591_v13  ;;  %v4601_v47 = vrot.slane %v4600_v34, 4  ;;  %v4615_v48 = vrot.slane %v4613_v4, 5  ;;  %v8769_v23 = vld [vmem:[#allocation6 + $0x1a8] sm:$0xff]   ;;  %v7466_v13 = vld [vmem:[%s9057_s23 + $0x5c] sm:$0x1] }
 0x113   : > { %v9652_v63 = vpop.f32.mrf.mxu1  ;;  %v7475_v12 = vcombine.low %v4582_v38, %v4592_v61  ;;  %v4611_v51 = vrot.slane %v4610_v39, 4  ;;  %8519 = vmatprep.subr.bf16.mxu1 %v9659_v15  ;;  %v4621_v41 = vshll.u32 %v7461_v42, 16  ;;  %v4627_v59 = vshll.u32 %v7462_v43, 16  ;;  %v8773_v31 = vld [vmem:[#allocation6 + $0x1a0] sm:$0xff]  }
 0x114   : > { %v9626_v27 = vpop.f32.mrf.mxu0  ;;  %8458 = vmatmul.mubr.msk.bf16.gmra.mxu0 %vm340_vm2, %v8763_v5  ;;  %v4606_v54 = vsel %vm9070_vm3, %v4601_v47, %v4605_v28  ;;  %v4620_v55 = vrot.slane %v4618_v50, 4  ;;  %v4631_v56 = vshrl.u32 %v7462_v43, 16  ;;  %v4637_v57 = vshll.u32 %v7463_v44, 16 }
 0x115   : > { %v9662_v18 = vpop.f32.mrf.mxu1  ;;  %8461 = vmatprep.mubr.msk.bf16.mxu0 %vm340_vm2, %v8766_v16  ;;  %8498 = vmatpush3.bf16.msra.mxu0 %v9650_v62  ;;  %v4616_v7 = vsel %vm9070_vm3, %v4611_v51, %v4615_v48  ;;  %v4623_v8 = vrot.slane %v4621_v41, 5  ;;  %v4629_v9 = vrot.slane %v4627_v59, 5  ;;  %v9720_v14 = vadd.f32 %v9632_v32, %v9604_v53  ;;  %v7468_v59 = vld [vmem:[%s9057_s23 + $0x64] sm:$0xf] }
 0x116   : > { %v9637_v40 = vpop.f32.mrf.mxu0  ;;  %8481 = vmatprep.mubr.msk.bf16.mxu1 %vm340_vm2, %v7475_v12  ;;  %8499 = vmatprep.subr.bf16.mxu0 %v9668_v35  ;;  %v7476_v20 = vcombine.low %v4606_v54, %v4616_v7  ;;  %v4633_v16 = vrot.slane %v4631_v56, 4  ;;  %v4639_v19 = vrot.slane %v4637_v57, 5  ;;  %v4642_v21 = vshrl.u32 %v7464_v0, 16 }
 0x117   : > { %v9670_v11 = vpop.f32.mrf.mxu1  ;;  %8520 = vmatpush3.bf16.msra.mxu1 %v9659_v15  ;;  %v4624_v1 = vor.u32 %v4623_v8, %v4620_v55  ;;  %v4645_v3 = vshll.u32 %v7464_v0, 16  ;;  %v4651_v28 = vshll.u32 %v7465_v10, 16  ;;  %v4655_v29 = vshrl.u32 %v7465_v10, 16  ;;  %v9755_v55 = vld [vmem:[#allocation6 + $0x1f8] sm:$0xff]  }
 0x118   : > { %v9643_v52 = vpop.f32.mrf.mxu0  ;;  %8521 = vmatprep.subr.bf16.mxu1 %v8769_v23  ;;  %v4634_v53 = vor.u32 %v4633_v16, %v4629_v9  ;;  %v4644_v32 = vrot.slane %v4642_v21, 4  ;;  %v4661_v4 = vshll.u32 %v7466_v13, 16  ;;  %v9731_v15 = vadd.f32 %v9652_v63, %v9611_v6  ;;  %v7467_v6 = vld [vmem:[%s9057_s23 + $0x60] sm:$0xf]  ;;  %v8771_v10 = vld [vmem:[%s9057_s23 + $0x6c] sm:$0xff]  }
 0x119   : > { %v9693_v25 = vpop.f32.mrf.mxu1  ;;  %8500 = vmatpush3.bf16.msra.mxu0 %v9668_v35  ;;  %8482 = vmatmul.mubr.msk.bf16.gmra.mxu1 %vm340_vm2, %v7476_v20  ;;  %v4625_v39 = vrot.slane %v4624_v1, 4  ;;  %v4647_v42 = vrot.slane %v4645_v3, 5  ;;  %v4653_v43 = vrot.slane %v4651_v28, 5  ;;  %v4657_v44 = vrot.slane %v4655_v29, 4  ;;  %v7470_v21 = vld [vmem:[%s9057_s23 + $0x6c] sm:$0xf] }
 0x11a   : > { %v9657_v49 = vpop.f32.mrf.mxu0  ;;  %8541 = vmatprep.subr.bf16.mxu0 %v9708_v2  ;;  %v4635_v47 = vrot.slane %v4634_v53, 4  ;;  %v4663_v35 = vrot.slane %v4661_v4, 5  ;;  %v9743_v63 = vadd.f32 %v9662_v18, %v9622_v17  ;;  %v4666_v54 = vshrl.u32 %v7467_v6, 16  ;;  %v7471_v28 = vld [vmem:[%s9057_s23 + $0x70] sm:$0xf] }
 0x11b   : > { %8522 = vmatpush3.bf16.msra.mxu1 %v8769_v23  ;;  %v4630_v12 = vsel %vm9070_vm3, %v4625_v39, %v4629_v9  ;;  %v4648_v51 = vor.u32 %v4647_v42, %v4644_v32  ;;  %v4658_v41 = vor.u32 %v4657_v44, %v4653_v43  ;;  %v7469_v23 = vld [vmem:[%s9057_s23 + $0x68] sm:$0x1]  ;;  %v4669_v18 = vshll.u32 %v7467_v6, 16  ;;  %v7472_v29 = vld [vmem:[%s9057_s23 + $0x74] sm:$0x1] }
 0x11c   : > { %v9666_v24 = vpop.f32.mrf.mxu0  ;;  %v8247_v62 = vpop.f32.mrf.mxu1  ;;  %8462 = vmatmul.mubr.msk.bf16.gmra.mxu0 %vm340_vm2, %v8767_v58  ;;  %8523 = vmatprep.subr.bf16.mxu1 %v8773_v31  ;;  %v4675_v56 = vshll.u32 %v7468_v59, 16  ;;  %v4679_v57 = vshrl.u32 %v7468_v59, 16  ;;  %v4668_v9 = vrot.slane %v4666_v54, 4  ;;  %v4685_v16 = vshll.u32 %v7469_v23, 16 }
 0x11d   : > { %v9746_v48 = vadd.f32 %v8247_v62, %v9643_v52  ;;  %8465 = vmatprep.mubr.msk.bf16.mxu0 %vm340_vm2, %v8770_v22  ;;  %v4640_v52 = vsel %vm9070_vm3, %v4635_v47, %v4639_v19  ;;  %v4649_v7 = vrot.slane %v4648_v51, 4  ;;  %v4659_v8 = vrot.slane %v4658_v41, 4 }
 0x11e   : > { %v9677_v37 = vpop.f32.mrf.mxu0  ;;  %v9726_v34 = vpop.f32.mrf.mxu1  ;;  %v7477_v0 = vcombine.low %v4630_v12, %v4640_v52  ;;  %v4671_v13 = vrot.slane %v4669_v18, 5  ;;  %v4677_v62 = vrot.slane %v4675_v56, 5  ;;  %v4681_v20 = vrot.slane %v4679_v57, 4  ;;  %v7525_v57 = vld [vmem:[%s9057_s23 + $0xc] sm:$0xf] }
 0x11f   : > { %10681 = vst [vmem:[#allocation18_spill] sm:$0xff] %v9746_v48  ;;  %8524 = vmatpush3.bf16.msra.mxu1 %v8773_v31  ;;  %v4654_v1 = vsel %vm9070_vm3, %v4649_v7, %v4653_v43  ;;  %v4664_v3 = vsel %vm9070_vm3, %v4659_v8, %v4663_v35  ;;  %v4690_v53 = vshrl.u32 %v7470_v21, 16  ;;  %v4693_v32 = vshll.u32 %v7470_v21, 16  ;;  %v7536_v48 = vld [vmem:[%s9057_s23 + $0x38] sm:$0x1] }
 0x120   : > { %v9699_v30 = vpop.f32.mrf.mxu0  ;;  %v9737_v61 = vpop.f32.mrf.mxu1  ;;  %8485 = vmatprep.mubr.msk.bf16.mxu1 %vm340_vm2, %v7477_v0  ;;  %8565 = vmatprep.subr.bf16.mxu1 %v9755_v55  ;;  %v7478_v4 = vcombine.low %v4654_v1, %v4664_v3  ;;  %v4672_v31 = vor.u32 %v4671_v13, %v4668_v9  ;;  %v4682_v39 = vor.u32 %v4681_v20, %v4677_v62  ;;  %v4687_v42 = vrot.slane %v4685_v16, 5  ;;  %v7526_v0 = vld [vmem:[%s9057_s23 + $0x10] sm:$0xf]  ;;  %v7527_v9 = vld [vmem:[%s9057_s23 + $0x14] sm:$0x1] }
 0x121   : > { %v4692_v43 = vrot.slane %v4690_v53, 4  ;;  %v4695_v6 = vrot.slane %v4693_v32, 5  ;;  %v4699_v12 = vshll.u32 %v7471_v28, 16  ;;  %v4703_v35 = vshrl.u32 %v7471_v28, 16  ;;  %v7569_v13 = vld [vmem:[%s9057_s23 + $0xc] sm:$0xe] }
 0x122   : > { %v9710_v5 = vpop.f32.mrf.mxu0  ;;  %v9757_v17 = vpop.f32.mrf.mxu1  ;;  %8486 = vmatmul.mubr.msk.bf16.gmra.mxu1 %vm340_vm2, %v7478_v4  ;;  %v4673_v51 = vrot.slane %v4672_v31, 4  ;;  %v4683_v41 = vrot.slane %v4682_v39, 4  ;;  %v4709_v59 = vshll.u32 %v7472_v29, 16  ;;  %v9785_v23 = vadd.f32 %v9726_v34, %v9657_v49  ;;  %v7571_v28 = vld [vmem:[%s9057_s23 + $0x14] sm:$0x1] }
 0x123   : > { %v4696_v52 = vor.u32 %v4695_v6, %v4692_v43  ;;  %v4701_v18 = vrot.slane %v4699_v12, 5  ;;  %v4705_v56 = vrot.slane %v4703_v35, 4  ;;  %v9793_v7 = vadd.f32 %v9670_v11, %v9626_v27  ;;  %v7570_v11 = vld [vmem:[%s9057_s23 + $0x10] sm:$0xf]  ;;  %v7528_v4 = vld [vmem:[%s9057_s23 + $0x18] sm:$0xf] }
 0x124   : > { %v9724_v26 = vpop.f32.mrf.mxu0  ;;  %v9765_v22 = vpop.f32.mrf.mxu1  ;;  %8466 = vmatmul.mubr.msk.bf16.gmra.mxu0 %vm340_vm2, %v8771_v10  ;;  %10682 = vst [vmem:[#allocation19_spill] sm:$0xff] %v9785_v23  ;;  %v4678_v8 = vsel %vm9070_vm3, %v4673_v51, %v4677_v62  ;;  %v4688_v49 = vsel %vm9070_vm3, %v4683_v41, %v4687_v42  ;;  %v4711_v34 = vrot.slane %v4709_v59, 5  ;;  %v5137_v10 = vshrl.u32 %v7525_v57, 16  ;;  %v7529_v59 = vld [vmem:[%s9057_s23 + $0x1c] sm:$0xf] }
 0x125   : > { %v7479_v21 = vcombine.low %v4678_v8, %v4688_v49  ;;  %v4697_v1 = vrot.slane %v4696_v52, 4  ;;  %v4706_v3 = vor.u32 %v4705_v56, %v4701_v18  ;;  %v5140_v27 = vshll.u32 %v7525_v57, 16  ;;  %v7530_v8 = vld [vmem:[%s9057_s23 + $0x20] sm:$0x1] }
 0x126   : > { %v9733_v38 = vpop.f32.mrf.mxu0  ;;  %v9777_v44 = vpop.f32.mrf.mxu1  ;;  %v5139_v62 = vrot.slane %v5137_v10, 4  ;;  %v5146_v29 = vshll.u32 %v7526_v0, 16  ;;  %v5150_v53 = vshrl.u32 %v7526_v0, 16  ;;  %v5156_v32 = vshll.u32 %v7527_v9, 16  ;;  %v7572_v9 = vld [vmem:[%s9057_s23 + $0x18] sm:$0xe] }
 0x127   : > { %10680 = vst [vmem:[#allocation17_spill] sm:$0xff] %v9733_v38  ;;  %8489 = vmatprep.mubr.msk.bf16.mxu1 %vm340_vm2, %v7479_v21  ;;  %v4702_v39 = vsel %vm9070_vm3, %v4697_v1, %v4701_v18  ;;  %v4707_v42 = vrot.slane %v4706_v3, 4  ;;  %v5142_v43 = vrot.slane %v5140_v27, 5  ;;  %v7593_v6 = vrot.slane %v7569_v13, 9  ;;  %v7573_v3 = vld [vmem:[%s9057_s23 + $0x1c] sm:$0xf] }
 0x128   : > { %v9748_v50 = vpop.f32.mrf.mxu0  ;;  %v9787_v54 = vpop.f32.mrf.mxu1  ;;  %v5148_v12 = vrot.slane %v5146_v29, 5  ;;  %v5152_v35 = vrot.slane %v5150_v53, 4  ;;  %v5158_v51 = vrot.slane %v5156_v32, 5  ;;  %v5604_v41 = vrot.slane %v7570_v11, 5  ;;  %v7574_v27 = vld [vmem:[%s9057_s23 + $0x20] sm:$0x1] }
 0x129   : > { %v4712_v57 = vsel %vm9070_vm3, %v4707_v42, %v4711_v34  ;;  %v5143_v0 = vor.u32 %v5142_v43, %v5139_v62  ;;  %v5607_v18 = vrot.slane %v7571_v28, 5  ;;  %v5161_v49 = vshrl.u32 %v7528_v4, 16  ;;  %v7532_v38 = vld [vmem:[%s9057_s23 + $0x28] sm:$0xf] }
 0x12a   : > { %v9761_v58 = vpop.f32.mrf.mxu0  ;;  %v9801_v20 = vpop.f32.mrf.mxu1  ;;  %v7480_v10 = vcombine.low %v4702_v39, %v4712_v57  ;;  %v5153_v13 = vor.u32 %v5152_v35, %v5148_v12  ;;  %v5605_v21 = vsel %vm9236_vm6, %v7593_v6, %v5604_v41  ;;  %v5606_v1 = vrot.slane %v5604_v41, 4 }
 0x12b   : > { %10683 = vst [vmem:[#allocation20_spill] sm:$0xff] %v9801_v20  ;;  %v5144_v29 = vrot.slane %v5143_v0, 4  ;;  %v5163_v53 = vrot.slane %v5161_v49, 4  ;;  %v5164_v32 = vshll.u32 %v7528_v4, 16  ;;  %v5170_v34 = vshll.u32 %v7529_v59, 16 }
 0x12c   : > { %v9767_v19 = vpop.f32.mrf.mxu0  ;;  %8490 = vmatmul.mubr.msk.bf16.gmra.mxu1 %vm340_vm2, %v7480_v10  ;;  %v5154_v28 = vrot.slane %v5153_v13, 4  ;;  %v5608_v39 = vsel %vm9236_vm6, %v5606_v1, %v5607_v18  ;;  %v5174_v42 = vshrl.u32 %v7529_v59, 16  ;;  %v5180_v43 = vshll.u32 %v7530_v8, 16  ;;  %v7531_v0 = vld [vmem:[%s9057_s23 + $0x24] sm:$0xf] }
 0x12d   : > { %v9814_v52 = vpop.f32.mrf.mxu1  ;;  %v5149_v35 = vsel %vm9070_vm3, %v5144_v29, %v5148_v12  ;;  %v7601_v41 = vcombine.low %v5605_v21, %v5608_v39  ;;  %v5166_v57 = vrot.slane %v5164_v32, 5  ;;  %v5172_v4 = vrot.slane %v5170_v34, 5  ;;  %v7533_v32 = vld [vmem:[%s9057_s23 + $0x2c] sm:$0x1] }
 0x12e   : > { %v9779_v47 = vpop.f32.mrf.mxu0  ;;  %v5159_v49 = vsel %vm9070_vm3, %v5154_v28, %v5158_v51  ;;  %v5176_v10 = vrot.slane %v5174_v42, 4  ;;  %v5182_v13 = vrot.slane %v5180_v43, 5  ;;  %v7594_v20 = vrot.slane %v7572_v9, 9 }
 0x12f   : > { %v9826_v11 = vpop.f32.mrf.mxu1  ;;  %v7549_v59 = vcombine.low %v5149_v35, %v5159_v49  ;;  %8525 = vmatprep.mubr.msk.bf16.mxu1 %vm340_vm2, %v7601_v41  ;;  %v5167_v8 = vor.u32 %v5166_v57, %v5163_v53  ;;  %v5611_v12 = vrot.slane %v7573_v3, 5  ;;  %v5614_v21 = vrot.slane %v7574_v27, 5  ;;  %v7575_v3 = vld [vmem:[%s9057_s23 + $0x24] sm:$0xe] }
 0x130   : > { %v9803_v16 = vpop.f32.mrf.mxu0  ;;  %v5177_v29 = vor.u32 %v5176_v10, %v5172_v4  ;;  %v5185_v34 = vshrl.u32 %v7531_v0, 16  ;;  %v5188_v51 = vshll.u32 %v7531_v0, 16  ;;  %v5194_v28 = vshll.u32 %v7532_v38, 16  ;;  %v7576_v0 = vld [vmem:[%s9057_s23 + $0x28] sm:$0xf] }
 0x131   : > { %v9833_v6 = vpop.f32.mrf.mxu1  ;;  %8501 = vmatprep.mubr.msk.bf16.mxu0 %vm340_vm2, %v7549_v59  ;;  %v5168_v9 = vrot.slane %v5167_v8, 4  ;;  %v5612_v39 = vsel %vm9236_vm6, %v7594_v20, %v5611_v12  ;;  %v5613_v42 = vrot.slane %v5611_v12, 4  ;;  %v5198_v53 = vshrl.u32 %v7532_v38, 16  ;;  %v7577_v20 = vld [vmem:[%s9057_s23 + $0x2c] sm:$0x1] }
 0x132   : > { %v9808_v31 = vpop.f32.mrf.mxu0  ;;  %v5178_v43 = vrot.slane %v5177_v29, 4  ;;  %v5187_v35 = vrot.slane %v5185_v34, 4  ;;  %v5190_v41 = vrot.slane %v5188_v51, 5  ;;  %v5196_v57 = vrot.slane %v5194_v28, 5  ;;  %v7534_v38 = vld [vmem:[%s9057_s23 + $0x30] sm:$0xf] }
 0x133   : > { %v9841_v18 = vpop.f32.mrf.mxu1  ;;  %v5173_v49 = vsel %vm9070_vm3, %v5168_v9, %v5172_v4  ;;  %v5615_v10 = vsel %vm9236_vm6, %v5613_v42, %v5614_v21  ;;  %v5200_v59 = vrot.slane %v5198_v53, 4  ;;  %v5204_v8 = vshll.u32 %v7533_v32, 16  ;;  %v7535_v4 = vld [vmem:[%s9057_s23 + $0x34] sm:$0xf]  ;;  %v8776_v21 = vld [vmem:[#allocation6 + $0x1d0] sm:$0xff]  }
 0x134   : > { %v9816_v56 = vpop.f32.mrf.mxu0  ;;  %v5183_v29 = vsel %vm9070_vm3, %v5178_v43, %v5182_v13  ;;  %v7602_v34 = vcombine.low %v5612_v39, %v5615_v10  ;;  %v5191_v51 = vor.u32 %v5190_v41, %v5187_v35  ;;  %v7595_v28 = vrot.slane %v7575_v3, 9  ;;  %v8777_v9 = vld [vmem:[#allocation6 + $0x1f0] sm:$0xff]   ;;  %v7578_v35 = vld [vmem:[%s9057_s23 + $0x30] sm:$0xe]  ;;  %v7579_v3 = vld [vmem:[%s9057_s23 + $0x34] sm:$0xf] }
 0x135   : > { %10684 = vst [vmem:[#allocation21_spill] sm:$0xff] %v9816_v56  ;;  %v9851_v27 = vpop.f32.mrf.mxu1  ;;  %v7550_v32 = vcombine.low %v5173_v49, %v5183_v29  ;;  %v5201_v42 = vor.u32 %v5200_v59, %v5196_v57  ;;  %v5206_v53 = vrot.slane %v5204_v8, 5  ;;  %v5621_v13 = vrot.slane %v7577_v20, 5  ;;  %v7580_v41 = vld [vmem:[%s9057_s23 + $0x38] sm:$0x1] }
 0x136   : > { %v9828_v62 = vpop.f32.mrf.mxu0  ;;  %8526 = vmatmul.mubr.msk.bf16.vlgmr.msra.gmra.mxu1 %vm340_vm2, %v7602_v34  ;;  %v5209_v39 = vshrl.u32 %v7534_v38, 16  ;;  %v5212_v43 = vshll.u32 %v7534_v38, 16  ;;  %v5218_v59 = vshll.u32 %v7535_v4, 16  ;;  %v5628_v56 = vrot.slane %v7580_v41, 5 }
 0x137   : > { %10685 = vst [vmem:[#allocation22_spill] sm:$0xff] %v9828_v62  ;;  %v9860_v12 = vpop.f32.mrf.mxu1  ;;  %8502 = vmatmul.mubr.msk.bf16.vlgmr.msra.gmra.mxu0 %vm340_vm2, %v7550_v32  ;;  %8566 = vmatpush3.bf16.msra.mxu1 %v9755_v55  ;;  %v5202_v49 = vrot.slane %v5201_v42, 4  ;;  %v5222_v55 = vshrl.u32 %v7535_v4, 16  ;;  %v5228_v32 = vshll.u32 %v7536_v48, 16  ;;  %v7537_v42 = vld [vmem:[%s9057_s23 + $0x3c] sm:$0xf] }
 0x138   : > { %v9844_v1 = vpop.f32.mrf.mxu0  ;;  %8542 = vmatpush3.bf16.msra.mxu0 %v9708_v2  ;;  %v5211_v38 = vrot.slane %v5209_v39, 4  ;;  %v5214_v34 = vrot.slane %v5212_v43, 5  ;;  %8567 = vmatprep.subr.bf16.mxu1 %v8777_v9  ;;  %v8779_v2 = vld [vmem:[#allocation6 + $0x1e8] sm:$0xff]  }
 0x139   : > { %10686 = vst [vmem:[#allocation23_spill] sm:$0xff] %v9844_v1  ;;  %v5618_v1 = vrot.slane %v7576_v0, 5  ;;  %v9868_v62 = vpop.f32.mrf.mxu1  ;;  %8543 = vmatprep.subr.bf16.mxu0 %v8776_v21  ;;  %v7538_v39 = vld [vmem:[%s9057_s23 + $0x40] sm:$0xf] }
 0x13a   : > { %v9862_v23 = vpop.f32.mrf.mxu0  ;;  %10688 = vst [vmem:[#allocation25_spill] sm:$0xff] %v9868_v62  ;;  %v8778_v4 = vld [vmem:[#allocation6 + $0x1c8] sm:$0xff]   ;;  %v5230_v62 = vrot.slane %v5228_v32, 5  ;;  %v5246_v41 = vshrl.u32 %v7538_v39, 16 }
 0x13b   : > { %10687 = vst [vmem:[#allocation24_spill] sm:$0xff] %v9862_v23  ;;  %v5192_v23 = vrot.slane %v5191_v51, 4  ;;  %v5619_v0 = vsel %vm9236_vm6, %v7595_v28, %v5618_v1  ;;  %v5620_v10 = vrot.slane %v5618_v1, 4  ;;  %v9878_v8 = vpop.f32.mrf.mxu1  ;;  %v5207_v51 = vsel %vm9070_vm3, %v5202_v49, %v5206_v53  ;;  %8568 = vmatpush3.bf16.msra.mxu1 %v8777_v9 }
 0x13c   : > { %10689 = vst [vmem:[#allocation26_spill] sm:$0xff] %v9878_v8  ;;  %v9880_v29 = vpop.f32.mrf.mxu0  ;;  %v5220_v28 = vrot.slane %v5218_v59, 5  ;;  %v7596_v53 = vrot.slane %v7578_v35, 9  ;;  %v5625_v49 = vrot.slane %v7579_v3, 5  ;;  %v5233_v59 = vshrl.u32 %v7537_v42, 16  ;;  %8544 = vmatpush3.bf16.msra.mxu0 %v8776_v21  ;;  %8569 = vmatprep.subr.bf16.mxu1 %v8779_v2 }
 0x13d   : > { %10690 = vst [vmem:[#allocation27_spill] sm:$0xff] %v9880_v29  ;;  %v5197_v20 = vsel %vm9070_vm3, %v5192_v23, %v5196_v57  ;;  %v5622_v1 = vsel %vm9236_vm6, %v5620_v10, %v5621_v13  ;;  %v5215_v23 = vor.u32 %v5214_v34, %v5211_v38  ;;  %v5224_v57 = vrot.slane %v5222_v55, 4  ;;  %v9891_v43 = vpop.f32.mrf.mxu1  ;;  %v7539_v13 = vld [vmem:[%s9057_s23 + $0x44] sm:$0x1]  ;;  %v7581_v38 = vld [vmem:[%s9057_s23 + $0x3c] sm:$0xe]  ;;  %8545 = vmatprep.subr.bf16.mxu0 %v8778_v4 }
 0x13e   : > { %v7551_v29 = vcombine.low %v5197_v20, %v5207_v51  ;;  %v7603_v8 = vcombine.low %v5619_v0, %v5622_v1  ;;  %v9894_v48 = vpop.f32.mrf.mxu0  ;;  %v5236_v20 = vshll.u32 %v7537_v42, 16  ;;  %v8781_v34 = vld [vmem:[#allocation6 + $0x1e0] sm:$0xff]   ;;  %v5626_v9 = vsel %vm9236_vm6, %v7596_v53, %v5625_v49  ;;  %v7583_v42 = vld [vmem:[%s9057_s23 + $0x44] sm:$0x1] }
 0x13f   : > { %10691 = vst [vmem:[#allocation28_spill] sm:$0xff] %v9894_v48  ;;  %v5216_v0 = vrot.slane %v5215_v23, 4  ;;  %v5225_v10 = vor.u32 %v5224_v57, %v5220_v28  ;;  %v9899_v55 = vpop.f32.mrf.mxu1  ;;  %v5627_v35 = vrot.slane %v5625_v49, 4  ;;  %v5242_v3 = vshll.u32 %v7538_v39, 16  ;;  %v8780_v23 = vld [vmem:[#allocation6 + $0x1c0] sm:$0xff]   ;;  %8570 = vmatpush3.bf16.msra.mxu1 %v8779_v2 }
 0x140   : > { %8505 = vmatprep.mubr.msk.bf16.mxu0 %vm340_vm2, %v7551_v29  ;;  %8529 = vmatprep.mubr.msk.bf16.mxu1 %vm340_vm2, %v7603_v8  ;;  %10692 = vst [vmem:[#allocation29_spill] sm:$0xff] %v9899_v55  ;;  %v7582_v29 = vld [vmem:[%s9057_s23 + $0x40] sm:$0xf]  ;;  %v5235_v1 = vrot.slane %v5233_v59, 4  ;;  %v5238_v32 = vrot.slane %v5236_v20, 5  ;;  %v5248_v49 = vrot.slane %v5246_v41, 4  ;;  %v9912_v55 = vpop.f32.mrf.mxu0 }
 0x141   : > { %v5221_v8 = vsel %vm9070_vm3, %v5216_v0, %v5220_v28  ;;  %v5226_v51 = vrot.slane %v5225_v10, 4  ;;  %v9907_v57 = vpop.f32.mrf.mxu1  ;;  %v5629_v21 = vsel %vm9236_vm6, %v5627_v35, %v5628_v56  ;;  %v5244_v53 = vrot.slane %v5242_v3, 5  ;;  %v7540_v48 = vld [vmem:[%s9057_s23 + $0x48] sm:$0xf]  ;;  %10693 = vst [vmem:[#allocation30_spill] sm:$0xff] %v9912_v55  ;;  %8571 = vmatprep.subr.bf16.mxu1 %v8781_v34  ;;  %8546 = vmatpush3.bf16.msra.mxu0 %v8778_v4 }
 0x142   : > { %v5252_v39 = vshll.u32 %v7539_v13, 16  ;;  %v7604_v0 = vcombine.low %v5626_v9, %v5629_v21  ;;  %v5239_v10 = vor.u32 %v5238_v32, %v5235_v1  ;;  %v7597_v59 = vrot.slane %v7581_v38, 9  ;;  %v7541_v20 = vld [vmem:[%s9057_s23 + $0x4c] sm:$0xf]  ;;  %v7542_v2 = vld [vmem:[%s9057_s23 + $0x50] sm:$0x1]  ;;  %8547 = vmatprep.subr.bf16.mxu0 %v8780_v23  ;;  %v9927_v4 = vpop.f32.mrf.mxu0 }
 0x143   : > { %v5231_v28 = vsel %vm9070_vm3, %v5226_v51, %v5230_v62  ;;  %v9917_v56 = vpop.f32.mrf.mxu1  ;;  %v5249_v3 = vor.u32 %v5248_v49, %v5244_v53  ;;  %v5632_v41 = vrot.slane %v7582_v29, 5  ;;  %v5635_v62 = vrot.slane %v7583_v42, 5  ;;  %v7584_v1 = vld [vmem:[%s9057_s23 + $0x48] sm:$0xe]  ;;  %v7585_v38 = vld [vmem:[%s9057_s23 + $0x4c] sm:$0xf]  ;;  %8572 = vmatpush3.bf16.msra.mxu1 %v8781_v34 }
 0x144   : > { %10694 = vst [vmem:[#allocation31_spill] sm:$0xff] %v9917_v56  ;;  %v7552_v35 = vcombine.low %v5221_v8, %v5231_v28  ;;  %v5254_v13 = vrot.slane %v5252_v39, 5  ;;  %8530 = vmatmul.mubr.msk.bf16.gmra.mxu1 %vm340_vm2, %v7604_v0  ;;  %v5240_v55 = vrot.slane %v5239_v10, 4  ;;  %v5257_v9 = vshrl.u32 %v7540_v48, 16  ;;  %v7586_v32 = vld [vmem:[%s9057_s23 + $0x50] sm:$0x1] }
 0x145   : > { %v5260_v51 = vshll.u32 %v7540_v48, 16  ;;  %v5250_v21 = vrot.slane %v5249_v3, 4  ;;  %v5633_v8 = vsel %vm9236_vm6, %v7597_v59, %v5632_v41  ;;  %v5634_v29 = vrot.slane %v5632_v41, 4  ;;  %10695 = vst [vmem:[#allocation32_spill] sm:$0xff] %v9927_v4  ;;  %v7543_v3 = vld [vmem:[%s9057_s23 + $0x54] sm:$0xf]  ;;  %8548 = vmatpush3.bf16.msra.mxu0 %v8780_v23 }
 0x146   : > { %8506 = vmatmul.mubr.msk.bf16.gmra.mxu0 %vm340_vm2, %v7552_v35  ;;  %v5266_v49 = vshll.u32 %v7541_v20, 16  ;;  %v5245_v48 = vsel %vm9070_vm3, %v5240_v55, %v5244_v53  ;;  %v5259_v42 = vrot.slane %v5257_v9, 4  ;;  %v5270_v28 = vshrl.u32 %v7541_v20, 16  ;;  %v7544_v53 = vld [vmem:[%s9057_s23 + $0x58] sm:$0xf] }
 0x147   : > { %v5262_v39 = vrot.slane %v5260_v51, 5  ;;  %v9931_v0 = vpop.f32.mrf.mxu1  ;;  %v5255_v10 = vsel %vm9070_vm3, %v5250_v21, %v5254_v13  ;;  %v5636_v59 = vsel %vm9236_vm6, %v5634_v29, %v5635_v62  ;;  %v5276_v34 = vshll.u32 %v7542_v2, 16  ;;  %v7545_v21 = vld [vmem:[%s9057_s23 + $0x5c] sm:$0x1]  ;;  %v9946_v2 = vpop.f32.mrf.mxu0 }
 0x148   : > { %10696 = vst [vmem:[#allocation33_spill] sm:$0xff] %v9931_v0  ;;  %v5268_v35 = vrot.slane %v5266_v49, 5  ;;  %v7553_v41 = vcombine.low %v5245_v48, %v5255_v10  ;;  %v7605_v4 = vcombine.low %v5633_v8, %v5636_v59  ;;  %v5272_v55 = vrot.slane %v5270_v28, 4  ;;  %10698 = vst [vmem:[#allocation35_spill] sm:$0xff] %v9946_v2  ;;  %v7587_v48 = vld [vmem:[%s9057_s23 + $0x54] sm:$0xe] }
 0x149   : > { %v5263_v56 = vor.u32 %v5262_v39, %v5259_v42  ;;  %v9939_v20 = vpop.f32.mrf.mxu1  ;;  %v9943_v9 = vadd.f32 %v9693_v25, %v9637_v40  ;;  %v7598_v13 = vrot.slane %v7584_v1, 9  ;;  %v5639_v51 = vrot.slane %v7585_v38, 5  ;;  %v7589_v10 = vld [vmem:[%s9057_s23 + $0x5c] sm:$0x1] }
 0x14a   : > { %10697 = vst [vmem:[#allocation34_spill] sm:$0xff] %v9939_v20  ;;  %v5642_v62 = vrot.slane %v7586_v32, 5  ;;  %8509 = vmatprep.mubr.msk.bf16.mxu0 %vm340_vm2, %v7553_v41  ;;  %8533 = vmatprep.mubr.msk.bf16.mxu1 %vm340_vm2, %v7605_v4  ;;  %v5273_v8 = vor.u32 %v5272_v55, %v5268_v35  ;;  %v5278_v29 = vrot.slane %v5276_v34, 5  ;;  %v5281_v49 = vshrl.u32 %v7543_v3, 16  ;;  %v7588_v32 = vld [vmem:[%s9057_s23 + $0x58] sm:$0xf] }
 0x14b   : > { %v5264_v23 = vrot.slane %v5263_v56, 4  ;;  %v9951_v42 = vpop.f32.mrf.mxu1  ;;  %v5640_v40 = vsel %vm9236_vm6, %v7598_v13, %v5639_v51  ;;  %v5641_v25 = vrot.slane %v5639_v51, 4  ;;  %v5284_v1 = vshll.u32 %v7543_v3, 16  ;;  %v7546_v3 = vld [vmem:[%s9057_s23 + $0x60] sm:$0xf]  ;;  %v9964_v51 = vpop.f32.mrf.mxu0 }
 0x14c   : > { %10699 = vst [vmem:[#allocation36_spill] sm:$0xff] %v9951_v42  ;;  %v5290_v38 = vshll.u32 %v7544_v53, 16  ;;  %v5274_v4 = vrot.slane %v5273_v8, 4  ;;  %v5283_v56 = vrot.slane %v5281_v49, 4  ;;  %v5294_v28 = vshrl.u32 %v7544_v53, 16 }
 0x14d   : > { %v5269_v39 = vsel %vm9070_vm3, %v5264_v23, %v5268_v35  ;;  %v9959_v59 = vpop.f32.mrf.mxu1  ;;  %v5643_v34 = vsel %vm9236_vm6, %v5641_v25, %v5642_v62  ;;  %v5286_v41 = vrot.slane %v5284_v1, 5  ;;  %v5300_v13 = vshll.u32 %v7545_v21, 16  ;;  %v7547_v49 = vld [vmem:[%s9057_s23 + $0x64] sm:$0xf]  ;;  %v7548_v53 = vld [vmem:[%s9057_s23 + $0x68] sm:$0x1] }
 0x14e   : > { %10700 = vst [vmem:[#allocation37_spill] sm:$0xff] %v9959_v59  ;;  %v5292_v55 = vrot.slane %v5290_v38, 5  ;;  %v5279_v35 = vsel %vm9070_vm3, %v5274_v4, %v5278_v29  ;;  %v7606_v23 = vcombine.low %v5640_v40, %v5643_v34  ;;  %v5296_v8 = vrot.slane %v5294_v28, 4  ;;  %v7590_v28 = vld [vmem:[%s9057_s23 + $0x60] sm:$0xe] }
 0x14f   : > { %v7599_v42 = vrot.slane %v7587_v48, 9  ;;  %v7554_v0 = vcombine.low %v5269_v39, %v5279_v35  ;;  %v5287_v2 = vor.u32 %v5286_v41, %v5283_v56  ;;  %v5302_v59 = vrot.slane %v5300_v13, 5  ;;  %v7592_v41 = vld [vmem:[%s9057_s23 + $0x68] sm:$0x1] }
 0x150   : > { %v5646_v20 = vrot.slane %v7588_v32, 5  ;;  %8534 = vmatmul.mubr.msk.bf16.gmra.mxu1 %vm340_vm2, %v7606_v23  ;;  %v5297_v62 = vor.u32 %v5296_v8, %v5292_v55  ;;  %v5649_v21 = vrot.slane %v7589_v10, 5  ;;  %v9973_v25 = vadd.f32 %v9765_v22, %v9699_v30  ;;  %v9975_v29 = vpop.f32.mrf.mxu1 }
 0x151   : > { %v5305_v1 = vshrl.u32 %v7546_v3, 16  ;;  %8510 = vmatmul.mubr.msk.bf16.gmra.mxu0 %vm340_vm2, %v7554_v0  ;;  %v5288_v48 = vrot.slane %v5287_v2, 4  ;;  %v5308_v32 = vshll.u32 %v7546_v3, 16  ;;  %v9980_v39 = vpop.f32.mrf.mxu0  ;;  %v5314_v30 = vshll.u32 %v7547_v49, 16 }
 0x152   : > { %v5647_v40 = vsel %vm9236_vm6, %v7599_v42, %v5646_v20  ;;  %v5648_v38 = vrot.slane %v5646_v20, 4  ;;  %v5298_v4 = vrot.slane %v5297_v62, 4  ;;  %v5318_v22 = vshrl.u32 %v7547_v49, 16  ;;  %v9983_v10 = vpop.f32.mrf.mxu1  ;;  %v7591_v20 = vld [vmem:[%s9057_s23 + $0x64] sm:$0xf] }
 0x153   : > { %v5307_v56 = vrot.slane %v5305_v1, 4  ;;  %v5293_v0 = vsel %vm9070_vm3, %v5288_v48, %v5292_v55  ;;  %v5310_v34 = vrot.slane %v5308_v32, 5  ;;  %v5324_v42 = vshll.u32 %v7548_v53, 16  ;;  %v9991_v13 = vpop.f32.mrf.mxu0  ;;  %v7621_v49 = vld [vmem:[%s9057_s23 + $0x18] sm:$0xf] }
 0x154   : > { %v5650_v2 = vsel %vm9236_vm6, %v5648_v38, %v5649_v21  ;;  %v5303_v3 = vsel %vm9070_vm3, %v5298_v4, %v5302_v59  ;;  %v5316_v23 = vrot.slane %v5314_v30, 5  ;;  %v5320_v8 = vrot.slane %v5318_v22, 4  ;;  %v9996_v62 = vpop.f32.mrf.mxu1  ;;  %v7622_v4 = vld [vmem:[%s9057_s23 + $0x1c] sm:$0xf] }
 0x155   : > { %v7607_v35 = vcombine.low %v5647_v40, %v5650_v2  ;;  %10701 = vst [vmem:[#allocation38_spill] sm:$0xff] %v9996_v62  ;;  %v7555_v55 = vcombine.low %v5293_v0, %v5303_v3  ;;  %v5311_v1 = vor.u32 %v5310_v34, %v5307_v56  ;;  %v5326_v21 = vrot.slane %v5324_v42, 5  ;;  %v9998_v53 = vpop.f32.mrf.mxu0  ;;  %v7666_v3 = vld [vmem:[%s9057_s23 + $0x1c] sm:$0xf]  ;;  %v7625_v62 = vld [vmem:[%s9057_s23 + $0x28] sm:$0xf] }
 0x156   : > { %v7600_v48 = vrot.slane %v7590_v28, 9  ;;  %10702 = vst [vmem:[#allocation39_spill] sm:$0xff] %v9998_v53  ;;  %v5321_v38 = vor.u32 %v5320_v8, %v5316_v23  ;;  %v5653_v32 = vrot.slane %v7591_v20, 5  ;;  %v5656_v59 = vrot.slane %v7592_v41, 5  ;;  %v7623_v28 = vld [vmem:[%s9057_s23 + $0x20] sm:$0x1]  ;;  %v10021_v42 = vpop.f32.mrf.mxu1 }
 0x157   : > { %8537 = vmatprep.mubr.msk.bf16.mxu1 %vm340_vm2, %v7607_v35  ;;  %v10003_v40 = vadd.f32 %v9777_v44, %v9710_v5  ;;  %v10008_v30 = vadd.f32 %v9737_v61, %v9666_v24  ;;  %8513 = vmatprep.mubr.msk.bf16.mxu0 %vm340_vm2, %v7555_v55  ;;  %v5312_v56 = vrot.slane %v5311_v1, 4  ;;  %v10013_v22 = vadd.f32 %v9787_v54, %v9724_v26  ;;  %v7665_v24 = vld [vmem:[%s9057_s23 + $0x18] sm:$0xe]  ;;  %v10019_v61 = vpop.f32.mrf.mxu0  ;;  %v7667_v1 = vld [vmem:[%s9057_s23 + $0x20] sm:$0x1]  ;;  %v10742_v60 = vld [vmem:[#allocation37_spill] sm:$0xff] }
 0x158   : > { %v5909_v0 = vshrl.u32 %v7621_v49, 16  ;;  %v5322_v2 = vrot.slane %v5321_v38, 4  ;;  %v5654_v5 = vsel %vm9236_vm6, %v7600_v48, %v5653_v32  ;;  %v5655_v44 = vrot.slane %v5653_v32, 4  ;;  %10703 = vst [vmem:[#allocation40_spill] sm:$0xff] %v10019_v61  ;;  %10704 = vst [vmem:[#allocation41_spill] sm:$0xff] %v10021_v42 }
 0x159   : > { %v5912_v34 = vshll.u32 %v7621_v49, 16  ;;  %v5317_v20 = vsel %vm9070_vm3, %v5312_v56, %v5316_v23  ;;  %v5918_v54 = vshll.u32 %v7622_v4, 16  ;;  %v5922_v41 = vshrl.u32 %v7622_v4, 16  ;;  %v7624_v48 = vld [vmem:[%s9057_s23 + $0x24] sm:$0xf] }
 0x15a   : > { %v5911_v26 = vrot.slane %v5909_v0, 4  ;;  %v5327_v35 = vsel %vm9070_vm3, %v5322_v2, %v5326_v21  ;;  %v5657_v8 = vsel %vm9236_vm6, %v5655_v44, %v5656_v59  ;;  %v5928_v55 = vshll.u32 %v7623_v28, 16 }
 0x15b   : > { %v5914_v49 = vrot.slane %v5912_v34, 5  ;;  %v7556_v38 = vcombine.low %v5317_v20, %v5327_v35  ;;  %v7608_v32 = vcombine.low %v5654_v5, %v5657_v8  ;;  %v5920_v42 = vrot.slane %v5918_v54, 5  ;;  %v7626_v20 = vld [vmem:[%s9057_s23 + $0x2c] sm:$0x1]  ;;  %v7668_v35 = vld [vmem:[%s9057_s23 + $0x24] sm:$0xe] }
 0x15c   : > { %v5924_v61 = vrot.slane %v5922_v41, 4  ;;  %v5930_v56 = vrot.slane %v5928_v55, 5  ;;  %v7689_v4 = vrot.slane %v7665_v24, 9  ;;  %v6376_v0 = vrot.slane %v7666_v3, 5  ;;  %v10033_v53 = vpop.f32.mrf.mxu0  ;;  %v10035_v21 = vpop.f32.mrf.mxu1 }
 0x15d   : > { %v5915_v23 = vor.u32 %v5914_v49, %v5911_v26  ;;  %8514 = vmatmul.mubr.msk.bf16.gmra.mxu0 %vm340_vm2, %v7556_v38  ;;  %8538 = vmatmul.mubr.msk.bf16.gmra.mxu1 %vm340_vm2, %v7608_v32  ;;  %v6379_v28 = vrot.slane %v7667_v1, 5  ;;  %v1171_v2 = vadd.f32 %v9748_v50, %v9675_v36  ;;  %v5933_v5 = vshrl.u32 %v7624_v48, 16  ;;  %v7670_v38 = vld [vmem:[%s9057_s23 + $0x2c] sm:$0x1] }
 0x15e   : > { %v5925_v59 = vor.u32 %v5924_v61, %v5920_v42  ;;  %v6377_v34 = vsel %vm9236_vm6, %v7689_v4, %v6376_v0  ;;  %v6378_v24 = vrot.slane %v6376_v0, 4  ;;  %v5936_v26 = vshll.u32 %v7624_v48, 16  ;;  %v10044_v54 = vpop.f32.mrf.mxu0  ;;  %v10046_v41 = vpop.f32.mrf.mxu1  ;;  %v7669_v48 = vld [vmem:[%s9057_s23 + $0x28] sm:$0xf] }
 0x15f   : > { %v5916_v44 = vrot.slane %v5915_v23, 4  ;;  %v10050_v61 = vadd.f32 %v9757_v17, %v9677_v37  ;;  %v5935_v36 = vrot.slane %v5933_v5, 4  ;;  %v5942_v50 = vshll.u32 %v7625_v62, 16 }
 0x160   : > { %v5926_v3 = vrot.slane %v5925_v59, 4  ;;  %v6380_v49 = vsel %vm9236_vm6, %v6378_v24, %v6379_v28  ;;  %v5938_v55 = vrot.slane %v5936_v26, 5  ;;  %v5946_v1 = vshrl.u32 %v7625_v62, 16  ;;  %v10059_v32 = vpop.f32.mrf.mxu0  ;;  %v10061_v23 = vpop.f32.mrf.mxu1 }
 0x161   : > { %v5921_v8 = vsel %vm9070_vm3, %v5916_v44, %v5920_v42  ;;  %10705 = vst [vmem:[#allocation42_spill] sm:$0xff] %v10059_v32  ;;  %10706 = vst [vmem:[#allocation43_spill] sm:$0xff] %v10061_v23  ;;  %v7697_v17 = vcombine.low %v6377_v34, %v6380_v49  ;;  %v1613_v4 = vadd.f32 %v9814_v52, %v1171_v2  ;;  %v5944_v0 = vrot.slane %v5942_v50, 5  ;;  %v7627_v23 = vld [vmem:[%s9057_s23 + $0x30] sm:$0xf] }
 0x162   : > { %v5931_v37 = vsel %vm9070_vm3, %v5926_v3, %v5930_v56  ;;  %v5939_v59 = vor.u32 %v5938_v55, %v5935_v36  ;;  %v5948_v28 = vrot.slane %v5946_v1, 4  ;;  %v5952_v5 = vshll.u32 %v7626_v20, 16  ;;  %v10070_v32 = vpop.f32.mrf.mxu1  ;;  %v10076_v20 = vpop.f32.mrf.mxu0  ;;  %v7628_v55 = vld [vmem:[%s9057_s23 + $0x34] sm:$0xf] }
 0x163   : > { %v7645_v42 = vcombine.low %v5921_v8, %v5931_v37  ;;  %8573 = vmatprep.mubr.msk.bf16.mxu1 %vm340_vm2, %v7697_v17  ;;  %v7690_v62 = vrot.slane %v7668_v35, 9  ;;  %v6383_v44 = vrot.slane %v7669_v48, 5  ;;  %v6386_v24 = vrot.slane %v7670_v38, 5  ;;  %v7629_v37 = vld [vmem:[%s9057_s23 + $0x38] sm:$0x1] }
 0x164   : > { %v1169_v26 = vadd.f32 %v9761_v58, %v9687_v45  ;;  %v5940_v52 = vrot.slane %v5939_v59, 4  ;;  %v5949_v56 = vor.u32 %v5948_v28, %v5944_v0  ;;  %v5954_v2 = vrot.slane %v5952_v5, 5  ;;  %v7671_v17 = vld [vmem:[%s9057_s23 + $0x30] sm:$0xe]  ;;  %v7672_v5 = vld [vmem:[%s9057_s23 + $0x34] sm:$0xf] }
 0x165   : > { %8549 = vmatprep.mubr.msk.bf16.mxu0 %vm340_vm2, %v7645_v42  ;;  %v1172_v34 = vadd.f32 %v9767_v19, %v9691_v46  ;;  %v6384_v3 = vsel %vm9236_vm6, %v7690_v62, %v6383_v44  ;;  %v6385_v36 = vrot.slane %v6383_v44, 4  ;;  %v1170_v58 = vadd.f32 %v9779_v47, %v9720_v14 }
 0x166   : > { %v1611_v45 = vadd.f32 %v9826_v11, %v1169_v26  ;;  %v5945_v50 = vsel %vm9070_vm3, %v5940_v52, %v5944_v0  ;;  %v5950_v35 = vrot.slane %v5949_v56, 4  ;;  %v5957_v19 = vshrl.u32 %v7627_v23, 16  ;;  %v7673_v52 = vld [vmem:[%s9057_s23 + $0x38] sm:$0x1] }
 0x167   : > { %v10086_v46 = vadd.f32 %v9833_v6, %v1172_v34  ;;  %v1683_v8 = vmul.f32 %v1613_v4, %v1613_v4  ;;  %v6387_v49 = vsel %vm9236_vm6, %v6385_v36, %v6386_v24  ;;  %v1612_v11 = vadd.f32 %v9841_v18, %v1170_v58  ;;  %v10092_v48 = vpop.f32.mrf.mxu1 }
 0x168   : > { %v5960_v1 = vshll.u32 %v7627_v23, 16  ;;  %v5955_v14 = vsel %vm9070_vm3, %v5950_v35, %v5954_v2  ;;  %v7698_v47 = vcombine.low %v6384_v3, %v6387_v49  ;;  %v1681_v38 = vmul.f32 %v1611_v45, %v1611_v45  ;;  %v10099_v0 = vpop.f32.mrf.mxu0  ;;  %v7631_v49 = vld [vmem:[%s9057_s23 + $0x40] sm:$0xf] }
 0x169   : > { %v7830_v6 = vpack.c.bf16 %v10086_v46, %v1613_v4  ;;  %v7646_v42 = vcombine.low %v5945_v50, %v5955_v14  ;;  %v1659_v59 = vadd.f32 %v1612_v11, %v1611_v45  ;;  %v1682_v28 = vmul.f32 %v1612_v11, %v1612_v11  ;;  %v10102_v23 = vpop.f32.mrf.mxu1 }
 0x16a   : > { %v7825_v18 = vpack.c.bf16 %v1612_v11, %v1611_v45  ;;  %8574 = vmatmul.mubr.msk.bf16.vlgmr.msra.gmra.mxu1 %vm340_vm2, %v7698_v47  ;;  %v5959_v62 = vrot.slane %v5957_v19, 4  ;;  %v5962_v44 = vrot.slane %v5960_v1, 5  ;;  %v5966_v24 = vshll.u32 %v7628_v55, 16  ;;  %v10109_v56 = vpop.f32.mrf.mxu0  ;;  %v7630_v45 = vld [vmem:[%s9057_s23 + $0x3c] sm:$0xf] }
 0x16b   : > { %7982 = vst [vmem:[%s10105_s28 + $0x8] sm:$0xff] %v7830_v6   ;;  %v5970_v26 = vshrl.u32 %v7628_v55, 16  ;;  %8550 = vmatmul.mubr.msk.bf16.vlgmr.msra.gmra.mxu0 %vm340_vm2, %v7646_v42  ;;  %v1660_v2 = vadd.f32 %v1659_v59, %v1613_v4  ;;  %v1697_v34 = vadd.f32 %v1682_v28, %v1681_v38  ;;  %v5976_v3 = vshll.u32 %v7629_v37, 16  ;;  %v10117_v55 = vpop.f32.mrf.mxu1  ;;  %v7632_v59 = vld [vmem:[%s9057_s23 + $0x44] sm:$0x1] }
 0x16c   : > { %7826 = vst [vmem:[%s10105_s28] sm:$0xff] %v7825_v18   ;;  %v7691_v36 = vrot.slane %v7671_v17, 9  ;;  %v5963_v58 = vor.u32 %v5962_v44, %v5959_v62  ;;  %v5968_v50 = vrot.slane %v5966_v24, 5  ;;  %v6390_v19 = vrot.slane %v7672_v5, 5  ;;  %v10115_v11 = vpop.f32.mrf.mxu0  ;;  %v7674_v24 = vld [vmem:[%s9057_s23 + $0x3c] sm:$0xe] }
 0x16d   : > { %v5972_v35 = vrot.slane %v5970_v26, 4  ;;  %v1698_v1 = vadd.f32 %v1697_v34, %v1683_v8  ;;  %v5978_v14 = vrot.slane %v5976_v3, 5  ;;  %v6393_v47 = vrot.slane %v7673_v52, 5  ;;  %v7675_v26 = vld [vmem:[%s9057_s23 + $0x40] sm:$0xf]  ;;  %v10134_v52 = vpop.f32.mrf.mxu1 }
 0x16e   : > { %v1175_v4 = vadd.f32 %v9803_v16, %v9731_v15  ;;  %v5964_v38 = vrot.slane %v5963_v58, 4  ;;  %v6391_v37 = vsel %vm9236_vm6, %v7691_v36, %v6390_v19  ;;  %v6392_v17 = vrot.slane %v6390_v19, 4  ;;  %v10126_v5 = vpop.f32.mrf.mxu0  ;;  %10708 = vst [vmem:[#allocation45_spill] sm:$0xff] %v10134_v52  ;;  %v7676_v58 = vld [vmem:[%s9057_s23 + $0x44] sm:$0x1] }
 0x16f   : > { %v5973_v6 = vor.u32 %v5972_v35, %v5968_v50  ;;  %v1684_v42 = vmul.f32 %v10086_v46, %v10086_v46  ;;  %v5981_v28 = vshrl.u32 %v7630_v45, 16  ;;  %v5984_v8 = vshll.u32 %v7630_v45, 16  ;;  %10707 = vst [vmem:[#allocation44_spill] sm:$0xff] %v10126_v5  ;;  %v7688_v5 = vld [vmem:[%s9057_s23 + $0x74] sm:$0x1] }
 0x170   : > { %v5990_v18 = vshll.u32 %v7631_v49, 16  ;;  %v5969_v15 = vsel %vm9070_vm3, %v5964_v38, %v5968_v50  ;;  %v6394_v62 = vsel %vm9236_vm6, %v6392_v17, %v6393_v47  ;;  %v5994_v44 = vshrl.u32 %v7631_v49, 16 }
 0x171   : > { %v5974_v16 = vrot.slane %v5973_v6, 4  ;;  %v7699_v34 = vcombine.low %v6391_v37, %v6394_v62  ;;  %v10137_v3 = vadd.f32 %v9851_v27, %v1175_v4  ;;  %v5983_v36 = vrot.slane %v5981_v28, 4  ;;  %v7633_v62 = vld [vmem:[%s9057_s23 + $0x48] sm:$0xf] }
 0x172   : > { %v5986_v45 = vrot.slane %v5984_v8, 5  ;;  %v5992_v35 = vrot.slane %v5990_v18, 5  ;;  %v5996_v19 = vrot.slane %v5994_v44, 4  ;;  %v6000_v38 = vshll.u32 %v7632_v59, 16 }
 0x173   : > { %v5979_v50 = vsel %vm9070_vm3, %v5974_v16, %v5978_v14  ;;  %8577 = vmatprep.mubr.msk.bf16.mxu1 %vm340_vm2, %v7699_v34  ;;  %v7692_v6 = vrot.slane %v7674_v24, 9  ;;  %v6397_v17 = vrot.slane %v7675_v26, 5  ;;  %v10143_v37 = vpop.f32.mrf.mxu0  ;;  %v6400_v28 = vrot.slane %v7676_v58, 5 }
 0x174   : > { %v7647_v47 = vcombine.low %v5969_v15, %v5979_v50  ;;  %v5987_v49 = vor.u32 %v5986_v45, %v5983_v36  ;;  %10709 = vst [vmem:[#allocation46_spill] sm:$0xff] %v10143_v37  ;;  %v5997_v27 = vor.u32 %v5996_v19, %v5992_v35  ;;  %v6002_v4 = vrot.slane %v6000_v38, 5  ;;  %v10148_v14 = vpop.f32.mrf.mxu1  ;;  %v7634_v50 = vld [vmem:[%s9057_s23 + $0x4c] sm:$0xf]  ;;  %v10732_v37 = vld [vmem:[#allocation20_spill] sm:$0xff] }
 0x175   : > { %v1173_v8 = vadd.f32 %v9808_v31, %v9743_v63  ;;  %10710 = vst [vmem:[#allocation47_spill] sm:$0xff] %v10148_v14  ;;  %v6398_v18 = vsel %vm9236_vm6, %v7692_v6, %v6397_v17  ;;  %v6399_v15 = vrot.slane %v6397_v17, 4  ;;  %v1661_v16 = vadd.f32 %v1660_v2, %v10086_v46  ;;  %v10154_v44 = vpop.f32.mrf.mxu0  ;;  %v10712_v63 = vld [vmem:[#allocation21_spill] sm:$0xff]  ;;  %v10714_v46 = vld [vmem:[#allocation22_spill] sm:$0xff] }
 0x176   : > { %8553 = vmatprep.mubr.msk.bf16.mxu0 %vm340_vm2, %v7647_v47  ;;  %v5988_v59 = vrot.slane %v5987_v49, 4  ;;  %10711 = vst [vmem:[#allocation48_spill] sm:$0xff] %v10154_v44  ;;  %v5998_v24 = vrot.slane %v5997_v27, 4  ;;  %v1699_v34 = vadd.f32 %v1698_v1, %v1684_v42  ;;  %v1176_v31 = vadd.f32 %v10712_v63, %v9793_v7  ;;  %v10159_v36 = vpop.f32.mrf.mxu1  ;;  %v10716_v49 = vld [vmem:[#allocation25_spill] sm:$0xff]  ;;  %v10717_v6 = vld [vmem:[#allocation26_spill] sm:$0xff] }
 0x177   : > { %v1615_v26 = vadd.f32 %v9860_v12, %v1173_v8  ;;  %10713 = vst [vmem:[#allocation21_spill] sm:$0xff] %v10159_v36  ;;  %v6401_v58 = vsel %vm9236_vm6, %v6399_v15, %v6400_v28  ;;  %v1174_v2 = vadd.f32 %v10714_v46, %v9943_v9  ;;  %v6005_v19 = vshrl.u32 %v7633_v62, 16  ;;  %v7635_v9 = vld [vmem:[%s9057_s23 + $0x50] sm:$0x1]  ;;  %v10177_v28 = vpop.f32.mrf.mxu0  ;;  %v7677_v15 = vld [vmem:[%s9057_s23 + $0x48] sm:$0xe] }
 0x178   : > { %v5993_v45 = vsel %vm9070_vm3, %v5988_v59, %v5992_v35  ;;  %v6003_v12 = vsel %vm9070_vm3, %v5998_v24, %v6002_v4  ;;  %v7700_v1 = vcombine.low %v6398_v18, %v6401_v58  ;;  %v10170_v38 = vpop.f32.mrf.mxu1  ;;  %v10173_v35 = vadd.f32 %v10716_v49, %v1176_v31  ;;  %10718 = vst [vmem:[#allocation25_spill] sm:$0xff] %v10177_v28  ;;  %v7679_v58 = vld [vmem:[%s9057_s23 + $0x50] sm:$0x1] }
 0x179   : > { %v1662_v42 = vadd.f32 %v1661_v16, %v1615_v26  ;;  %v1685_v7 = vmul.f32 %v1615_v26, %v1615_v26  ;;  %10715 = vst [vmem:[#allocation22_spill] sm:$0xff] %v10170_v38  ;;  %v7648_v47 = vcombine.low %v5993_v45, %v6003_v12  ;;  %v1616_v17 = vadd.f32 %v10717_v6, %v1174_v2  ;;  %v7678_v45 = vld [vmem:[%s9057_s23 + $0x4c] sm:$0xf]  ;;  %v10721_v38 = vld [vmem:[#allocation18_spill] sm:$0xff] }
 0x17a   : > { %v6007_v27 = vrot.slane %v6005_v19, 4  ;;  %8578 = vmatmul.mubr.msk.bf16.gmra.mxu1 %vm340_vm2, %v7700_v1  ;;  %v6008_v8 = vshll.u32 %v7633_v62, 16  ;;  %v6014_v59 = vshll.u32 %v7634_v50, 16  ;;  %v6018_v18 = vshrl.u32 %v7634_v50, 16  ;;  %v7636_v50 = vld [vmem:[%s9057_s23 + $0x54] sm:$0xf]  ;;  %v10189_v19 = vpop.f32.mrf.mxu1 }
 0x17b   : > { %v1700_v4 = vadd.f32 %v1699_v34, %v1685_v7  ;;  %v1687_v16 = vmul.f32 %v10137_v3, %v10137_v3  ;;  %8554 = vmatmul.mubr.msk.bf16.gmra.mxu0 %vm340_vm2, %v7648_v47  ;;  %v7840_v24 = vpack.c.bf16 %v10173_v35, %v10137_v3  ;;  %v1663_v63 = vadd.f32 %v1662_v42, %v1616_v17  ;;  %v10193_v42 = vpop.f32.mrf.mxu0 }
 0x17c   : > { %v1686_v31 = vmul.f32 %v1616_v17, %v1616_v17  ;;  %v7835_v34 = vpack.c.bf16 %v1616_v17, %v1615_v26  ;;  %v6010_v46 = vrot.slane %v6008_v8, 5  ;;  %v6016_v62 = vrot.slane %v6014_v59, 5  ;;  %10719 = vst [vmem:[#allocation26_spill] sm:$0xff] %v10189_v19  ;;  %10720 = vst [vmem:[#allocation49_spill] sm:$0xff] %v10193_v42  ;;  %v7637_v8 = vld [vmem:[%s9057_s23 + $0x58] sm:$0xf] }
 0x17d   : > { %v6020_v2 = vrot.slane %v6018_v18, 4  ;;  %7984 = vst [vmem:[%s10105_s28 + $0x18] sm:$0xff] %v7840_v24   ;;  %v1664_v12 = vadd.f32 %v1663_v63, %v10137_v3  ;;  %v6024_v7 = vshll.u32 %v7635_v9, 16  ;;  %v7693_v47 = vrot.slane %v7677_v15, 9  ;;  %v10722_v19 = vld [vmem:[#allocation23_spill] sm:$0xff] }
 0x17e   : > { %v1701_v1 = vadd.f32 %v1700_v4, %v1686_v31  ;;  %7983 = vst [vmem:[%s10105_s28 + $0x10] sm:$0xff] %v7835_v34   ;;  %v6011_v49 = vor.u32 %v6010_v46, %v6007_v27  ;;  %v6404_v26 = vrot.slane %v7678_v45, 5  ;;  %v6407_v17 = vrot.slane %v7679_v58, 5  ;;  %v7638_v27 = vld [vmem:[%s9057_s23 + $0x5c] sm:$0x1] }
 0x17f   : > { %v6021_v6 = vor.u32 %v6020_v2, %v6016_v62  ;;  %v6026_v18 = vrot.slane %v6024_v7, 5  ;;  %v1179_v24 = vadd.f32 %v10722_v19, %v10721_v38  ;;  %v6029_v28 = vshrl.u32 %v7636_v50, 16  ;;  %v7680_v34 = vld [vmem:[%s9057_s23 + $0x54] sm:$0xe]  ;;  %v7681_v7 = vld [vmem:[%s9057_s23 + $0x58] sm:$0xf] }
 0x180   : > { %v1702_v59 = vadd.f32 %v1701_v1, %v1687_v16  ;;  %v6012_v3 = vrot.slane %v6011_v49, 4  ;;  %v6405_v4 = vsel %vm9236_vm6, %v7693_v47, %v6404_v26  ;;  %v6406_v15 = vrot.slane %v6404_v26, 4  ;;  %v10202_v63 = vpop.f32.mrf.mxu1  ;;  %v7682_v47 = vld [vmem:[%s9057_s23 + $0x5c] sm:$0x1] }
 0x181   : > { %v6022_v9 = vrot.slane %v6021_v6, 4  ;;  %v1688_v31 = vmul.f32 %v10173_v35, %v10173_v35  ;;  %v6031_v16 = vrot.slane %v6029_v28, 4  ;;  %v6032_v45 = vshll.u32 %v7636_v50, 16  ;;  %v10207_v38 = vpop.f32.mrf.mxu0 }
 0x182   : > { %v6038_v58 = vshll.u32 %v7637_v8, 16  ;;  %v6017_v46 = vsel %vm9070_vm3, %v6012_v3, %v6016_v62  ;;  %v6408_v19 = vsel %vm9236_vm6, %v6406_v15, %v6407_v17  ;;  %v6042_v1 = vshrl.u32 %v7637_v8, 16  ;;  %v10217_v49 = vpop.f32.mrf.mxu1 }
 0x183   : > { %v6027_v2 = vsel %vm9070_vm3, %v6022_v9, %v6026_v18  ;;  %v7701_v50 = vcombine.low %v6405_v4, %v6408_v19  ;;  %v1621_v6 = vadd.f32 %v9891_v43, %v1179_v24  ;;  %v6034_v26 = vrot.slane %v6032_v45, 5  ;;  %v10220_v42 = vpop.f32.mrf.mxu0  ;;  %v10724_v4 = vld [vmem:[#allocation24_spill] sm:$0xff] }
 0x184   : > { %v7649_v28 = vcombine.low %v6017_v46, %v6027_v2  ;;  %v6040_v62 = vrot.slane %v6038_v58, 5  ;;  %v6044_v3 = vrot.slane %v6042_v1, 4  ;;  %v6048_v36 = vshll.u32 %v7638_v27, 16  ;;  %v10222_v9 = vpop.f32.mrf.mxu1  ;;  %v10723_v46 = vld [vmem:[#allocation19_spill] sm:$0xff]  ;;  %v7639_v43 = vld [vmem:[%s9057_s23 + $0x60] sm:$0xf] }
 0x185   : > { %v7694_v18 = vrot.slane %v7680_v34, 9  ;;  %8581 = vmatprep.mubr.msk.bf16.mxu1 %vm340_vm2, %v7701_v50  ;;  %v6035_v17 = vor.u32 %v6034_v26, %v6031_v16  ;;  %v6411_v8 = vrot.slane %v7681_v7, 5  ;;  %v6414_v15 = vrot.slane %v7682_v47, 5  ;;  %v10229_v24 = vpop.f32.mrf.mxu0  ;;  %v10725_v50 = vld [vmem:[#allocation29_spill] sm:$0xff]  ;;  %v10726_v47 = vld [vmem:[#allocation27_spill] sm:$0xff] }
 0x186   : > { %8557 = vmatprep.mubr.msk.bf16.mxu0 %vm340_vm2, %v7649_v28  ;;  %v1177_v2 = vadd.f32 %v10724_v4, %v10723_v46  ;;  %v6045_v45 = vor.u32 %v6044_v3, %v6040_v62  ;;  %v6050_v58 = vrot.slane %v6048_v36, 5  ;;  %v1665_v27 = vadd.f32 %v1664_v12, %v10173_v35  ;;  %v10727_v46 = vld [vmem:[#allocation28_spill] sm:$0xff]  ;;  %v10239_v4 = vpop.f32.mrf.mxu1 }
 0x187   : > { %v1703_v34 = vadd.f32 %v1702_v59, %v1688_v31  ;;  %v6036_v19 = vrot.slane %v6035_v17, 4  ;;  %v6412_v1 = vsel %vm9236_vm6, %v7694_v18, %v6411_v8  ;;  %v6413_v28 = vrot.slane %v6411_v8, 4  ;;  %v10245_v18 = vpop.f32.mrf.mxu0  ;;  %v10728_v8 = vld [vmem:[#allocation31_spill] sm:$0xff] }
 0x188   : > { %v1619_v16 = vadd.f32 %v10725_v50, %v1177_v2  ;;  %v6046_v7 = vrot.slane %v6045_v45, 4  ;;  %v1180_v26 = vadd.f32 %v10726_v47, %v10008_v30  ;;  %v1178_v3 = vadd.f32 %v10727_v46, %v10050_v61  ;;  %v7640_v45 = vld [vmem:[%s9057_s23 + $0x64] sm:$0xf] }
 0x189   : > { %v6053_v36 = vshrl.u32 %v7639_v43, 16  ;;  %v6041_v35 = vsel %vm9070_vm3, %v6036_v19, %v6040_v62  ;;  %v6415_v12 = vsel %vm9236_vm6, %v6413_v28, %v6414_v15  ;;  %v7641_v19 = vld [vmem:[%s9057_s23 + $0x68] sm:$0x1]  ;;  %v7683_v28 = vld [vmem:[%s9057_s23 + $0x60] sm:$0xe]  ;;  %v1691_v47 = vmul.f32 %v1621_v6, %v1621_v6 }
 0x18a   : > { %v1666_v59 = vadd.f32 %v1665_v27, %v1619_v16  ;;  %v1689_v31 = vmul.f32 %v1619_v16, %v1619_v16  ;;  %v6051_v30 = vsel %vm9070_vm3, %v6046_v7, %v6050_v58  ;;  %v7702_v17 = vcombine.low %v6412_v1, %v6415_v12  ;;  %v7684_v7 = vld [vmem:[%s9057_s23 + $0x64] sm:$0xf] }
 0x18b   : > { %v10250_v61 = vadd.f32 %v9907_v57, %v1180_v26  ;;  %v1620_v2 = vadd.f32 %v10728_v8, %v1178_v3  ;;  %v7650_v50 = vcombine.low %v6041_v35, %v6051_v30  ;;  %v6055_v15 = vrot.slane %v6053_v36, 4  ;;  %v7685_v36 = vld [vmem:[%s9057_s23 + $0x68] sm:$0x1] }
 0x18c   : > { %v1704_v62 = vadd.f32 %v1703_v34, %v1689_v31  ;;  %v6056_v27 = vshll.u32 %v7639_v43, 16  ;;  %8582 = vmatmul.mubr.msk.bf16.gmra.mxu1 %vm340_vm2, %v7702_v17  ;;  %v10259_v26 = vpop.f32.mrf.mxu1  ;;  %v6062_v3 = vshll.u32 %v7640_v45, 16  ;;  %v6066_v43 = vshrl.u32 %v7640_v45, 16  ;;  %v7642_v17 = vld [vmem:[%s9057_s23 + $0x6c] sm:$0xf] }
 0x18d   : > { %v7850_v58 = vpack.c.bf16 %v10250_v61, %v1621_v6  ;;  %v1667_v1 = vadd.f32 %v1666_v59, %v1620_v2  ;;  %v1690_v57 = vmul.f32 %v1620_v2, %v1620_v2  ;;  %10729 = vst [vmem:[#allocation18_spill] sm:$0xff] %v10259_v26  ;;  %8558 = vmatmul.mubr.msk.bf16.gmra.mxu0 %vm340_vm2, %v7650_v50  ;;  %v10263_v35 = vpop.f32.mrf.mxu0  ;;  %v6072_v59 = vshll.u32 %v7641_v19, 16  ;;  %v7643_v50 = vld [vmem:[%s9057_s23 + $0x70] sm:$0xf]  ;;  %v10731_v45 = vld [vmem:[#allocation17_spill] sm:$0xff] }
 0x18e   : > { %v7845_v34 = vpack.c.bf16 %v1620_v2, %v1619_v16  ;;  %v6058_v46 = vrot.slane %v6056_v27, 5  ;;  %v7695_v30 = vrot.slane %v7683_v28, 9  ;;  %v10267_v8 = vpop.f32.mrf.mxu1  ;;  %v6064_v14 = vrot.slane %v6062_v3, 5 }
 0x18f   : > { %7986 = vst [vmem:[%s10105_s28 + $0x28] sm:$0xff] %v7850_v58   ;;  %v1668_v12 = vadd.f32 %v1667_v1, %v1621_v6  ;;  %v1705_v31 = vadd.f32 %v1704_v62, %v1690_v57  ;;  %10730 = vst [vmem:[#allocation23_spill] sm:$0xff] %v10267_v8  ;;  %v6068_v16 = vrot.slane %v6066_v43, 4  ;;  %v6418_v2 = vrot.slane %v7684_v7, 5  ;;  %v10271_v27 = vpop.f32.mrf.mxu0 }
 0x190   : > { %7985 = vst [vmem:[%s10105_s28 + $0x20] sm:$0xff] %v7845_v34   ;;  %v6059_v44 = vor.u32 %v6058_v46, %v6055_v15  ;;  %v920_v26 = vadd.f32 %v10732_v37, %v10731_v45  ;;  %v6074_v6 = vrot.slane %v6072_v59, 5  ;;  %v6421_v62 = vrot.slane %v7685_v36, 5  ;;  %v10275_v19 = vpop.f32.mrf.mxu1  ;;  %v7644_v37 = vld [vmem:[%s9057_s23 + $0x74] sm:$0x1] }
 0x191   : > { %v1706_v58 = vadd.f32 %v1705_v31, %v1691_v47  ;;  %10733 = vst [vmem:[#allocation19_spill] sm:$0xff] %v10275_v19  ;;  %v6069_v1 = vor.u32 %v6068_v16, %v6064_v14  ;;  %v6419_v15 = vsel %vm9236_vm6, %v7695_v30, %v6418_v2  ;;  %v6420_v57 = vrot.slane %v6418_v2, 4  ;;  %v10279_v7 = vpop.f32.mrf.mxu0  ;;  %v7686_v59 = vld [vmem:[%s9057_s23 + $0x6c] sm:$0xe]  ;;  %v7687_v30 = vld [vmem:[%s9057_s23 + $0x70] sm:$0xf] }
 0x192   : > { %v6060_v28 = vrot.slane %v6059_v44, 4  ;;  %v1692_v34 = vmul.f32 %v10250_v61, %v10250_v61  ;;  %v6077_v47 = vshrl.u32 %v7642_v17, 16  ;;  %v6080_v46 = vshll.u32 %v7642_v17, 16  ;;  %v10734_v2 = vld [vmem:[#allocation30_spill] sm:$0xff]  ;;  %v10295_v17 = vpop.f32.mrf.mxu1 }
 0x193   : > { %v6086_v3 = vshll.u32 %v7643_v50, 16  ;;  %v6070_v36 = vrot.slane %v6069_v1, 4  ;;  %v6422_v44 = vsel %vm9236_vm6, %v6420_v57, %v6421_v62  ;;  %v6090_v31 = vshrl.u32 %v7643_v50, 16  ;;  %v10293_v8 = vpop.f32.mrf.mxu0  ;;  %10736 = vst [vmem:[#allocation29_spill] sm:$0xff] %v10295_v17 }
 0x194   : > { %v6065_v43 = vsel %vm9070_vm3, %v6060_v28, %v6064_v14  ;;  %v7703_v16 = vcombine.low %v6419_v15, %v6422_v44  ;;  %v1183_v45 = vadd.f32 %v10734_v2, %v9973_v25  ;;  %v6079_v19 = vrot.slane %v6077_v47, 4  ;;  %10735 = vst [vmem:[#allocation24_spill] sm:$0xff] %v10293_v8  ;;  %v10737_v2 = vld [vmem:[#allocation32_spill] sm:$0xff] }
 0x195   : > { %v6082_v52 = vrot.slane %v6080_v46, 5  ;;  %v6075_v14 = vsel %vm9070_vm3, %v6070_v36, %v6074_v6  ;;  %v6088_v28 = vrot.slane %v6086_v3, 5  ;;  %v6092_v1 = vrot.slane %v6090_v31, 4  ;;  %v10738_v36 = vld [vmem:[#allocation34_spill] sm:$0xff] }
 0x196   : > { %v6096_v62 = vshll.u32 %v7644_v37, 16  ;;  %v7651_v50 = vcombine.low %v6065_v43, %v6075_v14  ;;  %8585 = vmatprep.mubr.msk.bf16.mxu1 %vm340_vm2, %v7703_v16  ;;  %v7696_v57 = vrot.slane %v7686_v59, 9  ;;  %v6425_v44 = vrot.slane %v7687_v30, 5  ;;  %v10739_v59 = vld [vmem:[#allocation35_spill] sm:$0xff] }
 0x197   : > { %v6083_v15 = vor.u32 %v6082_v52, %v6079_v19  ;;  %v6093_v25 = vor.u32 %v6092_v1, %v6088_v28  ;;  %v6428_v46 = vrot.slane %v7688_v5, 5  ;;  %v1181_v8 = vadd.f32 %v10737_v2, %v10003_v40 }
 0x198   : > { %v6098_v47 = vrot.slane %v6096_v62, 5  ;;  %8561 = vmatprep.mubr.msk.bf16.mxu0 %vm340_vm2, %v7651_v50  ;;  %v6426_v6 = vsel %vm9236_vm6, %v7696_v57, %v6425_v44  ;;  %v6427_v3 = vrot.slane %v6425_v44, 4  ;;  %v1669_v37 = vadd.f32 %v1668_v12, %v10250_v61  ;;  %v10306_v43 = vpop.f32.mrf.mxu0  ;;  %v10308_v52 = vpop.f32.mrf.mxu1  ;;  %v10740_v62 = vld [vmem:[#allocation33_spill] sm:$0xff] }
 0x199   : > { %v6084_v17 = vrot.slane %v6083_v15, 4  ;;  %v6094_v19 = vrot.slane %v6093_v25, 4  ;;  %v1623_v31 = vadd.f32 %v10738_v36, %v1181_v8  ;;  %v1707_v5 = vadd.f32 %v1706_v58, %v1692_v34  ;;  %v10743_v36 = vld [vmem:[#allocation39_spill] sm:$0xff] }
 0x19a   : > { %v1184_v40 = vadd.f32 %v10739_v59, %v10013_v22  ;;  %v6429_v16 = vsel %vm9236_vm6, %v6427_v3, %v6428_v46  ;;  %v1182_v14 = vadd.f32 %v9964_v51, %v920_v26  ;;  %v10318_v61 = vpop.f32.mrf.mxu0  ;;  %v10320_v12 = vpop.f32.mrf.mxu1  ;;  %v1625_v22 = vadd.f32 %v10740_v62, %v1183_v45 }
 0x19b   : > { %v6089_v30 = vsel %vm9070_vm3, %v6084_v17, %v6088_v28  ;;  %v6099_v1 = vsel %vm9070_vm3, %v6094_v19, %v6098_v47  ;;  %v7704_v8 = vcombine.low %v6426_v6, %v6429_v16  ;;  %v1670_v58 = vadd.f32 %v1669_v37, %v1623_v31  ;;  %v10741_v17 = vld [vmem:[#allocation36_spill] sm:$0xff] }
 0x19c   : > { %v1693_v34 = vmul.f32 %v1623_v31, %v1623_v31  ;;  %v7652_v50 = vcombine.low %v6089_v30, %v6099_v1  ;;  %v1626_v28 = vadd.f32 %v10741_v17, %v1184_v40  ;;  %v1624_v15 = vadd.f32 %v10742_v60, %v1182_v14  ;;  %v10327_v51 = vpop.f32.mrf.mxu0  ;;  %v10329_v26 = vpop.f32.mrf.mxu1  ;;  %v10745_v40 = vld [vmem:[#allocation40_spill] sm:$0xff] }
 0x19d   : > { %8586 = vmatmul.mubr.msk.bf16.gmra.mxu1 %vm340_vm2, %v7704_v8  ;;  %v1695_v46 = vmul.f32 %v1625_v22, %v1625_v22  ;;  %v2560_v37 = vadd.f32 %v9975_v29, %v9980_v39  ;;  %v2558_v19 = vadd.f32 %v9983_v10, %v9991_v13  ;;  %v2564_v13 = vadd.f32 %v10035_v21, %v10033_v53  ;;  %v10747_v53 = vld [vmem:[#allocation42_spill] sm:$0xff]  ;;  %v10748_v21 = vld [vmem:[#allocation43_spill] sm:$0xff] }
 0x19e   : > { %v1708_v33 = vadd.f32 %v1707_v5, %v1693_v34  ;;  %8562 = vmatmul.mubr.msk.bf16.gmra.mxu0 %vm340_vm2, %v7652_v50  ;;  %v7860_v57 = vpack.c.bf16 %v1626_v28, %v1625_v22  ;;  %v1671_v44 = vadd.f32 %v1670_v58, %v1624_v15  ;;  %v1694_v25 = vmul.f32 %v1624_v15, %v1624_v15  ;;  %v10333_v45 = vpop.f32.mrf.mxu1  ;;  %v10336_v3 = vpop.f32.mrf.mxu0  ;;  %v10744_v5 = vld [vmem:[#allocation38_spill] sm:$0xff] }
 0x19f   : > { %v7855_v47 = vpack.c.bf16 %v1624_v15, %v1623_v31  ;;  %v2561_v59 = vadd.f32 %v10744_v5, %v10743_v36  ;;  %v10746_v31 = vld [vmem:[#allocation41_spill] sm:$0xff]  ;;  %v1696_v16 = vmul.f32 %v1626_v28, %v1626_v28  ;;  %v3002_v8 = vadd.f32 %v10207_v38, %v2560_v37  ;;  %v10752_v36 = vld [vmem:[#allocation18_spill] sm:$0xff] }
 0x1a0   : > { %7988 = vst [vmem:[%s10105_s28 + $0x38] sm:$0xff] %v7860_v57   ;;  %v1672_v2 = vadd.f32 %v1671_v44, %v1625_v22  ;;  %v1709_v6 = vadd.f32 %v1708_v33, %v1694_v25  ;;  %v2559_v30 = vadd.f32 %v10746_v31, %v10745_v40  ;;  %v3000_v58 = vadd.f32 %v10220_v42, %v2558_v19  ;;  %v10751_v37 = vld [vmem:[#allocation45_spill] sm:$0xff]  ;;  %v10756_v40 = vld [vmem:[#allocation47_spill] sm:$0xff] }
 0x1a1   : > { %7987 = vst [vmem:[%s10105_s28 + $0x30] sm:$0xff] %v7855_v47   ;;  %v3003_v34 = vadd.f32 %v10229_v24, %v2561_v59  ;;  %v2562_v62 = vadd.f32 %v10046_v41, %v10044_v54  ;;  %v3332_v38 = vadd.f32 %v10202_v63, %v3002_v8  ;;  %v2565_v54 = vadd.f32 %v10748_v21, %v10747_v53  ;;  %v10755_v59 = vld [vmem:[#allocation46_spill] sm:$0xff] }
 0x1a2   : > { %v10347_v14 = vadd.f32 %v1672_v2, %v1626_v28  ;;  %v1710_v1 = vadd.f32 %v1709_v6, %v1695_v46  ;;  %v3001_v29 = vadd.f32 %v10245_v18, %v2559_v30  ;;  %v3330_v42 = vadd.f32 %v10217_v49, %v3000_v58  ;;  %v10749_v46 = vld [vmem:[#allocation23_spill] sm:$0xff]  ;;  %v10750_v6 = vld [vmem:[#allocation44_spill] sm:$0xff]  ;;  %v10757_v58 = vld [vmem:[#allocation29_spill] sm:$0xff] }
 0x1a3   : > { %v10353_v39 = vpop.f32.mrf.mxu1  ;;  %v3333_v24 = vadd.f32 %v10222_v9, %v3003_v34  ;;  %v3004_v17 = vadd.f32 %v10271_v27, %v2562_v62  ;;  %v2563_v41 = vadd.f32 %v10070_v32, %v10076_v20  ;;  %v3006_v49 = vadd.f32 %v10263_v35, %v2564_v13  ;;  %v10758_v62 = vld [vmem:[#allocation48_spill] sm:$0xff] }
 0x1a4   : > { %v10355_v10 = vadd.f32 %v1710_v1, %v1696_v16  ;;  %v10361_v22 = vpop.f32.mrf.mxu0  ;;  %v3331_v18 = vadd.f32 %v10239_v4, %v3001_v29  ;;  %v2568_v9 = vadd.f32 %v10092_v48, %v10099_v0  ;;  %v3400_v4 = vmul.f32 %v3330_v42, %v3330_v42 }
 0x1a5   : > { %v10367_v50 = vpop.f32.mrf.mxu1  ;;  %v7870_v63 = vpack.c.bf16 %v3333_v24, %v3332_v38  ;;  %v2566_v57 = vadd.f32 %v10102_v23, %v10109_v56  ;;  %v2569_v44 = vadd.f32 %v10117_v55, %v10115_v11  ;;  %v3007_v20 = vadd.f32 %v10279_v7, %v2565_v54  ;;  %v10753_v56 = vld [vmem:[#allocation19_spill] sm:$0xff]  ;;  %v10754_v11 = vld [vmem:[#allocation24_spill] sm:$0xff] }
 0x1a6   : > { %v10370_v28 = vpop.f32.mrf.mxu0  ;;  %v3378_v15 = vadd.f32 %v3331_v18, %v3330_v42  ;;  %v3401_v27 = vmul.f32 %v3331_v18, %v3331_v18  ;;  %v7865_v32 = vpack.c.bf16 %v3331_v18, %v3330_v42  ;;  %v3402_v35 = vmul.f32 %v3332_v38, %v3332_v38 }
 0x1a7   : > { %v10377_v60 = vpop.f32.mrf.mxu1  ;;  %7990 = vst [vmem:[%s10105_s28 + $0x48] sm:$0xff] %v7870_v63   ;;  %v3334_v48 = vadd.f32 %v10749_v46, %v3004_v17  ;;  %v2567_v19 = vadd.f32 %v10751_v37, %v10750_v6  ;;  %v3336_v23 = vadd.f32 %v10752_v36, %v3006_v49  ;;  %v3337_v5 = vadd.f32 %v10753_v56, %v3007_v20  ;;  %v10762_v49 = vld [vmem:[#allocation49_spill] sm:$0xff] }
 0x1a8   : > { %v8372_v33 = vpop.f32.mrf.mxu0  ;;  %v3379_v25 = vadd.f32 %v3378_v15, %v3332_v38  ;;  %v3416_v47 = vadd.f32 %v3401_v27, %v3400_v4  ;;  %7989 = vst [vmem:[%s10105_s28 + $0x40] sm:$0xff] %v7865_v32   ;;  %v3005_v55 = vadd.f32 %v10754_v11, %v2563_v41  ;;  %v2572_v7 = vadd.f32 %v10756_v40, %v10755_v59  ;;  %v10759_v38 = vld [vmem:[#allocation21_spill] sm:$0xff]  ;;  %v10761_v41 = vld [vmem:[#allocation22_spill] sm:$0xff] }
 0x1a9   : > { %v3318_v2 = vpop.f32.mrf.mxu1  ;;  %v3403_v31 = vmul.f32 %v3333_v24, %v3333_v24  ;;  %v7880_v8 = vpack.c.bf16 %v3337_v5, %v3336_v23  ;;  %v3010_v29 = vadd.f32 %v10306_v43, %v2568_v9  ;;  %v3008_v13 = vadd.f32 %v10318_v61, %v2566_v57  ;;  %v10763_v4 = vld [vmem:[#allocation26_spill] sm:$0xff] }
 0x1aa   : > { %v2988_v0 = vpop.f32.mrf.mxu0  ;;  %v3417_v30 = vadd.f32 %v3416_v47, %v3402_v35  ;;  %v3380_v16 = vadd.f32 %v3379_v25, %v3333_v24  ;;  %v3335_v34 = vadd.f32 %v10757_v58, %v3005_v55  ;;  %v2570_v42 = vadd.f32 %v10759_v38, %v10758_v62  ;;  %v10760_v24 = vld [vmem:[#allocation25_spill] sm:$0xff] }
 0x1ab   : > { %v3404_v17 = vmul.f32 %v3334_v48, %v3334_v48  ;;  %v2573_v63 = vadd.f32 %v10761_v41, %v10760_v24  ;;  %v2571_v15 = vadd.f32 %v10763_v4, %v10762_v49  ;;  %7992 = vst [vmem:[%s10105_s28 + $0x58] sm:$0xff] %v7880_v8   ;;  %v3406_v9 = vmul.f32 %v3336_v23, %v3336_v23 }
 0x1ac   : > { %v10396_v1 = vpop.f32.mrf.mxu0  ;;  %v3381_v18 = vadd.f32 %v3380_v16, %v3334_v48  ;;  %v3418_v53 = vadd.f32 %v3417_v30, %v3403_v31  ;;  %v3405_v43 = vmul.f32 %v3335_v34, %v3335_v34  ;;  %v7875_v61 = vpack.c.bf16 %v3335_v34, %v3334_v48 }
 0x1ad   : > { %v3011_v32 = vadd.f32 %v10327_v51, %v2569_v44  ;;  %v3340_v25 = vadd.f32 %v10308_v52, %v3010_v29  ;;  %v3338_v47 = vadd.f32 %v10320_v12, %v3008_v13  ;;  %v3009_v46 = vadd.f32 %v10336_v3, %v2567_v19 }
 0x1ae   : > { %v10403_v21 = vpop.f32.mrf.mxu1  ;;  %v10405_v54 = vpop.f32.mrf.mxu0  ;;  %v3419_v27 = vadd.f32 %v3418_v53, %v3404_v17  ;;  %v3382_v57 = vadd.f32 %v3381_v18, %v3335_v34  ;;  %7991 = vst [vmem:[%s10105_s28 + $0x50] sm:$0xff] %v7875_v61   ;;  %v3014_v6 = vadd.f32 %v10361_v22, %v2572_v7  ;;  %v3015_v56 = vadd.f32 %v8372_v33, %v2573_v63 }
 0x1af   : > { %v3341_v36 = vadd.f32 %v10329_v26, %v3011_v32  ;;  %v3339_v44 = vadd.f32 %v10333_v45, %v3009_v46  ;;  %v3012_v52 = vadd.f32 %v10370_v28, %v2570_v42  ;;  %v3013_v55 = vadd.f32 %v2988_v0, %v2571_v15 }
 0x1b0   : > { %v10413_v20 = vpop.f32.mrf.mxu1  ;;  %v10415_v35 = vpop.f32.mrf.mxu0  ;;  %v3383_v37 = vadd.f32 %v3382_v57, %v3336_v23  ;;  %v3420_v48 = vadd.f32 %v3419_v27, %v3405_v43  ;;  %v3407_v12 = vmul.f32 %v3337_v5, %v3337_v5  ;;  %v3408_v26 = vmul.f32 %v3338_v47, %v3338_v47 }
 0x1b1   : > { %v7890_v22 = vpack.c.bf16 %v3341_v36, %v3340_v25  ;;  %v3409_v33 = vmul.f32 %v3339_v44, %v3339_v44  ;;  %v7885_v40 = vpack.c.bf16 %v3339_v44, %v3338_v47  ;;  %v3344_v7 = vadd.f32 %v10353_v39, %v3014_v6 }
 0x1b2   : > { %v10423_v11 = vpop.f32.mrf.mxu1  ;;  %v10425_v51 = vpop.f32.mrf.mxu0  ;;  %v3421_v3 = vadd.f32 %v3420_v48, %v3406_v9  ;;  %v3384_v19 = vadd.f32 %v3383_v37, %v3337_v5  ;;  %v3345_v45 = vadd.f32 %v10377_v60, %v3015_v56  ;;  %v3343_v28 = vadd.f32 %v3318_v2, %v3013_v55 }
 0x1b3   : > { %7994 = vst [vmem:[%s10105_s28 + $0x68] sm:$0xff] %v7890_v22   ;;  %7993 = vst [vmem:[%s10105_s28 + $0x60] sm:$0xff] %v7885_v40   ;;  %v3342_v5 = vadd.f32 %v10367_v50, %v3012_v52  ;;  %v3410_v13 = vmul.f32 %v3340_v25, %v3340_v25  ;;  %v1674_v42 = vrot.slane %v10347_v14, 4  ;;  %v3411_v50 = vmul.f32 %v3341_v36, %v3341_v36 }
 0x1b4   : > { %v10429_v23 = vpop.f32.mrf.mxu1  ;;  %v10431_v59 = vpop.f32.mrf.mxu0  ;;  %v3385_v31 = vadd.f32 %v3384_v19, %v3338_v47  ;;  %v3422_v30 = vadd.f32 %v3421_v3, %v3407_v12  ;;  %v7900_v58 = vpack.c.bf16 %v3345_v45, %v3344_v7  ;;  %v1712_v41 = vrot.slane %v10355_v10, 4 }
 0x1b5   : > { %v7895_v39 = vpack.c.bf16 %v3343_v28, %v3342_v5  ;;  %v3412_v49 = vmul.f32 %v3342_v5, %v3342_v5  ;;  %v3413_v15 = vmul.f32 %v3343_v28, %v3343_v28  ;;  %v1675_v9 = vadd.f32 %v1674_v42, %v10347_v14 }
 0x1b6   : > { %v10436_v0 = vpop.f32.mrf.mxu0  ;;  %v3423_v16 = vadd.f32 %v3422_v30, %v3408_v26  ;;  %v3386_v8 = vadd.f32 %v3385_v31, %v3339_v44  ;;  %7996 = vst [vmem:[%s10105_s28 + $0x78] sm:$0xff] %v7900_v58   ;;  %v1713_v47 = vadd.f32 %v1712_v41, %v10355_v10  ;;  %v3414_v46 = vmul.f32 %v3344_v7, %v3344_v7 }
 0x1b7   : > { %7995 = vst [vmem:[%s10105_s28 + $0x70] sm:$0xff] %v7895_v39   ;;  %v1676_v56 = vrot.slane %v1675_v9, 2  ;;  %v3415_v44 = vmul.f32 %v3345_v45, %v3345_v45 }
 0x1b8   : > { %v10440_v34 = vpop.f32.mrf.mxu1  ;;  %v10442_v29 = vpop.f32.mrf.mxu0  ;;  %v3387_v62 = vadd.f32 %v3386_v8, %v3340_v25  ;;  %v3424_v38 = vadd.f32 %v3423_v16, %v3409_v33  ;;  %v1714_v3 = vrot.slane %v1713_v47, 2 }
 0x1b9   : > { %v1677_v33 = vadd.f32 %v1676_v56, %v1675_v9 }
 0x1ba   : > { %v10445_v60 = vpop.f32.mrf.mxu1  ;;  %v10447_v2 = vpop.f32.mrf.mxu0  ;;  %v3425_v18 = vadd.f32 %v3424_v38, %v3410_v13  ;;  %v3388_v17 = vadd.f32 %v3387_v62, %v3341_v36  ;;  %v1715_v30 = vadd.f32 %v1714_v3, %v1713_v47 }
 0x1bb   : > { %v1678_v58 = vrot.slane %v1677_v33, 1 }
 0x1bc   : > { %v10451_v53 = vpop.f32.mrf.mxu1  ;;  %v10453_v24 = vpop.f32.mrf.mxu0  ;;  %v3389_v63 = vadd.f32 %v3388_v17, %v3342_v5  ;;  %v3426_v4 = vadd.f32 %v3425_v18, %v3411_v50  ;;  %v1716_v38 = vrot.slane %v1715_v30, 1 }
 0x1be   : > { %v10456_v43 = vpop.f32.mrf.mxu1  ;;  %v10458_v61 = vpop.f32.mrf.mxu0  ;;  %v3427_v27 = vadd.f32 %v3426_v4, %v3412_v49  ;;  %v3390_v57 = vadd.f32 %v3389_v63, %v3343_v28  ;;  %v1679_v63 = vadd.f32 %v1678_v58, %v1677_v33  ;;  %v1717_v9 = vadd.f32 %v1716_v38, %v1715_v30 }
 0x1bf   : > { %v4209_v30 = vadd.f32 %v10440_v34, %v10431_v59  ;;  %v4208_v59 = vadd.f32 %v10456_v43, %v10447_v2 }
 0x1c0   : > { %v10461_v32 = vpop.f32.mrf.mxu1  ;;  %v10463_v25 = vpop.f32.mrf.mxu0  ;;  %v3391_v6 = vadd.f32 %v3390_v57, %v3344_v7  ;;  %v3428_v37 = vadd.f32 %v3427_v27, %v3413_v15  ;;  %v4203_v27 = vadd.f32 %v10413_v20, %v10405_v54 }
 0x1c2   : > { %v10466_v48 = vpop.f32.mrf.mxu1  ;;  %v10468_v36 = vpop.f32.mrf.mxu0  ;;  %v3392_v52 = vadd.f32 %v3391_v6, %v3345_v45  ;;  %v3429_v55 = vadd.f32 %v3428_v37, %v3414_v46  ;;  %v4205_v46 = vadd.f32 %v10403_v21, %v10396_v1  ;;  %v4206_v6 = vadd.f32 %v10423_v11, %v10415_v35 }
 0x1c3   : > { %v4207_v21 = vadd.f32 %v10445_v60, %v10436_v0  ;;  %v4211_v2 = vadd.f32 %v10466_v48, %v10458_v61 }
 0x1c4   : > { %v10470_v14 = vpop.f32.mrf.mxu1  ;;  %v10472_v12 = vpop.f32.mrf.mxu0  ;;  %v3393_v19 = vrot.slane %v3392_v52, 4  ;;  %v3430_v22 = vadd.f32 %v3429_v55, %v3415_v44  ;;  %v4204_v55 = vadd.f32 %v10429_v23, %v10425_v51  ;;  %v4210_v51 = vadd.f32 %v10451_v53, %v10442_v29 }
 0x1c6   : > { %v10474_v26 = vpop.f32.mrf.mxu1  ;;  %v10476_v10 = vpop.f32.mrf.mxu0  ;;  %v3394_v40 = vadd.f32 %v3393_v19, %v3392_v52  ;;  %v3431_v7 = vrot.slane %v3430_v22, 4 }
 0x1c8   : > { %v10478_v31 = vpop.f32.mrf.mxu0  ;;  %v10480_v28 = vpop.f32.mrf.mxu1  ;;  %v3395_v45 = vrot.slane %v3394_v40, 2  ;;  %v3432_v5 = vadd.f32 %v3431_v7, %v3430_v22 }
 0x1ca   : > { %v10482_v16 = vpop.f32.mrf.mxu0  ;;  %v10484_v8 = vpop.f32.mrf.mxu1  ;;  %v3396_v39 = vadd.f32 %v3395_v45, %v3394_v40  ;;  %v3433_v13 = vrot.slane %v3432_v5, 2 }
 0x1cc   : > { %v8455_v62 = vpop.f32.mrf.mxu0  ;;  %v10486_v42 = vpop.f32.mrf.mxu1  ;;  %v3397_v50 = vrot.slane %v3396_v39, 1  ;;  %v3434_v18 = vadd.f32 %v3433_v13, %v3432_v5 }
 0x1cd   : > { %v4467_v3 = vadd.f32 %v8455_v62, %v4205_v46 }
 0x1ce   : > { %v4402_v17 = vpop.f32.mrf.mxu0  ;;  %v10488_v41 = vpop.f32.mrf.mxu1  ;;  %v3398_v49 = vadd.f32 %v3397_v50, %v3396_v39  ;;  %v3435_v4 = vrot.slane %v3434_v18, 1 }
 0x1cf   : > { %v4465_v44 = vadd.f32 %v4402_v17, %v4203_v27 }
 0x1d0   : > { %v8456_v15 = vpop.f32.mrf.mxu0  ;;  %v10492_v57 = vadd.f32 %v3398_v49, %v1679_v63  ;;  %v3436_v47 = vadd.f32 %v3435_v4, %v3434_v18 }
 0x1d1   : > { %v8479_v56 = vpop.f32.mrf.mxu1  ;;  %v4468_v19 = vadd.f32 %v8456_v15, %v4206_v6 }
 0x1d2   : > { %v4405_v37 = vpop.f32.mrf.mxu0  ;;  %v10498_v52 = vadd.f32 %v3436_v47, %v1717_v9  ;;  %v4909_v35 = vadd.f32 %v8479_v56, %v4467_v3 }
 0x1d3   : > { %v4844_v20 = vpop.f32.mrf.mxu1  ;;  %v4466_v22 = vadd.f32 %v4405_v37, %v4204_v55 }
 0x1d4   : > { %v8459_v54 = vpop.f32.mrf.mxu0  ;;  %v4907_v40 = vadd.f32 %v4844_v20, %v4465_v44  ;;  %v4979_v63 = vmul.f32 %v4909_v35, %v4909_v35  ;;  %v4213_v44 = vadd.f32 %v10461_v32, %v10453_v24 }
 0x1d5   : > { %v8480_v1 = vpop.f32.mrf.mxu1  ;;  %v4471_v62 = vadd.f32 %v8459_v54, %v4209_v30 }
 0x1d6   : > { %v4418_v33 = vpop.f32.mrf.mxu0  ;;  %v4910_v11 = vadd.f32 %v8480_v1, %v4468_v19  ;;  %v4977_v13 = vmul.f32 %v4907_v40, %v4907_v40 }
 0x1d7   : > { %v4847_v45 = vpop.f32.mrf.mxu1  ;;  %v4469_v58 = vadd.f32 %v4418_v33, %v4207_v21 }
 0x1d8   : > { %v8460_v7 = vpop.f32.mrf.mxu0  ;;  %v7910_v23 = vpack.c.bf16 %v4910_v11, %v4909_v35  ;;  %v4908_v5 = vadd.f32 %v4847_v45, %v4466_v22  ;;  %v4980_v15 = vmul.f32 %v4910_v11, %v4910_v11  ;;  %v4214_v22 = vadd.f32 %v10470_v14, %v10463_v25 }
 0x1d9   : > { %v8483_v38 = vpop.f32.mrf.mxu1  ;;  %v4472_v18 = vadd.f32 %v8460_v7, %v4210_v51  ;;  %v4212_v7 = vadd.f32 %v10474_v26, %v10468_v36 }
 0x1da   : > { %v4421_v39 = vpop.f32.mrf.mxu0  ;;  %7998 = vst [vmem:[%s10105_s28 + $0x88] sm:$0xff] %v7910_v23   ;;  %v4955_v0 = vadd.f32 %v4908_v5, %v4907_v40  ;;  %v4978_v60 = vmul.f32 %v4908_v5, %v4908_v5  ;;  %v7905_v50 = vpack.c.bf16 %v4908_v5, %v4907_v40  ;;  %v4913_v46 = vadd.f32 %v8483_v38, %v4471_v62 }
 0x1db   : > { %v4860_v34 = vpop.f32.mrf.mxu1  ;;  %v4470_v27 = vadd.f32 %v4421_v39, %v4208_v59 }
 0x1dc   : > { %v8463_v17 = vpop.f32.mrf.mxu0  ;;  %v4956_v29 = vadd.f32 %v4955_v0, %v4909_v35  ;;  %v4993_v53 = vadd.f32 %v4978_v60, %v4977_v13  ;;  %7997 = vst [vmem:[%s10105_s28 + $0x80] sm:$0xff] %v7905_v50   ;;  %v4911_v49 = vadd.f32 %v4860_v34, %v4469_v58  ;;  %v4983_v51 = vmul.f32 %v4913_v46, %v4913_v46 }
 0x1dd   : > { %v8484_v9 = vpop.f32.mrf.mxu1  ;;  %v4475_v21 = vadd.f32 %v8463_v17, %v4213_v44  ;;  %v4215_v60 = vadd.f32 %v10484_v8, %v10476_v10 }
 0x1de   : > { %v4434_v4 = vpop.f32.mrf.mxu0  ;;  %v4994_v47 = vadd.f32 %v4993_v53, %v4979_v63  ;;  %v4957_v6 = vadd.f32 %v4956_v29, %v4910_v11  ;;  %v4914_v37 = vadd.f32 %v8484_v9, %v4472_v18  ;;  %v4981_v3 = vmul.f32 %v4911_v49, %v4911_v49 }
 0x1df   : > { %v4863_v43 = vpop.f32.mrf.mxu1  ;;  %v4473_v40 = vadd.f32 %v4434_v4, %v4211_v2  ;;  %v4217_v63 = vadd.f32 %v10480_v28, %v10472_v12  ;;  %v4218_v29 = vadd.f32 %v10486_v42, %v10478_v31 }
 0x1e0   : > { %v8464_v56 = vpop.f32.mrf.mxu0  ;;  %v4958_v55 = vadd.f32 %v4957_v6, %v4911_v49  ;;  %v4995_v19 = vadd.f32 %v4994_v47, %v4980_v15  ;;  %v7920_v54 = vpack.c.bf16 %v4914_v37, %v4913_v46  ;;  %v4912_v33 = vadd.f32 %v4863_v43, %v4470_v27 }
 0x1e1   : > { %v4476_v48 = vadd.f32 %v8464_v56, %v4214_v22  ;;  %v4984_v5 = vmul.f32 %v4914_v37, %v4914_v37  ;;  %v4216_v27 = vadd.f32 %v10488_v41, %v10482_v16 }
 0x1e2   : > { %v4437_v20 = vpop.f32.mrf.mxu0  ;;  %v4996_v1 = vadd.f32 %v4995_v19, %v4981_v3  ;;  %8000 = vst [vmem:[%s10105_s28 + $0x98] sm:$0xff] %v7920_v54   ;;  %v8487_v35 = vpop.f32.mrf.mxu1  ;;  %v4959_v32 = vadd.f32 %v4958_v55, %v4912_v33  ;;  %v4982_v11 = vmul.f32 %v4912_v33, %v4912_v33  ;;  %v7915_v61 = vpack.c.bf16 %v4912_v33, %v4911_v49 }
 0x1e3   : > { %v4474_v39 = vadd.f32 %v4437_v20, %v4212_v7  ;;  %v4917_v62 = vadd.f32 %v8487_v35, %v4475_v21 }
 0x1e4   : > { %v8467_v24 = vpop.f32.mrf.mxu0  ;;  %v4876_v30 = vpop.f32.mrf.mxu1  ;;  %v4960_v23 = vadd.f32 %v4959_v32, %v4913_v46  ;;  %v4997_v25 = vadd.f32 %v4996_v1, %v4982_v11  ;;  %7999 = vst [vmem:[%s10105_s28 + $0x90] sm:$0xff] %v7915_v61  }
 0x1e5   : > { %v4915_v14 = vadd.f32 %v4876_v30, %v4473_v40  ;;  %v4479_v47 = vadd.f32 %v8467_v24, %v4217_v63  ;;  %v4987_v6 = vmul.f32 %v4917_v62, %v4917_v62 }
 0x1e6   : > { %v4450_v45 = vpop.f32.mrf.mxu0  ;;  %v8488_v58 = vpop.f32.mrf.mxu1  ;;  %v4998_v13 = vadd.f32 %v4997_v25, %v4983_v51  ;;  %v4961_v38 = vadd.f32 %v4960_v23, %v4914_v37  ;;  %v8928_v25 = vmov 0.0  }
 0x1e7   : > { %v4918_v0 = vadd.f32 %v8488_v58, %v4476_v48  ;;  %v4985_v18 = vmul.f32 %v4915_v14, %v4915_v14  ;;  %v4477_v49 = vadd.f32 %v4450_v45, %v4215_v60  ;;  %6813 = vst [vmem:[%s10535_s30] sm:$0xff] %v8928_v25 }
 0x1e8   : > { %v4879_v50 = vpop.f32.mrf.mxu1  ;;  %v8468_v36 = vpop.f32.mrf.mxu0  ;;  %v4962_v26 = vadd.f32 %v4961_v38, %v4915_v14  ;;  %v4999_v17 = vadd.f32 %v4998_v13, %v4984_v5 }
 0x1e9   : > { %v7930_v59 = vpack.c.bf16 %v4918_v0, %v4917_v62  ;;  %v4916_v34 = vadd.f32 %v4879_v50, %v4474_v39  ;;  %v4480_v46 = vadd.f32 %v8468_v36, %v4218_v29  ;;  %v4988_v56 = vmul.f32 %v4918_v0, %v4918_v0 }
 0x1ea   : > { %v5000_v53 = vadd.f32 %v4999_v17, %v4985_v18  ;;  %v4453_v9 = vpop.f32.mrf.mxu0 }
 0x1eb   : > { %8002 = vst [vmem:[%s10105_s28 + $0xa8] sm:$0xff] %v7930_v59   ;;  %v4963_v4 = vadd.f32 %v4962_v26, %v4916_v34  ;;  %v4986_v15 = vmul.f32 %v4916_v34, %v4916_v34  ;;  %v7925_v10 = vpack.c.bf16 %v4916_v34, %v4915_v14  ;;  %v4478_v42 = vadd.f32 %v4453_v9, %v4216_v27 }
 0x1ec   : > { %v8491_v8 = vpop.f32.mrf.mxu1 }
 0x1ed   : > { %v4964_v37 = vadd.f32 %v4963_v4, %v4917_v62  ;;  %v5001_v12 = vadd.f32 %v5000_v53, %v4986_v15  ;;  %8001 = vst [vmem:[%s10105_s28 + $0xa0] sm:$0xff] %v7925_v10   ;;  %v4921_v55 = vadd.f32 %v8491_v8, %v4479_v47 }
 0x1ee   : > { %v4892_v28 = vpop.f32.mrf.mxu1 }
 0x1ef   : > { %v4919_v31 = vadd.f32 %v4892_v28, %v4477_v49  ;;  %v5002_v44 = vadd.f32 %v5001_v12, %v4987_v6  ;;  %v4965_v2 = vadd.f32 %v4964_v37, %v4918_v0  ;;  %v4991_v24 = vmul.f32 %v4921_v55, %v4921_v55 }
 0x1f0   : > { %v8492_v43 = vpop.f32.mrf.mxu1 }
 0x1f1   : > { %v4922_v3 = vadd.f32 %v8492_v43, %v4480_v46  ;;  %v4966_v19 = vadd.f32 %v4965_v2, %v4919_v31  ;;  %v4989_v16 = vmul.f32 %v4919_v31, %v4919_v31  ;;  %v5003_v41 = vadd.f32 %v5002_v44, %v4988_v56 }
 0x1f2   : > { %v4895_v54 = vpop.f32.mrf.mxu1 }
 0x1f3   : > { %v7940_v20 = vpack.c.bf16 %v4922_v3, %v4921_v55  ;;  %v4920_v22 = vadd.f32 %v4895_v54, %v4478_v42  ;;  %v5004_v33 = vadd.f32 %v5003_v41, %v4989_v16  ;;  %v4992_v7 = vmul.f32 %v4922_v3, %v4922_v3 }
 0x1f5   : > { %8004 = vst [vmem:[%s10105_s28 + $0xb8] sm:$0xff] %v7940_v20   ;;  %v4967_v40 = vadd.f32 %v4966_v19, %v4920_v22  ;;  %v4990_v1 = vmul.f32 %v4920_v22, %v4920_v22  ;;  %v7935_v21 = vpack.c.bf16 %v4920_v22, %v4919_v31 }
 0x1f6   : > { %v8527_v35 = vpop.f32.mrf.mxu1 }
 0x1f7   : > { %v4968_v32 = vadd.f32 %v4967_v40, %v4921_v55  ;;  %v5005_v11 = vadd.f32 %v5004_v33, %v4990_v1  ;;  %8003 = vst [vmem:[%s10105_s28 + $0xb0] sm:$0xff] %v7935_v21   ;;  %v8503_v61 = vpop.f32.mrf.mxu0 }
 0x1f8   : > { %v5789_v48 = vpop.f32.mrf.mxu1  ;;  %v5854_v41 = vadd.f32 %v8527_v35, %v8503_v61 }
 0x1f9   : > { %v4969_v30 = vadd.f32 %v4968_v32, %v4922_v3  ;;  %v5006_v45 = vadd.f32 %v5005_v11, %v4991_v24  ;;  %v5459_v51 = vpop.f32.mrf.mxu0 }
 0x1fa   : > { %v8528_v23 = vpop.f32.mrf.mxu1  ;;  %v5852_v22 = vadd.f32 %v5789_v48, %v5459_v51 }
 0x1fb   : > { %v4970_v14 = vrot.slane %v4969_v30, 4  ;;  %v5007_v5 = vadd.f32 %v5006_v45, %v4992_v7  ;;  %v8504_v58 = vpop.f32.mrf.mxu0 }
 0x1fc   : > { %v5792_v62 = vpop.f32.mrf.mxu1  ;;  %v5855_v33 = vadd.f32 %v8528_v23, %v8504_v58 }
 0x1fd   : > { %v4971_v39 = vadd.f32 %v4970_v14, %v4969_v30  ;;  %v5008_v13 = vrot.slane %v5007_v5, 4  ;;  %v5462_v60 = vpop.f32.mrf.mxu0 }
 0x1fe   : > { %v5853_v24 = vadd.f32 %v5792_v62, %v5462_v60 }
 0x1ff   : > { %v4972_v38 = vrot.slane %v4971_v39, 2  ;;  %v5009_v0 = vadd.f32 %v5008_v13, %v5007_v5 }
 0x201   : > { %v4973_v50 = vadd.f32 %v4972_v38, %v4971_v39  ;;  %v5010_v36 = vrot.slane %v5009_v0, 2 }
 0x203   : > { %v4974_v18 = vrot.slane %v4973_v50, 1  ;;  %v5011_v17 = vadd.f32 %v5010_v36, %v5009_v0 }
 0x204   : > { %v8531_v26 = vpop.f32.mrf.mxu1 }
 0x205   : > { %v4975_v63 = vadd.f32 %v4974_v18, %v4973_v50  ;;  %v5012_v29 = vrot.slane %v5011_v17, 1 }
 0x206   : > { %v8507_v59 = vpop.f32.mrf.mxu0  ;;  %v5805_v34 = vpop.f32.mrf.mxu1 }
 0x207   : > { %v10539_v4 = vadd.f32 %v4975_v63, %v10492_v57  ;;  %v5013_v15 = vadd.f32 %v5012_v29, %v5011_v17  ;;  %v5858_v62 = vadd.f32 %v8531_v26, %v8507_v59 }
 0x208   : > { %v5475_v53 = vpop.f32.mrf.mxu0  ;;  %v8532_v49 = vpop.f32.mrf.mxu1 }
 0x209   : > { %v10542_v8 = vadd.f32 %v5013_v15, %v10498_v52  ;;  %v5856_v0 = vadd.f32 %v5805_v34, %v5475_v53 }
 0x20a   : > { %v8508_v10 = vpop.f32.mrf.mxu0  ;;  %v5808_v9 = vpop.f32.mrf.mxu1 }
 0x20b   : > { %v5859_v17 = vadd.f32 %v8532_v49, %v8508_v10 }
 0x20c   : > { %v5478_v27 = vpop.f32.mrf.mxu0 }
 0x210   : > { %v10544_v47 = vpop.f32.mrf.mxu1 }
 0x211   : > { %v10546_v46 = vpop.f32.mrf.mxu0 }
 0x212   : > { %v10548_v6 = vpop.f32.mrf.mxu1 }
 0x213   : > { %v10550_v37 = vpop.f32.mrf.mxu0 }
 0x214   : > { %v10554_v28 = vpop.f32.mrf.mxu1 }
 0x215   : > { %v10552_v12 = vpop.f32.mrf.mxu0 }
 0x216   : > { %v10558_v31 = vpop.f32.mrf.mxu1 }
 0x217   : > { %v10556_v57 = vpop.f32.mrf.mxu0 }
 0x21d   : > { %v10560_v52 = vpop.f32.mrf.mxu0  ;;  %v10562_v42 = vpop.f32.mrf.mxu1 }
 0x21f   : > { %v10564_v56 = vpop.f32.mrf.mxu0  ;;  %v10566_v44 = vpop.f32.mrf.mxu1 }
 0x221   : > { %v10568_v2 = vpop.f32.mrf.mxu1  ;;  %v10570_v43 = vpop.f32.mrf.mxu0 }
 0x223   : > { %v10572_v55 = vpop.f32.mrf.mxu1  ;;  %v10574_v3 = vpop.f32.mrf.mxu0 }
 0x22a   : > { %v8575_v19 = vpop.f32.mrf.mxu1 }
 0x22b   : > { %v8551_v16 = vpop.f32.mrf.mxu0 }
 0x22c   : > { %v6561_v54 = vpop.f32.mrf.mxu1  ;;  %v6296_v40 = vadd.f32 %v8551_v16, %v5854_v41  ;;  %v5857_v41 = vadd.f32 %v5808_v9, %v5478_v27 }
 0x22d   : > { %v6231_v20 = vpop.f32.mrf.mxu0 }
 0x22e   : > { %v8576_v21 = vpop.f32.mrf.mxu1  ;;  %v6294_v32 = vadd.f32 %v6231_v20, %v5852_v22  ;;  %v6626_v30 = vadd.f32 %v8575_v19, %v6296_v40 }
 0x22f   : > { %v8552_v1 = vpop.f32.mrf.mxu0 }
 0x230   : > { %v6297_v11 = vadd.f32 %v8552_v1, %v5855_v33  ;;  %v6564_v14 = vpop.f32.mrf.mxu1  ;;  %v6624_v5 = vadd.f32 %v6561_v54, %v6294_v32  ;;  %v6696_v50 = vmul.f32 %v6626_v30, %v6626_v30 }
 0x231   : > { %v6234_v7 = vpop.f32.mrf.mxu0 }
 0x232   : > { %v6627_v45 = vadd.f32 %v8576_v21, %v6297_v11  ;;  %v6295_v25 = vadd.f32 %v6234_v7, %v5853_v24  ;;  %v6694_v51 = vmul.f32 %v6624_v5, %v6624_v5 }
 0x234   : > { %v7950_v39 = vpack.c.bf16 %v6627_v45, %v6626_v30  ;;  %v6625_v35 = vadd.f32 %v6564_v14, %v6295_v25  ;;  %v6697_v20 = vmul.f32 %v6627_v45, %v6627_v45 }
 0x236   : > { %8006 = vst [vmem:[%s10105_s28 + $0xc8] sm:$0xff] %v7950_v39   ;;  %v7945_v61 = vpack.c.bf16 %v6625_v35, %v6624_v5  ;;  %v6695_v48 = vmul.f32 %v6625_v35, %v6625_v35  ;;  %v6672_v23 = vadd.f32 %v6625_v35, %v6624_v5  ;;  %v5862_v5 = vadd.f32 %v10544_v47, %v10546_v46 }
 0x237   : > { %v5860_v39 = vadd.f32 %v10548_v6, %v10550_v37 }
 0x238   : > { %8005 = vst [vmem:[%s10105_s28 + $0xc0] sm:$0xff] %v7945_v61   ;;  %v6710_v13 = vadd.f32 %v6695_v48, %v6694_v51  ;;  %v6673_v36 = vadd.f32 %v6672_v23, %v6626_v30  ;;  %v5863_v51 = vadd.f32 %v10554_v28, %v10552_v12 }
 0x23a   : > { %v8579_v58 = vpop.f32.mrf.mxu1  ;;  %v6711_v15 = vadd.f32 %v6710_v13, %v6696_v50  ;;  %v6674_v33 = vadd.f32 %v6673_v36, %v6627_v45 }
 0x23b   : > { %v8555_v38 = vpop.f32.mrf.mxu0 }
 0x23c   : > { %v6577_v60 = vpop.f32.mrf.mxu1  ;;  %v6300_v63 = vadd.f32 %v8555_v38, %v5858_v62  ;;  %v6712_v53 = vadd.f32 %v6711_v15, %v6697_v20 }
 0x23d   : > { %v6247_v18 = vpop.f32.mrf.mxu0 }
 0x23e   : > { %v6298_v29 = vadd.f32 %v6247_v18, %v5856_v0  ;;  %v8580_v16 = vpop.f32.mrf.mxu1  ;;  %v6630_v26 = vadd.f32 %v8579_v58, %v6300_v63 }
 0x23f   : > { %v8556_v19 = vpop.f32.mrf.mxu0 }
 0x240   : > { %v6301_v54 = vadd.f32 %v8556_v19, %v5859_v17  ;;  %v6628_v22 = vadd.f32 %v6577_v60, %v6298_v29  ;;  %v6580_v1 = vpop.f32.mrf.mxu1  ;;  %v6700_v25 = vmul.f32 %v6630_v26, %v6630_v26  ;;  %v5861_v60 = vadd.f32 %v10558_v31, %v10556_v57 }
 0x241   : > { %v6250_v40 = vpop.f32.mrf.mxu0 }
 0x242   : > { %v6631_v59 = vadd.f32 %v8580_v16, %v6301_v54  ;;  %v6299_v34 = vadd.f32 %v6250_v40, %v5857_v41  ;;  %v6675_v10 = vadd.f32 %v6674_v33, %v6628_v22  ;;  %v6698_v24 = vmul.f32 %v6628_v22, %v6628_v22 }
 0x243   : > { %v5864_v40 = vadd.f32 %v10566_v44, %v10564_v56 }
 0x244   : > { %v7960_v21 = vpack.c.bf16 %v6631_v59, %v6630_v26  ;;  %v6629_v49 = vadd.f32 %v6580_v1, %v6299_v34  ;;  %v6713_v11 = vadd.f32 %v6712_v53, %v6698_v24  ;;  %v6701_v13 = vmul.f32 %v6631_v59, %v6631_v59 }
 0x245   : > { %v5867_v1 = vadd.f32 %v10568_v2, %v10570_v43 }
 0x246   : > { %8008 = vst [vmem:[%s10105_s28 + $0xd8] sm:$0xff] %v7960_v21   ;;  %v7955_v32 = vpack.c.bf16 %v6629_v49, %v6628_v22  ;;  %v6699_v7 = vmul.f32 %v6629_v49, %v6629_v49  ;;  %v6676_v9 = vadd.f32 %v6675_v10, %v6629_v49  ;;  %v5866_v22 = vadd.f32 %v10562_v42, %v10560_v52 }
 0x247   : > { %v5865_v52 = vadd.f32 %v10572_v55, %v10574_v3 }
 0x248   : > { %8007 = vst [vmem:[%s10105_s28 + $0xd0] sm:$0xff] %v7955_v32   ;;  %v6714_v27 = vadd.f32 %v6713_v11, %v6699_v7  ;;  %v6677_v45 = vadd.f32 %v6676_v9, %v6630_v26 }
 0x24a   : > { %v6715_v61 = vadd.f32 %v6714_v27, %v6700_v25  ;;  %v6678_v38 = vadd.f32 %v6677_v45, %v6631_v59 }
 0x24c   : > { %v8583_v30 = vpop.f32.mrf.mxu1  ;;  %v6716_v6 = vadd.f32 %v6715_v61, %v6701_v13 }
 0x24d   : > { %v8559_v14 = vpop.f32.mrf.mxu0 }
 0x24e   : > { %v6593_v35 = vpop.f32.mrf.mxu1  ;;  %v6304_v23 = vadd.f32 %v8559_v14, %v5862_v5 }
 0x24f   : > { %v6263_v48 = vpop.f32.mrf.mxu0 }
 0x250   : > { %v6302_v58 = vadd.f32 %v6263_v48, %v5860_v39  ;;  %v8584_v0 = vpop.f32.mrf.mxu1  ;;  %v6634_v50 = vadd.f32 %v8583_v30, %v6304_v23 }
 0x251   : > { %v8560_v62 = vpop.f32.mrf.mxu0 }
 0x252   : > { %v6632_v47 = vadd.f32 %v6593_v35, %v6302_v58  ;;  %v6305_v46 = vadd.f32 %v8560_v62, %v5863_v51  ;;  %v6596_v28 = vpop.f32.mrf.mxu1  ;;  %v6704_v31 = vmul.f32 %v6634_v50, %v6634_v50 }
 0x253   : > { %v6266_v37 = vpop.f32.mrf.mxu0 }
 0x254   : > { %v6635_v36 = vadd.f32 %v8584_v0, %v6305_v46  ;;  %v6303_v18 = vadd.f32 %v6266_v37, %v5861_v60  ;;  %v6679_v17 = vadd.f32 %v6678_v38, %v6632_v47  ;;  %v6702_v12 = vmul.f32 %v6632_v47, %v6632_v47 }
 0x256   : > { %v7970_v63 = vpack.c.bf16 %v6635_v36, %v6634_v50  ;;  %v6633_v29 = vadd.f32 %v6596_v28, %v6303_v18  ;;  %v6717_v15 = vadd.f32 %v6716_v6, %v6702_v12  ;;  %v6705_v21 = vmul.f32 %v6635_v36, %v6635_v36 }
 0x258   : > { %8010 = vst [vmem:[%s10105_s28 + $0xe8] sm:$0xff] %v7970_v63   ;;  %v6703_v19 = vmul.f32 %v6633_v29, %v6633_v29  ;;  %v7965_v16 = vpack.c.bf16 %v6633_v29, %v6632_v47  ;;  %v6680_v41 = vadd.f32 %v6679_v17, %v6633_v29 }
 0x25a   : > { %8009 = vst [vmem:[%s10105_s28 + $0xe0] sm:$0xff] %v7965_v16   ;;  %v6718_v57 = vadd.f32 %v6717_v15, %v6703_v19  ;;  %v6681_v54 = vadd.f32 %v6680_v41, %v6634_v50 }
 0x25c   : > { %v6719_v26 = vadd.f32 %v6718_v57, %v6704_v31  ;;  %v6682_v10 = vadd.f32 %v6681_v54, %v6635_v36 }
 0x25d   : > { %v8587_v20 = vpop.f32.mrf.mxu1 }
 0x25e   : > { %v8563_v33 = vpop.f32.mrf.mxu0  ;;  %v6720_v11 = vadd.f32 %v6719_v26, %v6705_v21 }
 0x25f   : > { %v6609_v59 = vpop.f32.mrf.mxu1  ;;  %v6308_v34 = vadd.f32 %v8563_v33, %v5866_v22 }
 0x260   : > { %v6279_v53 = vpop.f32.mrf.mxu0 }
 0x261   : > { %v6306_v49 = vadd.f32 %v6279_v53, %v5864_v40  ;;  %v8588_v32 = vpop.f32.mrf.mxu1  ;;  %v6638_v56 = vadd.f32 %v8587_v20, %v6308_v34 }
 0x262   : > { %v8564_v24 = vpop.f32.mrf.mxu0 }
 0x263   : > { %v6636_v42 = vadd.f32 %v6609_v59, %v6306_v49  ;;  %v6309_v7 = vadd.f32 %v8564_v24, %v5867_v1  ;;  %v6612_v2 = vpop.f32.mrf.mxu1  ;;  %v6708_v61 = vmul.f32 %v6638_v56, %v6638_v56 }
 0x264   : > { %v6282_v44 = vpop.f32.mrf.mxu0 }
 0x265   : > { %v6683_v9 = vadd.f32 %v6682_v10, %v6636_v42  ;;  %v6706_v27 = vmul.f32 %v6636_v42, %v6636_v42  ;;  %v6639_v30 = vadd.f32 %v8588_v32, %v6309_v7  ;;  %v6307_v25 = vadd.f32 %v6282_v44, %v5865_v52 }
 0x267   : > { %v6721_v43 = vadd.f32 %v6720_v11, %v6706_v27  ;;  %v7980_v45 = vpack.c.bf16 %v6639_v30, %v6638_v56  ;;  %v6637_v14 = vadd.f32 %v6612_v2, %v6307_v25  ;;  %v6709_v48 = vmul.f32 %v6639_v30, %v6639_v30 }
 0x269   : > { %8012 = vst [vmem:[%s10105_s28 + $0xf8] sm:$0xff] %v7980_v45   ;;  %v6684_v5 = vadd.f32 %v6683_v9, %v6637_v14  ;;  %v6707_v39 = vmul.f32 %v6637_v14, %v6637_v14  ;;  %v7975_v35 = vpack.c.bf16 %v6637_v14, %v6636_v42 }
 0x26b   : > { %v6685_v55 = vadd.f32 %v6684_v5, %v6638_v56  ;;  %v6722_v3 = vadd.f32 %v6721_v43, %v6707_v39  ;;  %8011 = vst [vmem:[%s10105_s28 + $0xf0] sm:$0xff] %v7975_v35  }
 0x26d   : > { %v6686_v51 = vadd.f32 %v6685_v55, %v6639_v30  ;;  %v6723_v23 = vadd.f32 %v6722_v3, %v6708_v61 }
 0x26f   : > { %v6687_v58 = vrot.slane %v6686_v51, 4  ;;  %v6724_v13 = vadd.f32 %v6723_v23, %v6709_v48 }
 0x271   : > { %v6688_v38 = vadd.f32 %v6687_v58, %v6686_v51  ;;  %v6725_v62 = vrot.slane %v6724_v13, 4 }
 0x273   : > { %v6689_v0 = vrot.slane %v6688_v38, 2  ;;  %v6726_v60 = vadd.f32 %v6725_v62, %v6724_v13 }
 0x275   : > { %v6690_v47 = vadd.f32 %v6689_v0, %v6688_v38  ;;  %v6727_v46 = vrot.slane %v6726_v60, 2 }
 0x277   : > { %v6691_v6 = vrot.slane %v6690_v47, 1  ;;  %v6728_v37 = vadd.f32 %v6727_v46, %v6726_v60 }
 0x279   : > { %v6692_v50 = vadd.f32 %v6691_v6, %v6690_v47  ;;  %v6729_v36 = vrot.slane %v6728_v37, 1 }
 0x27b   : > { %v6693_v18 = vadd.f32 %v6692_v50, %v10539_v4  ;;  %v6730_v17 = vadd.f32 %v6729_v36, %v6728_v37 }
 0x27d   : > { %v6731_v12 = vadd.f32 %v6730_v17, %v10542_v8  ;;  %6814 = vst [vmem:[%s10535_s30] sm:$0x1] %v6693_v18 }
 0x27f   : > { %6815 = vst [vmem:[%s10535_s30 + $0x1] sm:$0x1] %v6731_v12 }
 0x280   : > { %s7821_s6 = sshll.u32 %s8914_s15, 10  ;;  %s6847_s7 = sshll.u32 %s10105_s28, 4  ;;  %s6848_s7 = int_to_ptr.vmem [resolvable:$true] %s6847_s7 }
 0x281   : > { %s6836_s10 = scalar_lea.hbm %s10668_s2, %s7821_s6  ;;  %s8929_s11 = smov 1024  }
 0x282   : > { %p10764_p4 = scmp.ne.s32.totalorder %s10671_s22, 0  ;;  %s8930_s18 = smov 2048  }
 0x283   : > { %s8931_s19 = smov 16   ;;  %s8932_s21 = smov 64  }
 0x284   : > { %8597 = sst [smem:[#allocation12]] (%p10764_p4), %s8929_s11  ;;  %s8933_s23 = smov 4  }
 0x285   : > { %8598 = sst [smem:[#allocation12 + $0x1]] (%p10764_p4), %s8930_s18  ;;  %s8934_s27 = smov 131072  }
 0x286   : > { %8599 = sst [smem:[#allocation12 + $0x2]] (%p10764_p4), %s8931_s19  ;;  %s8935_s28 = smov 0  }
 0x287   : > { %8600 = sst [smem:[#allocation12 + $0x3]] (%p10764_p4), %s8932_s21  ;;  %s7753_s29 = sshll.u32 %s8914_s15, 7 }
 0x288   : > { %8601 = sst [smem:[#allocation12 + $0x4]] (%p10764_p4), %s8932_s21  ;;  %s6878_s6 = sshll.u32 %s10535_s30, 4  ;;  %s6879_s6 = int_to_ptr.vmem [resolvable:$true] %s6878_s6 }
 0x289   : > { %8602 = sst [smem:[#allocation12 + $0x5]] (%p10764_p4), %s8933_s23  ;;  %s6876_s11 = scalar_lea.hbm %s10669_s3, %s7753_s29 }
 0x28a   : > { %8603 = dma.general (%p10764_p4), %s6848_s7, 4096, %s6836_s10, %s6817_s4, %s8934_s27, [#allocation12], %s8935_s28, 0  }
 0x28b   : > { %s8834_s18 = scalar_lea.vmem %s6879_s6, 128  ;;  %s8936_s19 = smov [#allocation9]  }
 0x28c   : > { %p8835_p8 = scmp.ne.s32.totalorder %s6879_s6, %s8834_s18  ;;  %s8838_s21 = sshll.u32 %s8936_s19, 4  ;;  %s8839_s21 = int_to_ptr.vmem [resolvable:$false] %s8838_s21 }
 0x28d   : > { %s8840_s23 = scalar_lea.vmem %s8839_s21, 256  ;;  %p8841_p13 = scmp.lt.s32.totalorder %s6879_s6, %s8839_s21 }
 0x28e   : > { %p8836_p10 = pnand %p8835_p8, %p10764_p4  ;;  %p8842_p0 = scmp.lt.s32.totalorder %s8840_s23, %s8834_s18 }
 0x290   : > { %p8837_p11 = pneg %p8836_p10  ;;  %p8843_p6 = por %p8842_p0, %p8841_p13 }
 0x292   : > { %p8844_p7 = pnand %p8843_p6, %p8837_p11 }
 0x294   : > { %8847 = shalt.err (!%p8844_p7)
}
 0x295   : > { %s8848_s15 = scalar_lea.hbm %s6876_s11, 128  ;;  %s8852_s7 = scalar_lea.hbm %s10669_s3, 256 }
 0x296   : > { %p8849_p9 = scmp.ne.s32.totalorder %s6876_s11, %s8848_s15  ;;  %p8853_p2 = scmp.lt.s32.totalorder %s6876_s11, %s10669_s3 }
 0x297   : > { %p8854_p5 = scmp.lt.s32.totalorder %s8852_s7, %s8848_s15 }
 0x298   : > { %p8850_p12 = pnand %p8849_p9, %p10764_p4 }
 0x299   : > { %p8855_p3 = por %p8854_p5, %p8853_p2 }
 0x29a   : > { %p8851_p1 = pneg %p8850_p12 }
 0x29c   : > { %p8856_p8 = pnand %p8855_p3, %p8851_p1 }
 0x29e   : > { %8859 = shalt.err (!%p8856_p8)
}
 0x29f   : > { %8604 = dma.vmem_to_hbm [thread:$0]  (%p10764_p4), %s6879_s6, 128, %s6876_s11, %s6822_s5  }
 0x2a0 PF: > { %p8625_p10 = scmp.ge.s32.totalorder %s8922_s17, 2  ;;  %s6890_s28 = sand.u32 1, %s8902_s12  }
 0x2a1   : > { %p10765_p11 = scmp.ne.s32.totalorder %s10672_s24, 0  ;;  %s6891_s29 = scalar_lea.sflag [#allocation5], %s6890_s28 }
 0x2a3   : > { %p8615_p13 = pnand %p8625_p10, %p10765_p11 }
 0x2a5   : > { %p8616_p0 = pneg %p8615_p13 }
 0x2a7   : > { %8893 = dma.done.wait (%p8616_p0), %s6891_s29, 4096  }
 0x2a8   : > { %8895 = vsyncadd (%p8616_p0), %s6891_s29, 4294963200  ;;  %s6900_s8 = scalar_lea.sflag [#allocation10], %s6890_s28 }
 0x2a9   : > { %8897 = dma.done.wait (%p8616_p0), %s6900_s8, 128  }
 0x2aa   : > { %8899 = vsyncadd (%p8616_p0), %s6900_s8, 4294967168  ;;  %s22_s17 = sadd.s32 1, %s8922_s17   ;;  %s10766_s12 = smov %s8906_s13 }
 0x2ab   : > { %p19_p6 = scmp.ge.s32.totalorder %s22_s17, 4   ;;  %s10767_s13 = smov %s8910_s14 }
 0x2ac   : > { %s10768_s14 = smov %s9010_s25  ;;  %s10769_s15 = smov %s8918_s16 }
 0x2ad   : > { %s10770_s16 = smov %s10772_s20  ;;  %21 = sbr.rel (!%p19_p6) target bundleno = 8 (0x8), region = 113 }
 0x2b2   :  { %6905 = vsyncpa [#allocation4], 1 }
 0x2b3   :  { %6907 = vsyncpa [#allocation4 + $0x1], 1 }
 0x2b4   :  { %6908 = vsyncpa [#allocation7], 1 }
 0x2b5   :  { %6909 = vsyncpa [#allocation5], 1 }
 0x2b6   :  { %6911 = vsyncpa [#allocation5 + $0x1], 1 }
 0x2b7   :  { %6912 = vsyncpa [#allocation10], 1 }
 0x2b8   :  { %6914 = vsyncpa [#allocation10 + $0x1], 1 }

</bundles_post_ra>
